<compile_context>
chip_gen: v5e
topology: v5e:2x2
jax: 0.10.0
libtpu: 0.0.40
codegen_flags: <defaults>
</compile_context>

<pallas_src>
import functools
import math

import numpy as np
import jax
import jax.numpy as jnp
from jax.experimental import pallas as pl
from jax.experimental.pallas import tpu as pltpu


# ----------------------------------------------------------------------------
# Fused kernel: mbstd -> conv3x3(+bias,lrelu,sqrt2) -> fc(+bias,lrelu,sqrt2)
#               -> out(linear) -> cmap projection
# ----------------------------------------------------------------------------

def _fused_base_b4_kernel(x2_ref, xhw_ref, wall_ref, wstd_ref, convb_ref,
                          wfc_ref, fcb_ref, wout_ref, outb_ref, cmap_ref,
                          pmat_ref, tmask_ref, o_ref,
                          *, N, H, W, C, cmap_dim, alpha, mxu_dtype):
    HW = H * W
    f32 = jnp.float32
    cast = (lambda a: a.astype(mxu_dtype)) if mxu_dtype is not None else (lambda a: a)
    act_gain = math.sqrt(2.0)                     # lrelu def_gain

    # ---- MinibatchStdLayer (group_size encoded in pmat, num_channels=1) -------
    x2 = x2_ref[...]                              # [N, H*W*C] lane-dense
    pmat = pmat_ref[...]                          # [N, N] group-average projector
    mean = jnp.dot(pmat, x2, preferred_element_type=f32)
    d = x2 - mean
    var = jnp.dot(pmat, d * d, preferred_element_type=f32)
    std = jnp.sqrt(var + 1e-8)
    stat = jnp.sum(std, axis=1, keepdims=True) * (1.0 / (H * W * C))   # [N, 1]
    std_col = jnp.tile(stat, (HW, 1))             # [HW*N, 1]; row m -> sample m % N

    # ---- Conv2dLayer 3x3, pad=1: one fat GEMM + 9 masked aligned row shifts ----
    conv_gain = 1.0 / math.sqrt((C + 1) * 9)      # weight_gain, fan-in = (C+1)*3*3
    z = jnp.dot(cast(xhw_ref[...]), cast(wall_ref[...]),
                preferred_element_type=f32)       # [HW*N, 9*C]
    tmask = tmask_ref[...]                        # [HW*N, 9] tap validity (0/1)
    acc = jnp.zeros((HW * N, C), f32)
    for t in range(9):
        dp, dq = t // 3 - 1, t % 3 - 1
        delta = (dp * W + dq) * N                 # uniform row shift (hw-major rows)
        zt = z[:, t * C:(t + 1) * C]              # [HW*N, C]
        if delta > 0:
            zt = jnp.concatenate(
                [zt[delta:, :], jnp.zeros((delta, C), f32)], axis=0)
        elif delta < 0:
            zt = jnp.concatenate(
                [jnp.zeros((-delta, C), f32), zt[:delta, :]], axis=0)
        acc = acc + zt * tmask[:, t:t + 1]
    # std channel is spatially constant per sample -> exact rank-1 correction.
    ctab = jnp.dot(tmask, wstd_ref[...], preferred_element_type=f32)   # [HW*N, C]
    acc = acc + std_col * ctab
    y = acc * conv_gain + convb_ref[...]
    convact = jnp.where(y >= 0.0, y, y * alpha) * act_gain             # [HW*N, C]

    # ---- FullyConnectedLayer fc (C*H*W -> C, lrelu): consume conv out in place --
    fc_gain = 1.0 / math.sqrt(C * HW)
    h1 = jnp.zeros((N, C), f32)
    for hw in range(HW):
        blk = convact[hw * N:(hw + 1) * N, :]                          # [N, C]
        wblk = wfc_ref[hw * C:(hw + 1) * C, :]                         # [C, C]
        h1 = h1 + jnp.dot(cast(blk), cast(wblk), preferred_element_type=f32)
    h1 = h1 * fc_gain + fcb_ref[...]
    h1 = jnp.where(h1 >= 0.0, h1, h1 * alpha) * act_gain               # [N, C]

    # ---- FullyConnectedLayer out (linear) + fused cmap projection --------------
    out_gain = 1.0 / math.sqrt(C)
    o = jnp.dot(cast(h1), cast(wout_ref[...]), preferred_element_type=f32)
    o = o * out_gain + outb_ref[...]                                   # [N, cmap_dim]
    res = jnp.sum(o * cmap_ref[...], axis=1, keepdims=True)
    o_ref[...] = (res * (1.0 / math.sqrt(cmap_dim))).astype(o_ref.dtype)


# ----------------------------------------------------------------------------
# Wrapper: trace-time layout prep (weights / constant masks) + one pallas_call
# ----------------------------------------------------------------------------

def base_b4_forward(x_nchw, cmap, params, *, cmap_dim, mbstd_group_size=4,
                    mxu_dtype=None):
    # TODO(synk): architecture='skip' fromrgb path and mbstd_num_channels>1 are not
    #             implemented (module defaults 'resnet'/num_channels=1 covered);
    #             conv_clamp is None in this config so no clamp is emitted.
    assert cmap is not None
    N, C, H, W = x_nchw.shape
    HW = H * W
    G = min(mbstd_group_size, N) if mbstd_group_size is not None else N
    assert N % G == 0
    M = N // G

    x = x_nchw.astype(jnp.float32)
    x_nhwc = jnp.transpose(x, (0, 2, 3, 1))                     # [N,H,W,C]
    x2 = x_nhwc.reshape(N, HW * C)                              # lane-dense, for mbstd
    xhw = jnp.transpose(x_nhwc, (1, 2, 0, 3)).reshape(HW * N, C)  # hw-major conv rows

    conv_w = params["conv_w"].astype(jnp.float32)               # [C, C+1, 3, 3]
    wall = jnp.transpose(conv_w[:, :C], (1, 2, 3, 0)).reshape(C, 9 * C)
    wstd = jnp.transpose(conv_w[:, C], (1, 2, 0)).reshape(9, C)
    convb = params["conv_b"].astype(jnp.float32).reshape(1, C)
    # fc weight rows permuted from NCHW-flatten order to (hw, c_out_conv) order.
    wfc = params["fc_w"].astype(jnp.float32).reshape(C, C, HW)
    wfc = jnp.transpose(wfc, (2, 1, 0)).reshape(HW * C, C)
    fcb = params["fc_b"].astype(jnp.float32).reshape(1, C)
    wout = jnp.transpose(params["out_w"].astype(jnp.float32))   # [C, cmap_dim]
    outb = params["out_b"].astype(jnp.float32).reshape(1, cmap_dim)
    cmapf = cmap.astype(jnp.float32)

    # Constant selector / mask matrices (trace-time numpy -> embedded constants).
    hw_idx = np.arange(HW * N) // N
    h_idx, w_idx = hw_idx // W, hw_idx % W
    tmask = np.zeros((HW * N, 9), np.float32)
    for t in range(9):
        dp, dq = t // 3 - 1, t % 3 - 1
        tmask[:, t] = ((h_idx + dp >= 0) & (h_idx + dp < H) &
                       (w_idx + dq >= 0) & (w_idx + dq < W)).astype(np.float32)
    grp = np.arange(N) % M
    pmat = (grp[:, None] == grp[None, :]).astype(np.float32) / G

    kernel = functools.partial(
        _fused_base_b4_kernel, N=N, H=H, W=W, C=C, cmap_dim=cmap_dim,
        alpha=0.2, mxu_dtype=mxu_dtype)
    vmem = pl.BlockSpec(memory_space=pltpu.MemorySpace.VMEM)

    out = pl.pallas_call(
        kernel,
        out_shape=jax.ShapeDtypeStruct((N, 1), jnp.float32),
        in_specs=[vmem] * 12,
        out_specs=vmem,
        compiler_params=pltpu.CompilerParams(
            vmem_limit_bytes=32 * 1024 * 1024),
    )(x2, xhw, wall, wstd, convb, wfc, fcb, wout, outb, cmapf,
      jnp.asarray(pmat), jnp.asarray(tmask))
    return out


# ----------------------------------------------------------------------------
# Params + pure-JAX reference (sanity check of the Pallas path)
# ----------------------------------------------------------------------------

def init_params(key, in_channels, resolution, cmap_dim):
    k1, k2, k3 = jax.random.split(key, 3)
    C, R = in_channels, resolution
    return {
        "conv_w": jax.random.normal(k1, (C, C + 1, 3, 3), jnp.float32),
        "conv_b": jnp.zeros((C,), jnp.float32),
        "fc_w": jax.random.normal(k2, (C, C * R * R), jnp.float32),
        "fc_b": jnp.zeros((C,), jnp.float32),
        "out_w": jax.random.normal(k3, (cmap_dim, C), jnp.float32),
        "out_b": jnp.zeros((cmap_dim,), jnp.float32),
    }


def reference_forward(x_nchw, cmap, params, *, cmap_dim, mbstd_group_size=4):
    N, C, H, W = x_nchw.shape
    x = x_nchw.astype(jnp.float32)
    G = min(mbstd_group_size, N)
    F_ = 1
    y = x.reshape(G, N // G, F_, C // F_, H, W)
    y = y - jnp.mean(y, axis=0)
    y = jnp.mean(y * y, axis=0)
    y = jnp.sqrt(y + 1e-8)
    y = jnp.mean(y, axis=(2, 3, 4))
    y = y.reshape(-1, F_, 1, 1)
    y = jnp.tile(y, (G, 1, H, W))
    x = jnp.concatenate([x, y], axis=1)

    wg = 1.0 / math.sqrt((C + 1) * 9)
    xc = jax.lax.conv_general_dilated(
        x, params["conv_w"] * wg, (1, 1), ((1, 1), (1, 1)),
        dimension_numbers=("NCHW", "OIHW", "NCHW"),
        precision=jax.lax.Precision.HIGHEST)
    xc = xc + params["conv_b"].reshape(1, C, 1, 1)
    xc = jnp.where(xc >= 0, xc, 0.2 * xc) * math.sqrt(2.0)

    xf = xc.reshape(N, C * H * W)
    h1 = jnp.dot(xf, params["fc_w"].T * (1.0 / math.sqrt(C * H * W)),
                 precision=jax.lax.Precision.HIGHEST) + params["fc_b"]
    h1 = jnp.where(h1 >= 0, h1, 0.2 * h1) * math.sqrt(2.0)

    o = jnp.dot(h1, params["out_w"].T * (1.0 / math.sqrt(C)),
                precision=jax.lax.Precision.HIGHEST) + params["out_b"]
    return jnp.sum(o * cmap, axis=1, keepdims=True) * (1.0 / math.sqrt(cmap_dim))


# ----------------------------------------------------------------------------
# main
# ----------------------------------------------------------------------------

if __name__ == "__main__":
    # BaseB4(in_channels=64, resolution=4, cmap_dim=32, cam_D=True,
    #        mbstd_group_size=4, mbstd_num_channels=1, activation='lrelu'), batch=8.
    N, C, R, CMAP = 8, 64, 4, 32

    key = jax.random.PRNGKey(0)
    kx, kc, kp = jax.random.split(key, 3)
    x = jax.random.normal(kx, (N, C, R, R), jnp.float32)
    cmap = jax.random.normal(kc, (N, CMAP), jnp.float32)
    params = init_params(kp, C, R, CMAP)

    fwd = jax.jit(functools.partial(base_b4_forward, cmap_dim=CMAP,
                                    mbstd_group_size=4))
    out = jax.block_until_ready(fwd(x, cmap, params))

    assert out.shape == (N, 1), out.shape
    assert out.dtype == jnp.float32
    assert bool(jnp.all(jnp.isfinite(out)))

    ref = reference_forward(x, cmap, params, cmap_dim=CMAP, mbstd_group_size=4)
    max_err = float(jnp.max(jnp.abs(out - ref)))
    assert jnp.allclose(out, ref, atol=2e-2, rtol=2e-2), max_err

    print("KERNEL_OK")
</pallas_src>

<mosaic_0001>
module attributes {stable_mosaic.version = 11 : i64} {
  func.func @_fused_base_b4_kernel(%arg0: memref<8x1024xf32, #tpu.memory_space<vmem>>, %arg1: memref<128x64xf32, #tpu.memory_space<vmem>>, %arg2: memref<64x576xf32, #tpu.memory_space<vmem>>, %arg3: memref<9x64xf32, #tpu.memory_space<vmem>>, %arg4: memref<1x64xf32, #tpu.memory_space<vmem>>, %arg5: memref<1024x64xf32, #tpu.memory_space<vmem>>, %arg6: memref<1x64xf32, #tpu.memory_space<vmem>>, %arg7: memref<64x32xf32, #tpu.memory_space<vmem>>, %arg8: memref<1x32xf32, #tpu.memory_space<vmem>>, %arg9: memref<8x32xf32, #tpu.memory_space<vmem>>, %arg10: memref<8x8xf32, #tpu.memory_space<vmem>>, %arg11: memref<128x9xf32, #tpu.memory_space<vmem>>, %arg12: memref<8x1xf32, #tpu.memory_space<vmem>>) attributes {dimension_semantics = [], scalar_prefetch = 0 : i64, scratch_operands = 0 : i64, tpu.core_type = #tpu.core_type<tc>} {
    %c0 = arith.constant 0 : index
    %c0_0 = arith.constant 0 : index
    %0 = vector.load %arg0[%c0, %c0_0] : memref<8x1024xf32, #tpu.memory_space<vmem>>, vector<8x1024xf32>
    %c0_1 = arith.constant 0 : index
    %c0_2 = arith.constant 0 : index
    %1 = vector.load %arg10[%c0_1, %c0_2] : memref<8x8xf32, #tpu.memory_space<vmem>>, vector<8x8xf32>
    %cst = arith.constant dense<0.000000e+00> : vector<8x1024xf32>
    %2 = tpu.matmul %1, %0, %cst {dimension_numbers = #tpu.dot_dimension_numbers<[1], [0], [0], [1], [0, 0, 1, 1], [], []>} : vector<8x8xf32>, vector<8x1024xf32>, vector<8x1024xf32> -> vector<8x1024xf32>
    %3 = arith.subf %0, %2 : vector<8x1024xf32>
    %4 = arith.mulf %3, %3 : vector<8x1024xf32>
    %cst_3 = arith.constant dense<0.000000e+00> : vector<8x1024xf32>
    %5 = tpu.matmul %1, %4, %cst_3 {dimension_numbers = #tpu.dot_dimension_numbers<[1], [0], [0], [1], [0, 0, 1, 1], [], []>} : vector<8x8xf32>, vector<8x1024xf32>, vector<8x1024xf32> -> vector<8x1024xf32>
    %cst_4 = arith.constant 9.99999993E-9 : f32
    %6 = vector.broadcast %cst_4 : f32 to vector<8x1024xf32>
    %7 = arith.addf %5, %6 : vector<8x1024xf32>
    %8 = math.sqrt %7 : vector<8x1024xf32>
    %cst_5 = arith.constant dense<0.000000e+00> : vector<8xf32>
    %9 = vector.multi_reduction <add>, %8, %cst_5 [1] : vector<8x1024xf32> to vector<8xf32>
    %10 = vector.shape_cast %9 : vector<8xf32> to vector<8x1xf32>
    %cst_6 = arith.constant 9.765625E-4 : f32
    %11 = vector.broadcast %cst_6 : f32 to vector<8x1xf32>
    %12 = arith.mulf %10, %11 : vector<8x1xf32>
    %13 = tpu.concatenate %12, %12, %12, %12, %12, %12, %12, %12, %12, %12, %12, %12, %12, %12, %12, %12 in 0 : vector<8x1xf32>, vector<8x1xf32>, vector<8x1xf32>, vector<8x1xf32>, vector<8x1xf32>, vector<8x1xf32>, vector<8x1xf32>, vector<8x1xf32>, vector<8x1xf32>, vector<8x1xf32>, vector<8x1xf32>, vector<8x1xf32>, vector<8x1xf32>, vector<8x1xf32>, vector<8x1xf32>, vector<8x1xf32> -> vector<128x1xf32>
    %c0_7 = arith.constant 0 : index
    %c0_8 = arith.constant 0 : index
    %14 = vector.load %arg1[%c0_7, %c0_8] : memref<128x64xf32, #tpu.memory_space<vmem>>, vector<128x64xf32>
    %c0_9 = arith.constant 0 : index
    %c0_10 = arith.constant 0 : index
    %15 = vector.load %arg2[%c0_9, %c0_10] : memref<64x576xf32, #tpu.memory_space<vmem>>, vector<64x576xf32>
    %cst_11 = arith.constant dense<0.000000e+00> : vector<128x576xf32>
    %16 = tpu.matmul %14, %15, %cst_11 {dimension_numbers = #tpu.dot_dimension_numbers<[1], [0], [0], [1], [0, 0, 1, 1], [], []>} : vector<128x64xf32>, vector<64x576xf32>, vector<128x576xf32> -> vector<128x576xf32>
    %c0_12 = arith.constant 0 : index
    %c0_13 = arith.constant 0 : index
    %17 = vector.load %arg11[%c0_12, %c0_13] : memref<128x9xf32, #tpu.memory_space<vmem>>, vector<128x9xf32>
    %cst_14 = arith.constant 0.000000e+00 : f32
    %18 = vector.broadcast %cst_14 : f32 to vector<128x64xf32>
    %19 = vector.extract_strided_slice %16 {offsets = [0, 0], sizes = [128, 64], strides = [1, 1]} : vector<128x576xf32> to vector<128x64xf32>
    %cst_15 = arith.constant 0.000000e+00 : f32
    %20 = vector.broadcast %cst_15 : f32 to vector<40x64xf32>
    %21 = vector.extract_strided_slice %19 {offsets = [0, 0], sizes = [88, 64], strides = [1, 1]} : vector<128x64xf32> to vector<88x64xf32>
    %22 = tpu.concatenate %20, %21 in 0 : vector<40x64xf32>, vector<88x64xf32> -> vector<128x64xf32>
    %23 = vector.extract_strided_slice %17 {offsets = [0, 0], sizes = [128, 1], strides = [1, 1]} : vector<128x9xf32> to vector<128x1xf32>
    %24 = vector.broadcast %23 : vector<128x1xf32> to vector<128x64xf32>
    %25 = arith.mulf %22, %24 : vector<128x64xf32>
    %26 = arith.addf %18, %25 : vector<128x64xf32>
    %27 = vector.extract_strided_slice %16 {offsets = [0, 64], sizes = [128, 64], strides = [1, 1]} : vector<128x576xf32> to vector<128x64xf32>
    %cst_16 = arith.constant 0.000000e+00 : f32
    %28 = vector.broadcast %cst_16 : f32 to vector<32x64xf32>
    %29 = vector.extract_strided_slice %27 {offsets = [0, 0], sizes = [96, 64], strides = [1, 1]} : vector<128x64xf32> to vector<96x64xf32>
    %30 = tpu.concatenate %28, %29 in 0 : vector<32x64xf32>, vector<96x64xf32> -> vector<128x64xf32>
    %31 = vector.extract_strided_slice %17 {offsets = [0, 1], sizes = [128, 1], strides = [1, 1]} : vector<128x9xf32> to vector<128x1xf32>
    %32 = vector.broadcast %31 : vector<128x1xf32> to vector<128x64xf32>
    %33 = arith.mulf %30, %32 : vector<128x64xf32>
    %34 = arith.addf %26, %33 : vector<128x64xf32>
    %35 = vector.extract_strided_slice %16 {offsets = [0, 128], sizes = [128, 64], strides = [1, 1]} : vector<128x576xf32> to vector<128x64xf32>
    %cst_17 = arith.constant 0.000000e+00 : f32
    %36 = vector.broadcast %cst_17 : f32 to vector<24x64xf32>
    %37 = vector.extract_strided_slice %35 {offsets = [0, 0], sizes = [104, 64], strides = [1, 1]} : vector<128x64xf32> to vector<104x64xf32>
    %38 = tpu.concatenate %36, %37 in 0 : vector<24x64xf32>, vector<104x64xf32> -> vector<128x64xf32>
    %39 = vector.extract_strided_slice %17 {offsets = [0, 2], sizes = [128, 1], strides = [1, 1]} : vector<128x9xf32> to vector<128x1xf32>
    %40 = vector.broadcast %39 : vector<128x1xf32> to vector<128x64xf32>
    %41 = arith.mulf %38, %40 : vector<128x64xf32>
    %42 = arith.addf %34, %41 : vector<128x64xf32>
    %43 = vector.extract_strided_slice %16 {offsets = [0, 192], sizes = [128, 64], strides = [1, 1]} : vector<128x576xf32> to vector<128x64xf32>
    %cst_18 = arith.constant 0.000000e+00 : f32
    %44 = vector.broadcast %cst_18 : f32 to vector<8x64xf32>
    %45 = vector.extract_strided_slice %43 {offsets = [0, 0], sizes = [120, 64], strides = [1, 1]} : vector<128x64xf32> to vector<120x64xf32>
    %46 = tpu.concatenate %44, %45 in 0 : vector<8x64xf32>, vector<120x64xf32> -> vector<128x64xf32>
    %47 = vector.extract_strided_slice %17 {offsets = [0, 3], sizes = [128, 1], strides = [1, 1]} : vector<128x9xf32> to vector<128x1xf32>
    %48 = vector.broadcast %47 : vector<128x1xf32> to vector<128x64xf32>
    %49 = arith.mulf %46, %48 : vector<128x64xf32>
    %50 = arith.addf %42, %49 : vector<128x64xf32>
    %51 = vector.extract_strided_slice %16 {offsets = [0, 256], sizes = [128, 64], strides = [1, 1]} : vector<128x576xf32> to vector<128x64xf32>
    %52 = vector.extract_strided_slice %17 {offsets = [0, 4], sizes = [128, 1], strides = [1, 1]} : vector<128x9xf32> to vector<128x1xf32>
    %53 = vector.broadcast %52 : vector<128x1xf32> to vector<128x64xf32>
    %54 = arith.mulf %51, %53 : vector<128x64xf32>
    %55 = arith.addf %50, %54 : vector<128x64xf32>
    %56 = vector.extract_strided_slice %16 {offsets = [0, 320], sizes = [128, 64], strides = [1, 1]} : vector<128x576xf32> to vector<128x64xf32>
    %57 = vector.extract_strided_slice %56 {offsets = [8, 0], sizes = [120, 64], strides = [1, 1]} : vector<128x64xf32> to vector<120x64xf32>
    %cst_19 = arith.constant 0.000000e+00 : f32
    %58 = vector.broadcast %cst_19 : f32 to vector<8x64xf32>
    %59 = tpu.concatenate %57, %58 in 0 : vector<120x64xf32>, vector<8x64xf32> -> vector<128x64xf32>
    %60 = vector.extract_strided_slice %17 {offsets = [0, 5], sizes = [128, 1], strides = [1, 1]} : vector<128x9xf32> to vector<128x1xf32>
    %61 = vector.broadcast %60 : vector<128x1xf32> to vector<128x64xf32>
    %62 = arith.mulf %59, %61 : vector<128x64xf32>
    %63 = arith.addf %55, %62 : vector<128x64xf32>
    %64 = vector.extract_strided_slice %16 {offsets = [0, 384], sizes = [128, 64], strides = [1, 1]} : vector<128x576xf32> to vector<128x64xf32>
    %65 = vector.extract_strided_slice %64 {offsets = [24, 0], sizes = [104, 64], strides = [1, 1]} : vector<128x64xf32> to vector<104x64xf32>
    %cst_20 = arith.constant 0.000000e+00 : f32
    %66 = vector.broadcast %cst_20 : f32 to vector<24x64xf32>
    %67 = tpu.concatenate %65, %66 in 0 : vector<104x64xf32>, vector<24x64xf32> -> vector<128x64xf32>
    %68 = vector.extract_strided_slice %17 {offsets = [0, 6], sizes = [128, 1], strides = [1, 1]} : vector<128x9xf32> to vector<128x1xf32>
    %69 = vector.broadcast %68 : vector<128x1xf32> to vector<128x64xf32>
    %70 = arith.mulf %67, %69 : vector<128x64xf32>
    %71 = arith.addf %63, %70 : vector<128x64xf32>
    %72 = vector.extract_strided_slice %16 {offsets = [0, 448], sizes = [128, 64], strides = [1, 1]} : vector<128x576xf32> to vector<128x64xf32>
    %73 = vector.extract_strided_slice %72 {offsets = [32, 0], sizes = [96, 64], strides = [1, 1]} : vector<128x64xf32> to vector<96x64xf32>
    %cst_21 = arith.constant 0.000000e+00 : f32
    %74 = vector.broadcast %cst_21 : f32 to vector<32x64xf32>
    %75 = tpu.concatenate %73, %74 in 0 : vector<96x64xf32>, vector<32x64xf32> -> vector<128x64xf32>
    %76 = vector.extract_strided_slice %17 {offsets = [0, 7], sizes = [128, 1], strides = [1, 1]} : vector<128x9xf32> to vector<128x1xf32>
    %77 = vector.broadcast %76 : vector<128x1xf32> to vector<128x64xf32>
    %78 = arith.mulf %75, %77 : vector<128x64xf32>
    %79 = arith.addf %71, %78 : vector<128x64xf32>
    %80 = vector.extract_strided_slice %16 {offsets = [0, 512], sizes = [128, 64], strides = [1, 1]} : vector<128x576xf32> to vector<128x64xf32>
    %81 = vector.extract_strided_slice %80 {offsets = [40, 0], sizes = [88, 64], strides = [1, 1]} : vector<128x64xf32> to vector<88x64xf32>
    %cst_22 = arith.constant 0.000000e+00 : f32
    %82 = vector.broadcast %cst_22 : f32 to vector<40x64xf32>
    %83 = tpu.concatenate %81, %82 in 0 : vector<88x64xf32>, vector<40x64xf32> -> vector<128x64xf32>
    %84 = vector.extract_strided_slice %17 {offsets = [0, 8], sizes = [128, 1], strides = [1, 1]} : vector<128x9xf32> to vector<128x1xf32>
    %85 = vector.broadcast %84 : vector<128x1xf32> to vector<128x64xf32>
    %86 = arith.mulf %83, %85 : vector<128x64xf32>
    %87 = arith.addf %79, %86 : vector<128x64xf32>
    %c0_23 = arith.constant 0 : index
    %c0_24 = arith.constant 0 : index
    %88 = vector.load %arg3[%c0_23, %c0_24] : memref<9x64xf32, #tpu.memory_space<vmem>>, vector<9x64xf32>
    %cst_25 = arith.constant dense<0.000000e+00> : vector<128x64xf32>
    %89 = tpu.matmul %17, %88, %cst_25 {dimension_numbers = #tpu.dot_dimension_numbers<[1], [0], [0], [1], [0, 0, 1, 1], [], []>} : vector<128x9xf32>, vector<9x64xf32>, vector<128x64xf32> -> vector<128x64xf32>
    %90 = vector.broadcast %13 : vector<128x1xf32> to vector<128x64xf32>
    %91 = arith.mulf %90, %89 : vector<128x64xf32>
    %92 = arith.addf %87, %91 : vector<128x64xf32>
    %cst_26 = arith.constant 0.0413449109 : f32
    %93 = vector.broadcast %cst_26 : f32 to vector<128x64xf32>
    %94 = arith.mulf %92, %93 : vector<128x64xf32>
    %c0_27 = arith.constant 0 : index
    %c0_28 = arith.constant 0 : index
    %95 = vector.load %arg4[%c0_27, %c0_28] : memref<1x64xf32, #tpu.memory_space<vmem>>, vector<1x64xf32>
    %96 = vector.broadcast %95 : vector<1x64xf32> to vector<128x64xf32>
    %97 = arith.addf %94, %96 : vector<128x64xf32>
    %cst_29 = arith.constant 0.000000e+00 : f32
    %98 = vector.broadcast %cst_29 : f32 to vector<128x64xf32>
    %99 = arith.cmpf oge, %97, %98 : vector<128x64xf32>
    %cst_30 = arith.constant 2.000000e-01 : f32
    %100 = vector.broadcast %cst_30 : f32 to vector<128x64xf32>
    %101 = arith.mulf %97, %100 : vector<128x64xf32>
    %102 = arith.select %99, %97, %101 : vector<128x64xi1>, vector<128x64xf32>
    %cst_31 = arith.constant 1.41421354 : f32
    %103 = vector.broadcast %cst_31 : f32 to vector<128x64xf32>
    %104 = arith.mulf %102, %103 : vector<128x64xf32>
    %cst_32 = arith.constant 0.000000e+00 : f32
    %105 = vector.broadcast %cst_32 : f32 to vector<8x64xf32>
    %106 = vector.extract_strided_slice %104 {offsets = [0, 0], sizes = [8, 64], strides = [1, 1]} : vector<128x64xf32> to vector<8x64xf32>
    %c0_33 = arith.constant 0 : index
    %c0_34 = arith.constant 0 : index
    %107 = vector.load %arg5[%c0_33, %c0_34] : memref<1024x64xf32, #tpu.memory_space<vmem>>, vector<64x64xf32>
    %cst_35 = arith.constant dense<0.000000e+00> : vector<8x64xf32>
    %108 = tpu.matmul %106, %107, %cst_35 {dimension_numbers = #tpu.dot_dimension_numbers<[1], [0], [0], [1], [0, 0, 1, 1], [], []>} : vector<8x64xf32>, vector<64x64xf32>, vector<8x64xf32> -> vector<8x64xf32>
    %109 = arith.addf %105, %108 : vector<8x64xf32>
    %110 = vector.extract_strided_slice %104 {offsets = [8, 0], sizes = [8, 64], strides = [1, 1]} : vector<128x64xf32> to vector<8x64xf32>
    %c64 = arith.constant 64 : index
    %c0_36 = arith.constant 0 : index
    %111 = vector.load %arg5[%c64, %c0_36] : memref<1024x64xf32, #tpu.memory_space<vmem>>, vector<64x64xf32>
    %cst_37 = arith.constant dense<0.000000e+00> : vector<8x64xf32>
    %112 = tpu.matmul %110, %111, %cst_37 {dimension_numbers = #tpu.dot_dimension_numbers<[1], [0], [0], [1], [0, 0, 1, 1], [], []>} : vector<8x64xf32>, vector<64x64xf32>, vector<8x64xf32> -> vector<8x64xf32>
    %113 = arith.addf %109, %112 : vector<8x64xf32>
    %114 = vector.extract_strided_slice %104 {offsets = [16, 0], sizes = [8, 64], strides = [1, 1]} : vector<128x64xf32> to vector<8x64xf32>
    %c128 = arith.constant 128 : index
    %c0_38 = arith.constant 0 : index
    %115 = vector.load %arg5[%c128, %c0_38] : memref<1024x64xf32, #tpu.memory_space<vmem>>, vector<64x64xf32>
    %cst_39 = arith.constant dense<0.000000e+00> : vector<8x64xf32>
    %116 = tpu.matmul %114, %115, %cst_39 {dimension_numbers = #tpu.dot_dimension_numbers<[1], [0], [0], [1], [0, 0, 1, 1], [], []>} : vector<8x64xf32>, vector<64x64xf32>, vector<8x64xf32> -> vector<8x64xf32>
    %117 = arith.addf %113, %116 : vector<8x64xf32>
    %118 = vector.extract_strided_slice %104 {offsets = [24, 0], sizes = [8, 64], strides = [1, 1]} : vector<128x64xf32> to vector<8x64xf32>
    %c192 = arith.constant 192 : index
    %c0_40 = arith.constant 0 : index
    %119 = vector.load %arg5[%c192, %c0_40] : memref<1024x64xf32, #tpu.memory_space<vmem>>, vector<64x64xf32>
    %cst_41 = arith.constant dense<0.000000e+00> : vector<8x64xf32>
    %120 = tpu.matmul %118, %119, %cst_41 {dimension_numbers = #tpu.dot_dimension_numbers<[1], [0], [0], [1], [0, 0, 1, 1], [], []>} : vector<8x64xf32>, vector<64x64xf32>, vector<8x64xf32> -> vector<8x64xf32>
    %121 = arith.addf %117, %120 : vector<8x64xf32>
    %122 = vector.extract_strided_slice %104 {offsets = [32, 0], sizes = [8, 64], strides = [1, 1]} : vector<128x64xf32> to vector<8x64xf32>
    %c256 = arith.constant 256 : index
    %c0_42 = arith.constant 0 : index
    %123 = vector.load %arg5[%c256, %c0_42] : memref<1024x64xf32, #tpu.memory_space<vmem>>, vector<64x64xf32>
    %cst_43 = arith.constant dense<0.000000e+00> : vector<8x64xf32>
    %124 = tpu.matmul %122, %123, %cst_43 {dimension_numbers = #tpu.dot_dimension_numbers<[1], [0], [0], [1], [0, 0, 1, 1], [], []>} : vector<8x64xf32>, vector<64x64xf32>, vector<8x64xf32> -> vector<8x64xf32>
    %125 = arith.addf %121, %124 : vector<8x64xf32>
    %126 = vector.extract_strided_slice %104 {offsets = [40, 0], sizes = [8, 64], strides = [1, 1]} : vector<128x64xf32> to vector<8x64xf32>
    %c320 = arith.constant 320 : index
    %c0_44 = arith.constant 0 : index
    %127 = vector.load %arg5[%c320, %c0_44] : memref<1024x64xf32, #tpu.memory_space<vmem>>, vector<64x64xf32>
    %cst_45 = arith.constant dense<0.000000e+00> : vector<8x64xf32>
    %128 = tpu.matmul %126, %127, %cst_45 {dimension_numbers = #tpu.dot_dimension_numbers<[1], [0], [0], [1], [0, 0, 1, 1], [], []>} : vector<8x64xf32>, vector<64x64xf32>, vector<8x64xf32> -> vector<8x64xf32>
    %129 = arith.addf %125, %128 : vector<8x64xf32>
    %130 = vector.extract_strided_slice %104 {offsets = [48, 0], sizes = [8, 64], strides = [1, 1]} : vector<128x64xf32> to vector<8x64xf32>
    %c384 = arith.constant 384 : index
    %c0_46 = arith.constant 0 : index
    %131 = vector.load %arg5[%c384, %c0_46] : memref<1024x64xf32, #tpu.memory_space<vmem>>, vector<64x64xf32>
    %cst_47 = arith.constant dense<0.000000e+00> : vector<8x64xf32>
    %132 = tpu.matmul %130, %131, %cst_47 {dimension_numbers = #tpu.dot_dimension_numbers<[1], [0], [0], [1], [0, 0, 1, 1], [], []>} : vector<8x64xf32>, vector<64x64xf32>, vector<8x64xf32> -> vector<8x64xf32>
    %133 = arith.addf %129, %132 : vector<8x64xf32>
    %134 = vector.extract_strided_slice %104 {offsets = [56, 0], sizes = [8, 64], strides = [1, 1]} : vector<128x64xf32> to vector<8x64xf32>
    %c448 = arith.constant 448 : index
    %c0_48 = arith.constant 0 : index
    %135 = vector.load %arg5[%c448, %c0_48] : memref<1024x64xf32, #tpu.memory_space<vmem>>, vector<64x64xf32>
    %cst_49 = arith.constant dense<0.000000e+00> : vector<8x64xf32>
    %136 = tpu.matmul %134, %135, %cst_49 {dimension_numbers = #tpu.dot_dimension_numbers<[1], [0], [0], [1], [0, 0, 1, 1], [], []>} : vector<8x64xf32>, vector<64x64xf32>, vector<8x64xf32> -> vector<8x64xf32>
    %137 = arith.addf %133, %136 : vector<8x64xf32>
    %138 = vector.extract_strided_slice %104 {offsets = [64, 0], sizes = [8, 64], strides = [1, 1]} : vector<128x64xf32> to vector<8x64xf32>
    %c512 = arith.constant 512 : index
    %c0_50 = arith.constant 0 : index
    %139 = vector.load %arg5[%c512, %c0_50] : memref<1024x64xf32, #tpu.memory_space<vmem>>, vector<64x64xf32>
    %cst_51 = arith.constant dense<0.000000e+00> : vector<8x64xf32>
    %140 = tpu.matmul %138, %139, %cst_51 {dimension_numbers = #tpu.dot_dimension_numbers<[1], [0], [0], [1], [0, 0, 1, 1], [], []>} : vector<8x64xf32>, vector<64x64xf32>, vector<8x64xf32> -> vector<8x64xf32>
    %141 = arith.addf %137, %140 : vector<8x64xf32>
    %142 = vector.extract_strided_slice %104 {offsets = [72, 0], sizes = [8, 64], strides = [1, 1]} : vector<128x64xf32> to vector<8x64xf32>
    %c576 = arith.constant 576 : index
    %c0_52 = arith.constant 0 : index
    %143 = vector.load %arg5[%c576, %c0_52] : memref<1024x64xf32, #tpu.memory_space<vmem>>, vector<64x64xf32>
    %cst_53 = arith.constant dense<0.000000e+00> : vector<8x64xf32>
    %144 = tpu.matmul %142, %143, %cst_53 {dimension_numbers = #tpu.dot_dimension_numbers<[1], [0], [0], [1], [0, 0, 1, 1], [], []>} : vector<8x64xf32>, vector<64x64xf32>, vector<8x64xf32> -> vector<8x64xf32>
    %145 = arith.addf %141, %144 : vector<8x64xf32>
    %146 = vector.extract_strided_slice %104 {offsets = [80, 0], sizes = [8, 64], strides = [1, 1]} : vector<128x64xf32> to vector<8x64xf32>
    %c640 = arith.constant 640 : index
    %c0_54 = arith.constant 0 : index
    %147 = vector.load %arg5[%c640, %c0_54] : memref<1024x64xf32, #tpu.memory_space<vmem>>, vector<64x64xf32>
    %cst_55 = arith.constant dense<0.000000e+00> : vector<8x64xf32>
    %148 = tpu.matmul %146, %147, %cst_55 {dimension_numbers = #tpu.dot_dimension_numbers<[1], [0], [0], [1], [0, 0, 1, 1], [], []>} : vector<8x64xf32>, vector<64x64xf32>, vector<8x64xf32> -> vector<8x64xf32>
    %149 = arith.addf %145, %148 : vector<8x64xf32>
    %150 = vector.extract_strided_slice %104 {offsets = [88, 0], sizes = [8, 64], strides = [1, 1]} : vector<128x64xf32> to vector<8x64xf32>
    %c704 = arith.constant 704 : index
    %c0_56 = arith.constant 0 : index
    %151 = vector.load %arg5[%c704, %c0_56] : memref<1024x64xf32, #tpu.memory_space<vmem>>, vector<64x64xf32>
    %cst_57 = arith.constant dense<0.000000e+00> : vector<8x64xf32>
    %152 = tpu.matmul %150, %151, %cst_57 {dimension_numbers = #tpu.dot_dimension_numbers<[1], [0], [0], [1], [0, 0, 1, 1], [], []>} : vector<8x64xf32>, vector<64x64xf32>, vector<8x64xf32> -> vector<8x64xf32>
    %153 = arith.addf %149, %152 : vector<8x64xf32>
    %154 = vector.extract_strided_slice %104 {offsets = [96, 0], sizes = [8, 64], strides = [1, 1]} : vector<128x64xf32> to vector<8x64xf32>
    %c768 = arith.constant 768 : index
    %c0_58 = arith.constant 0 : index
    %155 = vector.load %arg5[%c768, %c0_58] : memref<1024x64xf32, #tpu.memory_space<vmem>>, vector<64x64xf32>
    %cst_59 = arith.constant dense<0.000000e+00> : vector<8x64xf32>
    %156 = tpu.matmul %154, %155, %cst_59 {dimension_numbers = #tpu.dot_dimension_numbers<[1], [0], [0], [1], [0, 0, 1, 1], [], []>} : vector<8x64xf32>, vector<64x64xf32>, vector<8x64xf32> -> vector<8x64xf32>
    %157 = arith.addf %153, %156 : vector<8x64xf32>
    %158 = vector.extract_strided_slice %104 {offsets = [104, 0], sizes = [8, 64], strides = [1, 1]} : vector<128x64xf32> to vector<8x64xf32>
    %c832 = arith.constant 832 : index
    %c0_60 = arith.constant 0 : index
    %159 = vector.load %arg5[%c832, %c0_60] : memref<1024x64xf32, #tpu.memory_space<vmem>>, vector<64x64xf32>
    %cst_61 = arith.constant dense<0.000000e+00> : vector<8x64xf32>
    %160 = tpu.matmul %158, %159, %cst_61 {dimension_numbers = #tpu.dot_dimension_numbers<[1], [0], [0], [1], [0, 0, 1, 1], [], []>} : vector<8x64xf32>, vector<64x64xf32>, vector<8x64xf32> -> vector<8x64xf32>
    %161 = arith.addf %157, %160 : vector<8x64xf32>
    %162 = vector.extract_strided_slice %104 {offsets = [112, 0], sizes = [8, 64], strides = [1, 1]} : vector<128x64xf32> to vector<8x64xf32>
    %c896 = arith.constant 896 : index
    %c0_62 = arith.constant 0 : index
    %163 = vector.load %arg5[%c896, %c0_62] : memref<1024x64xf32, #tpu.memory_space<vmem>>, vector<64x64xf32>
    %cst_63 = arith.constant dense<0.000000e+00> : vector<8x64xf32>
    %164 = tpu.matmul %162, %163, %cst_63 {dimension_numbers = #tpu.dot_dimension_numbers<[1], [0], [0], [1], [0, 0, 1, 1], [], []>} : vector<8x64xf32>, vector<64x64xf32>, vector<8x64xf32> -> vector<8x64xf32>
    %165 = arith.addf %161, %164 : vector<8x64xf32>
    %166 = vector.extract_strided_slice %104 {offsets = [120, 0], sizes = [8, 64], strides = [1, 1]} : vector<128x64xf32> to vector<8x64xf32>
    %c960 = arith.constant 960 : index
    %c0_64 = arith.constant 0 : index
    %167 = vector.load %arg5[%c960, %c0_64] : memref<1024x64xf32, #tpu.memory_space<vmem>>, vector<64x64xf32>
    %cst_65 = arith.constant dense<0.000000e+00> : vector<8x64xf32>
    %168 = tpu.matmul %166, %167, %cst_65 {dimension_numbers = #tpu.dot_dimension_numbers<[1], [0], [0], [1], [0, 0, 1, 1], [], []>} : vector<8x64xf32>, vector<64x64xf32>, vector<8x64xf32> -> vector<8x64xf32>
    %169 = arith.addf %165, %168 : vector<8x64xf32>
    %cst_66 = arith.constant 3.125000e-02 : f32
    %170 = vector.broadcast %cst_66 : f32 to vector<8x64xf32>
    %171 = arith.mulf %169, %170 : vector<8x64xf32>
    %c0_67 = arith.constant 0 : index
    %c0_68 = arith.constant 0 : index
    %172 = vector.load %arg6[%c0_67, %c0_68] : memref<1x64xf32, #tpu.memory_space<vmem>>, vector<1x64xf32>
    %173 = vector.broadcast %172 : vector<1x64xf32> to vector<8x64xf32>
    %174 = arith.addf %171, %173 : vector<8x64xf32>
    %cst_69 = arith.constant 0.000000e+00 : f32
    %175 = vector.broadcast %cst_69 : f32 to vector<8x64xf32>
    %176 = arith.cmpf oge, %174, %175 : vector<8x64xf32>
    %cst_70 = arith.constant 2.000000e-01 : f32
    %177 = vector.broadcast %cst_70 : f32 to vector<8x64xf32>
    %178 = arith.mulf %174, %177 : vector<8x64xf32>
    %179 = arith.select %176, %174, %178 : vector<8x64xi1>, vector<8x64xf32>
    %cst_71 = arith.constant 1.41421354 : f32
    %180 = vector.broadcast %cst_71 : f32 to vector<8x64xf32>
    %181 = arith.mulf %179, %180 : vector<8x64xf32>
    %c0_72 = arith.constant 0 : index
    %c0_73 = arith.constant 0 : index
    %182 = vector.load %arg7[%c0_72, %c0_73] : memref<64x32xf32, #tpu.memory_space<vmem>>, vector<64x32xf32>
    %cst_74 = arith.constant dense<0.000000e+00> : vector<8x32xf32>
    %183 = tpu.matmul %181, %182, %cst_74 {dimension_numbers = #tpu.dot_dimension_numbers<[1], [0], [0], [1], [0, 0, 1, 1], [], []>} : vector<8x64xf32>, vector<64x32xf32>, vector<8x32xf32> -> vector<8x32xf32>
    %cst_75 = arith.constant 1.250000e-01 : f32
    %184 = vector.broadcast %cst_75 : f32 to vector<8x32xf32>
    %185 = arith.mulf %183, %184 : vector<8x32xf32>
    %c0_76 = arith.constant 0 : index
    %c0_77 = arith.constant 0 : index
    %186 = vector.load %arg8[%c0_76, %c0_77] : memref<1x32xf32, #tpu.memory_space<vmem>>, vector<1x32xf32>
    %187 = vector.broadcast %186 : vector<1x32xf32> to vector<8x32xf32>
    %188 = arith.addf %185, %187 : vector<8x32xf32>
    %c0_78 = arith.constant 0 : index
    %c0_79 = arith.constant 0 : index
    %189 = vector.load %arg9[%c0_78, %c0_79] : memref<8x32xf32, #tpu.memory_space<vmem>>, vector<8x32xf32>
    %190 = arith.mulf %188, %189 : vector<8x32xf32>
    %cst_80 = arith.constant dense<0.000000e+00> : vector<8xf32>
    %191 = vector.multi_reduction <add>, %190, %cst_80 [1] : vector<8x32xf32> to vector<8xf32>
    %192 = vector.shape_cast %191 : vector<8xf32> to vector<8x1xf32>
    %cst_81 = arith.constant 0.176776692 : f32
    %193 = vector.broadcast %cst_81 : f32 to vector<8x1xf32>
    %194 = arith.mulf %192, %193 : vector<8x1xf32>
    %c0_82 = arith.constant 0 : index
    %c0_83 = arith.constant 0 : index
    %195 = vector.load %arg12[%c0_82, %c0_83] : memref<8x1xf32, #tpu.memory_space<vmem>>, vector<8x1xf32>
    tpu.vector_store %arg12[%c0_82, %c0_83], %194 {strides = array<i32>} : memref<8x1xf32, #tpu.memory_space<vmem>>, vector<8x1xf32>,
    return
  }
}

</mosaic_0001>

<bundles_post_ra>
// kernel: base_b4_forward.1
= control target key start
LH: loop header
LB: loop body
LE: loop exit
PB: predicated region body
PF: predicated region fallthrough
CT: control target
= control target key end

     0   :  { %v5337_v0 = vmov 0   ;;  %vm50_vm0 = vcmask 64512   ;;  %v3078_v18 = vmov 1   ;;  %v3079_v27 = vmov 2   ;;  %s5324_s11 = inlined_call_operand.vmem [shape: f32[128,9], index: 11, kind: input, shape index: {}]   ;;  %s5325_s0 = inlined_call_operand.vmem [shape: f32[8,1024], index: 0, kind: input, shape index: {}]   ;;  %s5326_s10 = inlined_call_operand.vmem [shape: f32[8,8], index: 10, kind: input, shape index: {}]   ;;  %s5327_s2 = inlined_call_operand.vmem [shape: f32[64,576], index: 2, kind: input, shape index: {}]   ;;  %s5328_s1 = inlined_call_operand.vmem [shape: f32[128,64], index: 1, kind: input, shape index: {}]   ;;  %s5329_s3 = inlined_call_operand.vmem [shape: f32[9,64], index: 3, kind: input, shape index: {}]   ;;  %s5330_s4 = inlined_call_operand.vmem [shape: f32[1,64], index: 4, kind: input, shape index: {}]   ;;  %s5331_s5 = inlined_call_operand.vmem [shape: f32[1024,64], index: 5, kind: input, shape index: {}]   ;;  %s5332_s7 = inlined_call_operand.vmem [shape: f32[64,32], index: 7, kind: input, shape index: {}]   ;;  %s5333_s6 = inlined_call_operand.vmem [shape: f32[1,64], index: 6, kind: input, shape index: {}]   ;;  %s5334_s8 = inlined_call_operand.vmem [shape: f32[1,32], index: 8, kind: input, shape index: {}]   ;;  %s5335_s9 = inlined_call_operand.vmem [shape: f32[8,32], index: 9, kind: input, shape index: {}]   ;;  %s5336_s12 = inlined_call_operand.vmem [shape: f32[8,1], index: 12, kind: output, shape index: {}]  }
   0x1   :  { %2998 = vset.pattern.permute.xlu2 %v5337_v0  ;;  %2997 = vset.pattern.permute.xlu1 %v5337_v0  ;;  %v3157_v1 = vld [vmem:[%s5324_s11 + $0x18] sm:$0xff]  ;;  %v3162_v2 = vld [vmem:[%s5324_s11 + $0x8] sm:$0xff]  ;;  %v3167_v3 = vld [vmem:[%s5325_s0] sm:$0xff]  ;;  %v3080_v33 = vmov 3   ;;  %vm552_vm1 = vcmask 523264   ;;  %vm2080_vm2 = vcmask 1040384  }
   0x2   :  { %2996 = vset.pattern.permute.xlu0 %v5337_v0  ;;  %946 = vperm.xlu2 %2998, %v3157_v1   ;;  %v3174_v4 = vld [vmem:[%s5325_s0 + $0x8] sm:$0xff]  ;;  %v3179_v5 = vld [vmem:[%s5324_s11] sm:$0xff]  ;;  %v3191_v7 = vld [vmem:[%s5325_s0 + $0x18] sm:$0xff]  ;;  %vm2047_vm7 = vcmask 72704  }
   0x3   :  { %v3184_v6 = vld [vmem:[%s5326_s10] sm:$0xff]  ;;  %936 = vperm.xlu1 %2997, %v3162_v2   ;;  %69 = vmatpush.msra.mxu2 %v3167_v3  ;;  %v3203_v9 = vld [vmem:[%s5325_s0 + $0x10] sm:$0xff]  ;;  %v3212_v10 = vld [vmem:[%s5325_s0 + $0x28] sm:$0xff] }
   0x4   :  { %v3196_v8 = vld [vmem:[%s5325_s0 + $0x20] sm:$0xff]  ;;  %89 = vmatpush.msra.mxu1 %v3174_v4  ;;  %931 = vperm.xlu0 %2996, %v3179_v5   ;;  %v3219_v11 = vld [vmem:[%s5325_s0 + $0x38] sm:$0xff]  ;;  %v3224_v12 = vld [vmem:[%s5325_s0 + $0x30] sm:$0xff] }
   0x5   :  { %2856 = vmatmul.msk.f32.vlgmr.msra.gmra.mxu2 %vm50_vm0, %v3184_v6  ;;  %2857 = vmatmul.msk.f32.vlgmr.msra.gmra.mxu1 %vm50_vm0, %v3184_v6  ;;  %v3229_v13 = vld [vmem:[%s5324_s11 + $0x20] sm:$0xff]  ;;  %v3237_v14 = vld [vmem:[%s5324_s11 + $0x10] sm:$0xff]  ;;  %v3245_v15 = vld [vmem:[%s5324_s11 + $0x68] sm:$0xff] }
   0x6   :  { %129 = vmatpush.msra.mxu3 %v3191_v7  ;;  %149 = vmatpush.msra.mxu0 %v3196_v8  ;;  %v3259_v16 = vld [vmem:[%s5324_s11 + $0x30] sm:$0xff]  ;;  %v3266_v17 = vld [vmem:[%s5324_s11 + $0x28] sm:$0xff]  ;;  %v3276_v19 = vld [vmem:[%s5324_s11 + $0x40] sm:$0xff] }
   0x7   :  { %109 = vmatpush.msrb.mxu2 %v3203_v9  ;;  %2859 = vmatmul.msk.f32.vlgmr.msra.gmra.mxu3 %vm50_vm0, %v3184_v6  ;;  %v3281_v20 = vld [vmem:[%s5324_s11 + $0x38] sm:$0xff]  ;;  %v3289_v21 = vld [vmem:[%s5324_s11 + $0x50] sm:$0xff]  ;;  %v3294_v22 = vld [vmem:[%s5324_s11 + $0x48] sm:$0xff] }
   0x8   :  { %2860 = vmatmul.msk.f32.vlgmr.msra.gmra.mxu0 %vm50_vm0, %v3184_v6  ;;  %169 = vmatpush.msrb.mxu1 %v3212_v10  ;;  %v3302_v23 = vld [vmem:[%s5324_s11 + $0x60] sm:$0xff]  ;;  %v3307_v24 = vld [vmem:[%s5324_s11 + $0x58] sm:$0xff]  ;;  %v3320_v26 = vld [vmem:[%s5324_s11 + $0x70] sm:$0xff] }
   0x9   :  { %209 = vmatpush.msrb.mxu3 %v3219_v11  ;;  %189 = vmatpush.msra.mxu2 %v3224_v12  ;;  %v3315_v25 = vld [vmem:[%s5324_s11 + $0x78] sm:$0xff]  ;;  %v548_v56 = vld [vmem:[%s5327_s2 + $0x120] sm:$0xff]  ;;  %v542_v57 = vld [vmem:[%s5327_s2 + $0xf0] sm:$0xff] }
   0xa   :  { %951 = vperm.xlu2 %2998, %v3229_v13   ;;  %v547_v55 = vld [vmem:[%s5327_s2 + $0x118] sm:$0xff]  ;;  %v537_v62 = vld [vmem:[%s5327_s2 + $0xc8] sm:$0xff]  ;;  %v538_v63 = vld [vmem:[%s5327_s2 + $0xd0] sm:$0xff] }
   0xb   :  { %941 = vperm.xlu1 %2997, %v3237_v14   ;;  %v543_v60 = vld [vmem:[%s5327_s2 + $0xf8] sm:$0xff] }
   0xc   :  { %996 = vperm.xlu0 %2996, %v3245_v15  }
   0xd   :  { %2858 = vmatmul.msk.f32.vlgmr.msrb.gmra.mxu2 %vm50_vm0, %v3184_v6  ;;  %2861 = vmatmul.msk.f32.vlgmr.msrb.gmra.mxu1 %vm50_vm0, %v3184_v6 }
   0xf   :  { %2863 = vmatmul.msk.f32.vlgmr.msrb.gmra.mxu3 %vm50_vm0, %v3184_v6 }
  0x12   :  { %961 = vperm.xlu2 %2998, %v3259_v16  }
  0x13   :  { %956 = vperm.xlu1 %2997, %v3266_v17  }
  0x14   :  { %2999 = vset.pattern.permute.xlu0 %v3078_v18 }
  0x15   :  { %2862 = vmatmul.msk.f32.vlgmr.msra.gmra.mxu2 %vm50_vm0, %v3184_v6  ;;  %1090 = vperm.xlu0 %2999, %v3179_v5  }
  0x1a   :  { %971 = vperm.xlu2 %2998, %v3276_v19  }
  0x1b   :  { %966 = vperm.xlu1 %2997, %v3281_v20  }
  0x1d   :  { %1110 = vperm.xlu0 %2999, %v3266_v17  }
  0x22   :  { %981 = vperm.xlu2 %2998, %v3289_v21  }
  0x23   :  { %976 = vperm.xlu1 %2997, %v3294_v22  }
  0x25   :  { %1122 = vperm.xlu0 %2999, %v3276_v19  }
  0x2a   :  { %991 = vperm.xlu2 %2998, %v3302_v23  }
  0x2b   :  { %986 = vperm.xlu1 %2997, %v3307_v24  }
  0x2d   :  { %1134 = vperm.xlu0 %2999, %v3307_v24  }
  0x32   :  { %1006 = vperm.xlu2 %2998, %v3315_v25  }
  0x33   :  { %1001 = vperm.xlu1 %2997, %v3320_v26  }
  0x35   :  { %1146 = vperm.xlu0 %2999, %v3320_v26  }
  0x3a   :  { %3001 = vset.pattern.permute.xlu2 %v3078_v18 }
  0x3b   :  { %3000 = vset.pattern.permute.xlu1 %v3078_v18  ;;  %1098 = vperm.xlu2 %3001, %v3237_v14  }
  0x3c   :  { %1094 = vperm.xlu1 %3000, %v3162_v2  }
  0x3d   :  { %3003 = vset.pattern.permute.xlu0 %v3079_v27 }
  0x3e   :  { %1190 = vperm.xlu0 %3003, %v3162_v2  }
  0x43   :  { %1106 = vperm.xlu2 %3001, %v3229_v13  }
  0x44   :  { %1102 = vperm.xlu1 %3000, %v3157_v1  }
  0x46   :  { %1210 = vperm.xlu0 %3003, %v3259_v16  }
  0x4b   :  { %1118 = vperm.xlu2 %3001, %v3281_v20  }
  0x4c   :  { %1114 = vperm.xlu1 %3000, %v3259_v16  }
  0x4e   :  { %1222 = vperm.xlu0 %3003, %v3294_v22  }
  0x53   :  { %1130 = vperm.xlu2 %3001, %v3289_v21  }
  0x54   :  { %1126 = vperm.xlu1 %3000, %v3294_v22  }
  0x56   :  { %1234 = vperm.xlu0 %3003, %v3302_v23  }
  0x5b   :  { %1142 = vperm.xlu2 %3001, %v3245_v15  }
  0x5c   :  { %1138 = vperm.xlu1 %3000, %v3302_v23   ;;  %v3339_v28 = vpop.permute.xlu2 %946 }
  0x5e   :  { %1246 = vperm.xlu0 %3003, %v3315_v25  }
  0x63   :  { %3002 = vset.pattern.permute.xlu2 %v3079_v27 }
  0x64   :  { %1150 = vperm.xlu1 %3000, %v3315_v25   ;;  %v3343_v29 = vpop.permute.xlu2 %951  ;;  %1186 = vperm.xlu2 %3002, %v3179_v5  }
  0x65   :  { %5388 = vst [vmem:[#allocation2_spill] sm:$0xff] %v3343_v29 }
  0x66   :  { %3007 = vset.pattern.permute.xlu0 %v3080_v33 }
  0x67   :  { %1350 = vperm.xlu0 %3007, %v3237_v14  }
  0x6c   :  { %3004 = vset.pattern.permute.xlu1 %v3079_v27  ;;  %v3346_v30 = vpop.permute.xlu2 %961  ;;  %1198 = vperm.xlu2 %3002, %v3157_v1  }
  0x6d   :  { %5389 = vst [vmem:[#allocation3_spill] sm:$0xff] %v3346_v30  ;;  %1194 = vperm.xlu1 %3004, %v3237_v14  }
  0x6f   :  { %1370 = vperm.xlu0 %3007, %v3281_v20  }
  0x74   :  { %v3350_v31 = vpop.permute.xlu2 %971  ;;  %1206 = vperm.xlu2 %3002, %v3266_v17  }
  0x75   :  { %5390 = vst [vmem:[#allocation4_spill] sm:$0xff] %v3350_v31  ;;  %1202 = vperm.xlu1 %3004, %v3229_v13   ;;  %v3354_v32 = vpop.permute.xlu1 %936 }
  0x76   :  { %v3396_v58 = vpop.permute.xlu0 %931 }
  0x77   :  { %1382 = vperm.xlu0 %3007, %v3289_v21   ;;  %5396 = vst [vmem:[#allocation10_spill] sm:$0xff] %v3396_v58 }
  0x7c   :  { %v3358_v34 = vpop.permute.xlu2 %981  ;;  %1218 = vperm.xlu2 %3002, %v3276_v19  }
  0x7d   :  { %5391 = vst [vmem:[#allocation5_spill] sm:$0xff] %v3358_v34  ;;  %1214 = vperm.xlu1 %3004, %v3281_v20   ;;  %v3362_v35 = vpop.permute.xlu1 %941 }
  0x7e   :  { %5392 = vst [vmem:[#allocation6_spill] sm:$0xff] %v3362_v35 }
  0x7f   :  { %1394 = vperm.xlu0 %3007, %v3245_v15  }
  0x82   :  { %v91_v36 = vpop.f32.mrf.mxu1 }
  0x83   :  { %v215_v37 = vsub.f32 %v3174_v4, %v91_v36  ;;  %v528_v36 = vld [vmem:[%s5327_s2 + $0x80] sm:$0xff] }
  0x84   :  { %v3366_v38 = vpop.permute.xlu2 %991  ;;  %1230 = vperm.xlu2 %3002, %v3307_v24  }
  0x85   :  { %5393 = vst [vmem:[#allocation7_spill] sm:$0xff] %v3366_v38  ;;  %v223_v39 = vmul.f32 %v215_v37, %v215_v37  ;;  %1226 = vperm.xlu1 %3004, %v3289_v21   ;;  %v3370_v40 = vpop.permute.xlu1 %956  ;;  %v151_v41 = vpop.f32.mrf.mxu0 }
  0x86   :  { %v218_v42 = vsub.f32 %v3196_v8, %v151_v41 }
  0x87   :  { %265 = vmatpush.msra.mxu1 %v223_v39  ;;  %v550_v39 = vld [vmem:[%s5327_s2 + $0x130] sm:$0xff] }
  0x88   :  { %v71_v43 = vpop.f32.mrf.mxu2  ;;  %2865 = vmatmul.msk.f32.vlgmr.msra.gmra.mxu1 %vm50_vm0, %v3184_v6  ;;  %v226_v47 = vmul.f32 %v218_v42, %v218_v42  ;;  %v523_v42 = vld [vmem:[%s5327_s2 + $0x58] sm:$0xff] }
  0x89   :  { %v214_v44 = vsub.f32 %v3167_v3, %v71_v43  ;;  %v3448_v43 = vpop.permute.xlu0 %996 }
  0x8a   :  { %v171_v45 = vpop.f32.mrf.mxu1  ;;  %v131_v46 = vpop.f32.mrf.mxu3  ;;  %5399 = vst [vmem:[#allocation13_spill] sm:$0xff] %v3448_v43 }
  0x8b   :  { %v219_v48 = vsub.f32 %v3212_v10, %v171_v45  ;;  %v222_v49 = vmul.f32 %v214_v44, %v214_v44  ;;  %v217_v50 = vsub.f32 %v3191_v7, %v131_v46  ;;  %v532_v7 = vld [vmem:[%s5327_s2 + $0xa0] sm:$0xff]  ;;  %v533_v10 = vld [vmem:[%s5327_s2 + $0xa8] sm:$0xff] }
  0x8c   :  { %v3379_v51 = vpop.permute.xlu2 %1006  ;;  %1242 = vperm.xlu2 %3002, %v3320_v26   ;;  %v517_v44 = vld [vmem:[%s5327_s2 + $0x28] sm:$0xff] }
  0x8d   :  { %5394 = vst [vmem:[#allocation8_spill] sm:$0xff] %v3379_v51  ;;  %v227_v52 = vmul.f32 %v219_v48, %v219_v48  ;;  %245 = vmatpush.msrb.mxu0 %v222_v49  ;;  %1238 = vperm.xlu1 %3004, %v3245_v15   ;;  %v3383_v53 = vpop.permute.xlu1 %966  ;;  %v225_v54 = vmul.f32 %v217_v50, %v217_v50  ;;  %v549_v46 = vld [vmem:[%s5327_s2 + $0x128] sm:$0xff]  ;;  %v3469_v49 = vld [vmem:[%s5328_s1] sm:$0xff]  ;;  %v3748_v51 = vld [vmem:[%s5328_s1 + $0x58] sm:$0xff] }
  0x8e   :  { %5395 = vst [vmem:[#allocation9_spill] sm:$0xff] %v3383_v53  ;;  %2864 = vmatmul.msk.f32.vlgmr.msrb.gmra.mxu0 %vm50_vm0, %v3184_v6  ;;  %v513_v50 = vld [vmem:[%s5327_s2 + $0x8] sm:$0xff] }
  0x8f   :  { %325 = vmatpush.msra.mxu0 %v226_v47  ;;  %345 = vmatpush.msrb.mxu1 %v227_v52  ;;  %v512_v47 = vld [vmem:[%s5327_s2] sm:$0xff]  ;;  %5426 = vst [vmem:[#allocation40_spill] sm:$0xff] %v3748_v51 }
  0x90   :  { %v111_v59 = vpop.f32.mrf.mxu2  ;;  %2869 = vmatmul.msk.f32.vlgmr.msrb.gmra.mxu1 %vm50_vm0, %v3184_v6  ;;  %305 = vmatpush.msra.mxu3 %v225_v54  ;;  %v545_v54 = vld [vmem:[%s5327_s2 + $0x108] sm:$0xff] }
  0x91   :  { %609 = vmatpush.msrb.mxu0 %v547_v55  ;;  %v216_v61 = vsub.f32 %v3203_v9, %v111_v59  ;;  %670 = vmatpush.msra.mxu1 %v548_v56  ;;  %v544_v55 = vld [vmem:[%s5327_s2 + $0x100] sm:$0xff]  ;;  %v539_v56 = vld [vmem:[%s5327_s2 + $0xd8] sm:$0xff]  ;;  %v534_v59 = vld [vmem:[%s5327_s2 + $0xb0] sm:$0xff] }
  0x92   :  { %v211_v3 = vpop.f32.mrf.mxu3  ;;  %2867 = vmatmul.msk.f32.vlgmr.msra.gmra.mxu3 %vm50_vm0, %v3184_v6 }
  0x93   :  { %610 = vmatpush.msrb.mxu0 %v542_v57  ;;  %v224_v4 = vmul.f32 %v216_v61, %v216_v61  ;;  %671 = vmatpush.msra.mxu1 %v543_v60  ;;  %v221_v8 = vsub.f32 %v3219_v11, %v211_v3  ;;  %v527_v11 = vld [vmem:[%s5327_s2 + $0x78] sm:$0xff]  ;;  %v3081_v60 = vmov 4   ;;  %v3503_v61 = vpop.permute.xlu0 %1090  ;;  %v3513_v3 = vld [vmem:[%s5328_s1 + $0x8] sm:$0xff] }
  0x94   :  { %3006 = vset.pattern.permute.xlu2 %v3080_v33  ;;  %v535_v57 = vld [vmem:[%s5327_s2 + $0xb8] sm:$0xff]  ;;  %3008 = vset.pattern.permute.xlu0 %v3081_v60  ;;  %5401 = vst [vmem:[#allocation15_spill] sm:$0xff] %v3503_v61  ;;  %v3723_v61 = vld [vmem:[%s5328_s1 + $0x50] sm:$0xff] }
  0x95   :  { %611 = vmatpush.msrb.mxu0 %v537_v62  ;;  %672 = vmatpush.msra.mxu1 %v538_v63  ;;  %v3418_v9 = vpop.permute.xlu1 %976  ;;  %v3423_v18 = vpop.permute.xlu2 %1098  ;;  %v229_v27 = vmul.f32 %v221_v8, %v221_v8  ;;  %v530_v62 = vld [vmem:[%s5327_s2 + $0x90] sm:$0xff]  ;;  %v525_v8 = vld [vmem:[%s5327_s2 + $0x68] sm:$0xff]  ;;  %5423 = vst [vmem:[#allocation37_spill] sm:$0xff] %v3723_v61 }
  0x96   :  { %285 = vmatpush.msrb.mxu2 %v224_v4  ;;  %5397 = vst [vmem:[#allocation11_spill] sm:$0xff] %v3418_v9  ;;  %3005 = vset.pattern.permute.xlu1 %v3080_v33  ;;  %v522_v33 = vld [vmem:[%s5327_s2 + $0x50] sm:$0xff]  ;;  %v3833_v9 = vld [vmem:[%s5328_s1 + $0x78] sm:$0xff] }
  0x97   :  { %5398 = vst [vmem:[#allocation12_spill] sm:$0xff] %v3423_v18  ;;  %612 = vmatpush.msrb.mxu0 %v532_v7  ;;  %2866 = vmatmul.msk.f32.vlgmr.msrb.gmra.mxu2 %vm50_vm0, %v3184_v6  ;;  %v529_v7 = vld [vmem:[%s5327_s2 + $0x88] sm:$0xff] }
  0x98   :  { %2868 = vmatmul.msk.f32.vlgmr.msra.gmra.mxu0 %vm50_vm0, %v3184_v6  ;;  %673 = vmatpush.msra.mxu1 %v533_v10  ;;  %v191_v37 = vpop.f32.mrf.mxu2  ;;  %v524_v10 = vld [vmem:[%s5327_s2 + $0x60] sm:$0xff]  ;;  %5442 = vst [vmem:[#allocation54_spill] sm:$0xff] %v3833_v9 }
  0x99   :  { %1342 = vperm.xlu1 %3005, %v3179_v5   ;;  %613 = vmatpush.msrb.mxu0 %v527_v11  ;;  %v220_v41 = vsub.f32 %v3224_v12, %v191_v37  ;;  %v518_v12 = vld [vmem:[%s5327_s2 + $0x30] sm:$0xff]  ;;  %v519_v11 = vld [vmem:[%s5327_s2 + $0x38] sm:$0xff] }
  0x9a   :  { %1346 = vperm.xlu2 %3006, %v3162_v2   ;;  %674 = vmatpush.msra.mxu1 %v528_v36  ;;  %v515_v36 = vld [vmem:[%s5327_s2 + $0x18] sm:$0xff]  ;;  %v514_v37 = vld [vmem:[%s5327_s2 + $0x10] sm:$0xff] }
  0x9b   :  { %385 = vmatpush.msrb.mxu3 %v229_v27  ;;  %v228_v45 = vmul.f32 %v220_v41, %v220_v41  ;;  %614 = vmatpush.msrb.mxu0 %v522_v33  ;;  %v520_v27 = vld [vmem:[%s5327_s2 + $0x40] sm:$0xff]  ;;  %v3548_v33 = vld [vmem:[%s5328_s1 + $0x10] sm:$0xff] }
  0x9c   :  { %675 = vmatpush.msra.mxu1 %v523_v42  ;;  %2871 = vmatmul.msk.f32.vlgmr.msrb.gmra.mxu3 %vm50_vm0, %v3184_v6  ;;  %v3555_v42 = vpop.permute.xlu0 %1110 }
  0x9d   :  { %799 = vmatpush.msra.mxu3 %v550_v39  ;;  %615 = vmatpush.msrb.mxu0 %v517_v44  ;;  %v3464_v48 = vpop.permute.xlu1 %986  ;;  %v3474_v52 = vpop.permute.xlu2 %1106  ;;  %v3570_v44 = vld [vmem:[%s5328_s1 + $0x18] sm:$0xff] }
  0x9e   :  { %365 = vmatpush.msra.mxu2 %v228_v45  ;;  %5400 = vst [vmem:[#allocation14_spill] sm:$0xff] %v3464_v48  ;;  %676 = vmatpush.msra.mxu1 %v518_v12 }
  0x9f   :  { %616 = vmatpush.msrb.mxu0 %v512_v47  ;;  %2870 = vmatmul.msk.f32.vlgmr.msra.gmra.mxu2 %vm50_vm0, %v3184_v6  ;;  %v540_v6 = vld [vmem:[%s5327_s2 + $0xe0] sm:$0xff] }
  0xa0   :  { %734 = vmatpush.msrb.mxu2 %v549_v46  ;;  %2872 = vmatmul.msk.f32.vlgmr.msrb.gmra.mxu0 %vm552_vm1, %v3469_v49  ;;  %v3592_v47 = vld [vmem:[%s5328_s1 + $0x20] sm:$0xff] }
  0xa1   :  { %677 = vmatpush.msra.mxu1 %v513_v50  ;;  %1354 = vperm.xlu1 %3005, %v3157_v1  }
  0xa2   :  { %2888 = vmatmul.msk.f32.vlgmr.msra.gmra.mxu1 %vm552_vm1, %v3469_v49  ;;  %800 = vmatpush.msra.mxu3 %v545_v54 }
  0xa3   :  { %735 = vmatpush.msrb.mxu2 %v544_v55  ;;  %1358 = vperm.xlu2 %3006, %v3229_v13  }
  0xa4   :  { %801 = vmatpush.msra.mxu3 %v540_v6  ;;  %1438 = vperm.xlu0 %3008, %v3179_v5   ;;  %v3583_v46 = vpop.permute.xlu0 %1122 }
  0xa5   :  { %736 = vmatpush.msrb.mxu2 %v539_v56  ;;  %v3508_v63 = vpop.permute.xlu1 %1001  ;;  %v3515_v4 = vpop.permute.xlu2 %1118  ;;  %5406 = vst [vmem:[#allocation20_spill] sm:$0xff] %v3583_v46 }
  0xa6   :  { %5402 = vst [vmem:[#allocation16_spill] sm:$0xff] %v3508_v63  ;;  %802 = vmatpush.msra.mxu3 %v535_v57  ;;  %v3638_v57 = vld [vmem:[%s5328_s1 + $0x30] sm:$0xff] }
  0xa7   :  { %5403 = vst [vmem:[#allocation17_spill] sm:$0xff] %v3515_v4  ;;  %737 = vmatpush.msrb.mxu2 %v534_v59 }
  0xa8   :  { %803 = vmatpush.msra.mxu3 %v530_v62  ;;  %2873 = vmatmul.msk.f32.gmra.mxu0 %vm552_vm1, %v3513_v3 }
  0xa9   :  { %738 = vmatpush.msrb.mxu2 %v529_v7  ;;  %1362 = vperm.xlu1 %3005, %v3266_v17  }
  0xaa   :  { %2889 = vmatmul.msk.f32.gmra.mxu1 %vm552_vm1, %v3513_v3  ;;  %804 = vmatpush.msra.mxu3 %v525_v8 }
  0xab   :  { %739 = vmatpush.msrb.mxu2 %v524_v10  ;;  %1366 = vperm.xlu2 %3006, %v3259_v16  }
  0xac   :  { %805 = vmatpush.msra.mxu3 %v520_v27  ;;  %1458 = vperm.xlu0 %3008, %v3266_v17   ;;  %v3608_v55 = vpop.permute.xlu0 %1134  ;;  %v3678_v27 = vld [vmem:[%s5328_s1 + $0x40] sm:$0xff] }
  0xad   :  { %740 = vmatpush.msrb.mxu2 %v519_v11  ;;  %v3550_v39 = vpop.permute.xlu2 %1130  ;;  %5409 = vst [vmem:[#allocation23_spill] sm:$0xff] %v3608_v55  ;;  %v5339_v11 = vmov 7  }
  0xae   :  { %5404 = vst [vmem:[#allocation18_spill] sm:$0xff] %v3550_v39  ;;  %806 = vmatpush.msra.mxu3 %v515_v36  ;;  %v3553_v41 = vpop.permute.xlu1 %1094 }
  0xaf   :  { %741 = vmatpush.msrb.mxu2 %v514_v37  ;;  %2920 = vmatmul.msk.f32.vlgmr.msra.gmra.mxu3 %vm552_vm1, %v3469_v49  ;;  %5415 = vst [vmem:[#allocation29_spill] sm:$0xff] %v3678_v27 }
  0xb0   :  { %2904 = vmatmul.msk.f32.vlgmr.msrb.gmra.mxu2 %vm552_vm1, %v3469_v49  ;;  %2874 = vmatmul.msk.f32.gmra.mxu0 %vm552_vm1, %v3548_v33 }
  0xb1   :  { %1374 = vperm.xlu1 %3005, %v3276_v19  }
  0xb2   :  { %2890 = vmatmul.msk.f32.gmra.mxu1 %vm552_vm1, %v3548_v33 }
  0xb3   :  { %1378 = vperm.xlu2 %3006, %v3294_v22  }
  0xb4   :  { %1470 = vperm.xlu0 %3008, %v3276_v19  }
  0xb5   :  { %v3572_v45 = vpop.permute.xlu2 %1142 }
  0xb6   :  { %5405 = vst [vmem:[#allocation19_spill] sm:$0xff] %v3572_v45  ;;  %v3575_v12 = vpop.permute.xlu1 %1102 }
  0xb7   :  { %2921 = vmatmul.msk.f32.gmra.mxu3 %vm552_vm1, %v3513_v3 }
  0xb8   :  { %2905 = vmatmul.msk.f32.gmra.mxu2 %vm552_vm1, %v3513_v3  ;;  %2875 = vmatmul.msk.f32.gmra.mxu0 %vm552_vm1, %v3570_v44 }
  0xb9   :  { %1386 = vperm.xlu1 %3005, %v3307_v24  }
  0xba   :  { %2891 = vmatmul.msk.f32.gmra.mxu1 %vm552_vm1, %v3570_v44 }
  0xbb   :  { %1390 = vperm.xlu2 %3006, %v3302_v23  }
  0xbc   :  { %1482 = vperm.xlu0 %3008, %v3307_v24   ;;  %v3614_v24 = vld [vmem:[%s5328_s1 + $0x28] sm:$0xff] }
  0xbe   :  { %v3595_v50 = vpop.permute.xlu1 %1114  ;;  %v3597_v54 = vpop.permute.xlu2 %1186 }
  0xbf   :  { %5407 = vst [vmem:[#allocation21_spill] sm:$0xff] %v3595_v50  ;;  %2922 = vmatmul.msk.f32.gmra.mxu3 %vm552_vm1, %v3548_v33 }
  0xc0   :  { %5408 = vst [vmem:[#allocation22_spill] sm:$0xff] %v3597_v54  ;;  %2906 = vmatmul.msk.f32.gmra.mxu2 %vm552_vm1, %v3548_v33  ;;  %2876 = vmatmul.msk.f32.gmra.mxu0 %vm552_vm1, %v3592_v47 }
  0xc1   :  { %1398 = vperm.xlu1 %3005, %v3320_v26  }
  0xc2   :  { %2892 = vmatmul.msk.f32.gmra.mxu1 %vm552_vm1, %v3592_v47 }
  0xc3   :  { %1402 = vperm.xlu2 %3006, %v3315_v25  }
  0xc4   :  { %1494 = vperm.xlu0 %3008, %v3320_v26   ;;  %v3633_v26 = vpop.permute.xlu0 %1146 }
  0xc5   :  { %5411 = vst [vmem:[#allocation25_spill] sm:$0xff] %v3633_v26 }
  0xc6   :  { %v3617_v6 = vpop.permute.xlu1 %1126  ;;  %v3619_v56 = vpop.permute.xlu2 %1198 }
  0xc7   :  { %5410 = vst [vmem:[#allocation24_spill] sm:$0xff] %v3617_v6  ;;  %2923 = vmatmul.msk.f32.gmra.mxu3 %vm552_vm1, %v3570_v44 }
  0xc8   :  { %2907 = vmatmul.msk.f32.gmra.mxu2 %vm552_vm1, %v3570_v44  ;;  %2877 = vmatmul.msk.f32.gmra.mxu0 %vm552_vm1, %v3614_v24 }
  0xc9   :  { %3009 = vset.pattern.permute.xlu1 %v3081_v60 }
  0xca   :  { %2893 = vmatmul.msk.f32.gmra.mxu1 %vm552_vm1, %v3614_v24  ;;  %1442 = vperm.xlu1 %3009, %v3162_v2  }
  0xcb   :  { %3010 = vset.pattern.permute.xlu2 %v3081_v60  ;;  %v3657_v60 = vld [vmem:[%s5328_s1 + $0x38] sm:$0xff] }
  0xcc   :  { %1446 = vperm.xlu2 %3010, %v3237_v14   ;;  %v3665_v10 = vpop.permute.xlu0 %1190  ;;  %3014 = vset.pattern.permute.xlu0 %v5339_v11  ;;  %v3701_v11 = vld [vmem:[%s5328_s1 + $0x48] sm:$0xff] }
  0xcd   :  { %1790 = vperm.xlu0 %3014, %v3179_v5   ;;  %5419 = vst [vmem:[#allocation33_spill] sm:$0xff] %v3701_v11 }
  0xce   :  { %v3640_v59 = vpop.permute.xlu1 %1138  ;;  %v3642_v62 = vpop.permute.xlu2 %1206 }
  0xcf   :  { %5412 = vst [vmem:[#allocation26_spill] sm:$0xff] %v3640_v59  ;;  %2924 = vmatmul.msk.f32.gmra.mxu3 %vm552_vm1, %v3592_v47  ;;  %v3789_v59 = vld [vmem:[%s5328_s1 + $0x68] sm:$0xff] }
  0xd0   :  { %2908 = vmatmul.msk.f32.gmra.mxu2 %vm552_vm1, %v3592_v47  ;;  %2878 = vmatmul.msk.f32.gmra.mxu0 %vm552_vm1, %v3638_v57  ;;  %5434 = vst [vmem:[#allocation47_spill] sm:$0xff] %v3789_v59 }
  0xd2   :  { %2894 = vmatmul.msk.f32.gmra.mxu1 %vm552_vm1, %v3638_v57  ;;  %1450 = vperm.xlu1 %3009, %v3157_v1  }
  0xd4   :  { %1454 = vperm.xlu2 %3010, %v3229_v13   ;;  %v3692_v0 = vpop.permute.xlu0 %1210 }
  0xd5   :  { %5418 = vst [vmem:[#allocation32_spill] sm:$0xff] %v3692_v0  ;;  %1810 = vperm.xlu0 %3014, %v3266_v17  }
  0xd6   :  { %v3659_v7 = vpop.permute.xlu1 %1150  ;;  %v3661_v8 = vpop.permute.xlu2 %1218 }
  0xd7   :  { %5413 = vst [vmem:[#allocation27_spill] sm:$0xff] %v3659_v7  ;;  %2925 = vmatmul.msk.f32.gmra.mxu3 %vm552_vm1, %v3614_v24 }
  0xd8   :  { %5414 = vst [vmem:[#allocation28_spill] sm:$0xff] %v3661_v8  ;;  %2909 = vmatmul.msk.f32.gmra.mxu2 %vm552_vm1, %v3614_v24  ;;  %2879 = vmatmul.msk.f32.gmra.mxu0 %vm552_vm1, %v3657_v60 }
  0xda   :  { %2895 = vmatmul.msk.f32.gmra.mxu1 %vm552_vm1, %v3657_v60  ;;  %1462 = vperm.xlu1 %3009, %v3259_v16  }
  0xdc   :  { %1466 = vperm.xlu2 %3010, %v3281_v20  }
  0xdd   :  { %1814 = vperm.xlu0 %3014, %v3259_v16  }
  0xde   :  { %v3685_v37 = vpop.permute.xlu2 %1230 }
  0xdf   :  { %2926 = vmatmul.msk.f32.gmra.mxu3 %vm552_vm1, %v3638_v57  ;;  %v3683_v36 = vpop.permute.xlu1 %1194  ;;  %5417 = vst [vmem:[#allocation31_spill] sm:$0xff] %v3685_v37 }
  0xe0   :  { %5416 = vst [vmem:[#allocation30_spill] sm:$0xff] %v3683_v36  ;;  %2910 = vmatmul.msk.f32.gmra.mxu2 %vm552_vm1, %v3638_v57  ;;  %2880 = vmatmul.msk.f32.gmra.mxu0 %vm552_vm1, %v3678_v27 }
  0xe2   :  { %2896 = vmatmul.msk.f32.gmra.mxu1 %vm552_vm1, %v3678_v27  ;;  %1474 = vperm.xlu1 %3009, %v3294_v22  }
  0xe4   :  { %1478 = vperm.xlu2 %3010, %v3289_v21   ;;  %v3717_v21 = vpop.permute.xlu0 %1222 }
  0xe5   :  { %5422 = vst [vmem:[#allocation36_spill] sm:$0xff] %v3717_v21 }
  0xe6   :  { %v3712_v22 = vpop.permute.xlu2 %1242 }
  0xe7   :  { %2927 = vmatmul.msk.f32.gmra.mxu3 %vm552_vm1, %v3657_v60  ;;  %v3705_v54 = vpop.permute.xlu1 %1202  ;;  %5421 = vst [vmem:[#allocation35_spill] sm:$0xff] %v3712_v22 }
  0xe8   :  { %5420 = vst [vmem:[#allocation34_spill] sm:$0xff] %v3705_v54  ;;  %2911 = vmatmul.msk.f32.gmra.mxu2 %vm552_vm1, %v3657_v60  ;;  %2881 = vmatmul.msk.f32.gmra.mxu0 %vm552_vm1, %v3701_v11 }
  0xea   :  { %2897 = vmatmul.msk.f32.gmra.mxu1 %vm552_vm1, %v3701_v11  ;;  %1486 = vperm.xlu1 %3009, %v3302_v23   ;;  %v5341_v23 = vmov 5  }
  0xeb   :  { %3018 = vset.pattern.permute.xlu0 %v5341_v23 }
  0xec   :  { %1490 = vperm.xlu2 %3010, %v3245_v15   ;;  %v3740_v7 = vpop.permute.xlu0 %1234 }
  0xed   :  { %5425 = vst [vmem:[#allocation39_spill] sm:$0xff] %v3740_v7  ;;  %v3771_v7 = vld [vmem:[%s5328_s1 + $0x60] sm:$0xff] }
  0xee   :  { %5430 = vst [vmem:[#allocation44_spill] sm:$0xff] %v3771_v7 }
  0xef   :  { %2928 = vmatmul.msk.f32.gmra.mxu3 %vm552_vm1, %v3678_v27  ;;  %v3727_v58 = vpop.permute.xlu1 %1214 }
  0xf0   :  { %5424 = vst [vmem:[#allocation38_spill] sm:$0xff] %v3727_v58  ;;  %2912 = vmatmul.msk.f32.gmra.mxu2 %vm552_vm1, %v3678_v27  ;;  %2882 = vmatmul.msk.f32.gmra.mxu0 %vm552_vm1, %v3723_v61 }
  0xf2   :  { %2898 = vmatmul.msk.f32.gmra.mxu1 %vm552_vm1, %v3723_v61  ;;  %1498 = vperm.xlu1 %3009, %v3315_v25  }
  0xf4   :  { %v3737_v15 = vpop.permute.xlu2 %1346  ;;  %3011 = vset.pattern.permute.xlu2 %v5341_v23  ;;  %v3764_v25 = vpop.permute.xlu0 %1246 }
  0xf5   :  { %1534 = vperm.xlu2 %3011, %v3179_v5   ;;  %5429 = vst [vmem:[#allocation43_spill] sm:$0xff] %v3764_v25  ;;  %v5432_v25 = vmov 7  }
  0xf7   :  { %2929 = vmatmul.msk.f32.gmra.mxu3 %vm552_vm1, %v3701_v11  ;;  %v3750_v38 = vpop.permute.xlu1 %1226 }
  0xf8   :  { %5427 = vst [vmem:[#allocation41_spill] sm:$0xff] %v3750_v38  ;;  %2913 = vmatmul.msk.f32.gmra.mxu2 %vm552_vm1, %v3701_v11  ;;  %2883 = vmatmul.msk.f32.gmra.mxu0 %vm552_vm1, %v3748_v51 }
  0xfa   :  { %2899 = vmatmul.msk.f32.gmra.mxu1 %vm552_vm1, %v3748_v51  ;;  %3012 = vset.pattern.permute.xlu1 %v5341_v23 }
  0xfb   :  { %1542 = vperm.xlu1 %3012, %v3237_v14  }
  0xfd   :  { %1546 = vperm.xlu2 %3011, %v3157_v1   ;;  %v3762_v5 = vpop.permute.xlu2 %1358 }
  0xfe   :  { %5428 = vst [vmem:[#allocation42_spill] sm:$0xff] %v3762_v5 }
  0xff   :  { %2930 = vmatmul.msk.f32.gmra.mxu3 %vm552_vm1, %v3723_v61  ;;  %v3775_v23 = vpop.permute.xlu1 %1238 }
 0x100   :  { %2914 = vmatmul.msk.f32.gmra.mxu2 %vm552_vm1, %v3723_v61  ;;  %5431 = vst [vmem:[#allocation45_spill] sm:$0xff] %v3775_v23  ;;  %2884 = vmatmul.msk.f32.gmra.mxu0 %vm552_vm1, %v3771_v7  ;;  %v3795_v23 = vpop.permute.xlu0 %1350 }
 0x101   :  { %5435 = vst [vmem:[#allocation48_spill] sm:$0xff] %v3795_v23  ;;  %v3811_v23 = vld [vmem:[%s5328_s1 + $0x70] sm:$0xff]  ;;  %s3084_s1 = smov 64  }
 0x102   :  { %2900 = vmatmul.msk.f32.gmra.mxu1 %vm552_vm1, %v3771_v7  ;;  %5438 = vst [vmem:[#allocation51_spill] sm:$0xff] %v3811_v23 }
 0x103   :  { %1550 = vperm.xlu1 %3012, %v3229_v13  }
 0x105   :  { %3013 = vset.pattern.permute.xlu2 %v5432_v25  ;;  %v3783_v45 = vpop.permute.xlu2 %1366  ;;  %v267_v35 = vpop.f32.mrf.mxu1 }
 0x106   :  { %5433 = vst [vmem:[#allocation46_spill] sm:$0xff] %v3783_v45  ;;  %1794 = vperm.xlu2 %3013, %v3162_v2   ;;  %v3876_v30 = vadd.f32 1e-08, %v267_v35 }
 0x107   :  { %2931 = vmatmul.msk.f32.gmra.mxu3 %vm552_vm1, %v3748_v51 }
 0x108   :  { %2915 = vmatmul.msk.f32.gmra.mxu2 %vm552_vm1, %v3748_v51  ;;  %2885 = vmatmul.msk.f32.gmra.mxu0 %vm552_vm1, %v3789_v59  ;;  %vm409_vm3 = vcmp.eq.f32.partialorder %v3876_v30, inf  ;;  %vm411_vm10 = vcmp.eq.f32.partialorder %v3876_v30, 0.0 }
 0x10a   :  { %2901 = vmatmul.msk.f32.gmra.mxu1 %vm552_vm1, %v3789_v59 }
 0x10b   :  { %v3799_v43 = vpop.permute.xlu1 %1342  ;;  %3015 = vset.pattern.permute.xlu1 %v5432_v25  ;;  %v247_v36 = vpop.f32.mrf.mxu0 }
 0x10c   :  { %5436 = vst [vmem:[#allocation49_spill] sm:$0xff] %v3799_v43  ;;  %1798 = vperm.xlu1 %3015, %v3237_v14   ;;  %v3819_v43 = vpop.permute.xlu0 %1370  ;;  %v3869_v22 = vadd.f32 1e-08, %v247_v36 }
 0x10d   :  { %v3805_v18 = vpop.permute.xlu2 %1378  ;;  %5439 = vst [vmem:[#allocation52_spill] sm:$0xff] %v3819_v43  ;;  %v347_v38 = vpop.f32.mrf.mxu1 }
 0x10e   :  { %5437 = vst [vmem:[#allocation50_spill] sm:$0xff] %v3805_v18  ;;  %1802 = vperm.xlu2 %3013, %v3157_v1   ;;  %v5440_v18 = vmov 5   ;;  %3044 = vrsqrt.f32 %v3869_v22  ;;  %v3917_v8 = vadd.f32 1e-08, %v347_v38  ;;  %vm397_vm4 = vcmp.eq.f32.partialorder %v3869_v22, inf }
 0x10f   :  { %2932 = vmatmul.msk.f32.gmra.mxu3 %vm552_vm1, %v3771_v7  ;;  %3046 = vrsqrt.f32 %v3876_v30  ;;  %vm399_vm5 = vcmp.eq.f32.partialorder %v3869_v22, 0.0 }
 0x110   :  { %2916 = vmatmul.msk.f32.gmra.mxu2 %vm552_vm1, %v3771_v7  ;;  %2886 = vmatmul.msk.f32.gmra.mxu0 %vm552_vm1, %v3811_v23  ;;  %vm457_vm14 = vcmp.eq.f32.partialorder %v3917_v8, inf  ;;  %vm459_vm0 = vcmp.eq.f32.partialorder %v3917_v8, 0.0 }
 0x112   :  { %2902 = vmatmul.msk.f32.gmra.mxu1 %vm552_vm1, %v3811_v23 }
 0x113   :  { %v3823_v1 = vpop.permute.xlu1 %1354 }
 0x114   :  { %3016 = vset.pattern.permute.xlu1 %v5440_v18 }
 0x115   :  { %v327_v14 = vpop.f32.mrf.mxu0  ;;  %1554 = vperm.xlu1 %3016, %v3266_v17   ;;  %v3827_v21 = vpop.permute.xlu2 %1390 }
 0x116   :  { %5441 = vst [vmem:[#allocation53_spill] sm:$0xff] %v3827_v21  ;;  %1806 = vperm.xlu2 %3013, %v3229_v13   ;;  %v3845_v13 = vpop.permute.xlu0 %1382  ;;  %v307_v34 = vpop.f32.mrf.mxu3  ;;  %v3907_v55 = vadd.f32 1e-08, %v327_v14 }
 0x117   :  { %2933 = vmatmul.msk.f32.gmra.mxu3 %vm552_vm1, %v3789_v59  ;;  %5444 = vst [vmem:[#allocation56_spill] sm:$0xff] %v3845_v13  ;;  %v3891_v35 = vadd.f32 1e-08, %v307_v34 }
 0x118   :  { %2917 = vmatmul.msk.f32.gmra.mxu2 %vm552_vm1, %v3789_v59  ;;  %2887 = vmatmul.msk.f32.gmra.mxu0 %vm552_vm1, %v3833_v9  ;;  %vm445_vm12 = vcmp.eq.f32.partialorder %v3907_v55, inf  ;;  %vm447_vm13 = vcmp.eq.f32.partialorder %v3907_v55, 0.0 }
 0x119   :  { %vm433_vm9 = vcmp.eq.f32.partialorder %v3891_v35, inf  ;;  %vm435_vm11 = vcmp.eq.f32.partialorder %v3891_v35, 0.0 }
 0x11a   :  { %2903 = vmatmul.msk.f32.gmra.mxu1 %vm552_vm1, %v3833_v9 }
 0x11b   :  { %v3843_v17 = vpop.permute.xlu1 %1362 }
 0x11c   :  { %5443 = vst [vmem:[#allocation55_spill] sm:$0xff] %v3843_v17 }
 0x11d   :  { %v3847_v21 = vpop.f32.mrf.mxu0  ;;  %v3849_v39 = vpop.permute.xlu2 %1402 }
 0x11e   :  { %5445 = vst [vmem:[#allocation57_spill] sm:$0xff] %v3849_v39  ;;  %3017 = vset.pattern.permute.xlu2 %v5440_v18  ;;  %1053 = vrot.lane.b32.xlu0 %v3847_v21, %s3084_s1  ;;  %v287_v39 = vpop.f32.mrf.mxu2  ;;  %v3874_v63 = vpop.permute.xlu0 %1394 }
 0x11f   :  { %v3852_v6 = vpop.f32.mrf.mxu1  ;;  %1562 = vperm.xlu2 %3017, %v3281_v20   ;;  %2934 = vmatmul.msk.f32.gmra.mxu3 %vm552_vm1, %v3811_v23  ;;  %5450 = vst [vmem:[#allocation62_spill] sm:$0xff] %v3874_v63  ;;  %v3882_v50 = vadd.f32 1e-08, %v287_v39  ;;  %v387_v36 = vpop.f32.mrf.mxu3 }
 0x120   :  { %1296 = vrot.lane.b32.xlu1 %v3852_v6, %s3084_s1  ;;  %2918 = vmatmul.msk.f32.gmra.mxu2 %vm552_vm1, %v3811_v23 }
 0x121   :  { %3048 = vrsqrt.f32 %v3882_v50  ;;  %vm421_vm6 = vcmp.eq.f32.partialorder %v3882_v50, inf  ;;  %vm423_vm8 = vcmp.eq.f32.partialorder %v3882_v50, 0.0 }
 0x122   :  { %3050 = vrsqrt.f32 %v3891_v35 }
 0x123   :  { %v3863_v13 = vpop.permute.xlu1 %1374  ;;  %3052 = vrsqrt.f32 %v3907_v55 }
 0x124   :  { %5446 = vst [vmem:[#allocation58_spill] sm:$0xff] %v3863_v13  ;;  %3054 = vrsqrt.f32 %v3917_v8 }
 0x125   :  { %v3865_v45 = vpop.f32.mrf.mxu0 }
 0x126   :  { %5447 = vst [vmem:[#allocation59_spill] sm:$0xff] %v3865_v45  ;;  %v3867_v0 = vpop.permute.xlu2 %1446  ;;  %v1439_v34 = vpop.permute.xlu0 %1438 }
 0x127   :  { %5448 = vst [vmem:[#allocation60_spill] sm:$0xff] %v3867_v0  ;;  %v3871_v26 = vpop.f32.mrf.mxu1  ;;  %2935 = vmatmul.msk.f32.gmra.mxu3 %vm552_vm1, %v3833_v9  ;;  %v367_v0 = vpop.f32.mrf.mxu2 }
 0x128   :  { %5449 = vst [vmem:[#allocation61_spill] sm:$0xff] %v3871_v26  ;;  %1558 = vperm.xlu1 %3016, %v3259_v16   ;;  %1298 = vrot.lane.b32.xlu2 %v3871_v26, %s3084_s1 }
 0x129   :  { %2919 = vmatmul.msk.f32.gmra.mxu2 %vm552_vm1, %v3833_v9 }
 0x12b   :  { %v3887_v16 = vpop.permute.xlu1 %1386 }
 0x12c   :  { %5451 = vst [vmem:[#allocation63_spill] sm:$0xff] %v3887_v16  ;;  %v3045_v16 = vpop.eup %3044 }
 0x12d   :  { %v3893_v63 = vpop.f32.mrf.mxu0  ;;  %v3047_v9 = vpop.eup %3046 }
 0x12e   :  { %5452 = vst [vmem:[#allocation64_spill] sm:$0xff] %v3893_v63  ;;  %v3895_v23 = vpop.permute.xlu2 %1454  ;;  %v3049_v59 = vpop.eup %3048  ;;  %v403_v58 = vmul.f32 %v3047_v9, %v3876_v30 }
 0x12f   :  { %v3897_v39 = vpop.f32.mrf.mxu1 }
 0x130   :  { %1055 = vrot.lane.b32.xlu1 %v3865_v45, %s3084_s1  ;;  %1300 = vrot.lane.b32.xlu0 %v3897_v39, %s3084_s1  ;;  %v391_v45 = vmul.f32 %v3045_v16, %v3869_v22  ;;  %v404_v38 = vmul.f32 %v3047_v9, %v403_v58 }
 0x131   :  { %1057 = vrot.lane.b32.xlu2 %v3893_v63, %s3084_s1  ;;  %3019 = vset.pattern.permute.xlu1 %v5432_v25  ;;  %v3922_v63 = vpop.eup %3050 }
 0x132   :  { %v808_v37 = vpop.f32.mrf.mxu3  ;;  %v427_v51 = vmul.f32 %v3922_v63, %v3891_v35  ;;  %v3940_v31 = vpop.eup %3052  ;;  %v405_v58 = vmul.f32 0.5, %v404_v38 }
 0x133   :  { %v743_v48 = vpop.f32.mrf.mxu2  ;;  %v3909_v7 = vpop.permute.xlu1 %1398  ;;  %v415_v37 = vmul.f32 %v3049_v59, %v3882_v50 }
 0x134   :  { %5453 = vst [vmem:[#allocation65_spill] sm:$0xff] %v3909_v7  ;;  %v3912_v43 = vmul.f32 %v1439_v34, %v743_v48  ;;  %v392_v48 = vmul.f32 %v3045_v16, %v391_v45  ;;  %v3930_v34 = vadd.f32 1e-08, %v367_v0  ;;  %v3943_v0 = vadd.f32 1e-08, %v387_v36  ;;  %v3952_v61 = vpop.eup %3054 }
 0x135   :  { %v3915_v13 = vpop.f32.mrf.mxu0  ;;  %v416_v7 = vmul.f32 %v3049_v59, %v415_v37  ;;  %v428_v37 = vmul.f32 %v3922_v63, %v427_v51  ;;  %v439_v36 = vmul.f32 %v3940_v31, %v3907_v55 }
 0x136   :  { %5454 = vst [vmem:[#allocation66_spill] sm:$0xff] %v3912_v43  ;;  %v3919_v53 = vpop.permute.xlu2 %1466  ;;  %3056 = vrsqrt.f32 %v3930_v34  ;;  %vm469_vm15 = vcmp.eq.f32.partialorder %v3930_v34, inf }
 0x137   :  { %5455 = vst [vmem:[#allocation67_spill] sm:$0xff] %v3915_v13  ;;  %v3925_v14 = vpop.f32.mrf.mxu1  ;;  %3058 = vrsqrt.f32 %v3943_v0  ;;  %v440_v54 = vmul.f32 %v3940_v31, %v439_v36 }
 0x138   :  { %5456 = vst [vmem:[#allocation68_spill] sm:$0xff] %v3925_v14  ;;  %1538 = vperm.xlu0 %3018, %v3162_v2   ;;  %1302 = vrot.lane.b32.xlu1 %v3925_v14, %s3084_s1  ;;  %v393_v2 = vmul.f32 0.5, %v392_v48 }
 0x139   :  { %1566 = vperm.xlu2 %3017, %v3276_v19  }
 0x13a   :  { %v810_v43 = vpop.f32.mrf.mxu3  ;;  %v394_v48 = vsub.f32 1.5, %v393_v2  ;;  %v451_v2 = vmul.f32 %v3952_v61, %v3917_v8 }
 0x13b   :  { %v3936_v46 = vpop.f32.mrf.mxu2  ;;  %v417_v43 = vmul.f32 0.5, %v416_v7  ;;  %v406_v7 = vsub.f32 1.5, %v405_v58 }
 0x13c   :  { %v3938_v4 = vpop.permute.xlu1 %1442  ;;  %v3963_v11 = vpop.eup %3056  ;;  %v395_v5 = vmul.f32 %v3045_v16, %v394_v48  ;;  %v452_v17 = vmul.f32 %v3952_v61, %v451_v2  ;;  %v441_v16 = vmul.f32 0.5, %v440_v54 }
 0x13d   :  { %v3945_v19 = vpop.f32.mrf.mxu0  ;;  %v418_v38 = vsub.f32 1.5, %v417_v43  ;;  %v463_v43 = vmul.f32 %v3963_v11, %v3930_v34 }
 0x13e   :  { %5457 = vst [vmem:[#allocation69_spill] sm:$0xff] %v3945_v19  ;;  %v3947_v45 = vpop.permute.xlu2 %1478  ;;  %v453_v54 = vmul.f32 0.5, %v452_v17 }
 0x13f   :  { %5458 = vst [vmem:[#allocation70_spill] sm:$0xff] %v3947_v45  ;;  %v3950_v14 = vpop.f32.mrf.mxu1  ;;  %v429_v45 = vmul.f32 0.5, %v428_v37  ;;  %v3976_v37 = vpop.eup %3058 }
 0x140   :  { %5459 = vst [vmem:[#allocation71_spill] sm:$0xff] %v3950_v14  ;;  %1818 = vperm.xlu1 %3019, %v3281_v20   ;;  %1059 = vrot.lane.b32.xlu0 %v3915_v13, %s3084_s1 }
 0x141   :  { %1304 = vrot.lane.b32.xlu2 %v3950_v14, %s3084_s1  ;;  %v407_v14 = vmul.f32 %v3047_v9, %v406_v7  ;;  %v2046_v9 = vld [vmem:[%s5329_s3 + $0x8] sm:$0x1]  ;;  %v464_v7 = vmul.f32 %v3963_v11, %v463_v43 }
 0x142   :  { %v812_v51 = vpop.f32.mrf.mxu3  ;;  %3020 = vset.pattern.permute.xlu2 %v5432_v25  ;;  %v430_v25 = vsub.f32 1.5, %v429_v45  ;;  %2952 = vmatpush.msk.msrb.mxu1 %vm2080_vm2, %v2046_v9  ;;  %v400_v9 = vand.u32 2147483648, %v3869_v22  ;;  %vm471_vm2 = vcmp.eq.f32.partialorder %v3930_v34, 0.0 }
 0x143   :  { %v3965_v20 = vpop.f32.mrf.mxu2  ;;  %v419_v51 = vmul.f32 %v3049_v59, %v418_v38  ;;  %v396_v59 = vmul.f32 %v395_v5, %v3869_v22  ;;  %v408_v45 = vmul.f32 %v407_v14, %v3876_v30  ;;  %v475_v38 = vmul.f32 %v3976_v37, %v3943_v0  ;;  %v2045_v5 = vld [vmem:[%s5329_s3] sm:$0xff] }
 0x144   :  { %5460 = vst [vmem:[#allocation72_spill] sm:$0xff] %v3965_v20  ;;  %v1451_v13 = vpop.permute.xlu1 %1450  ;;  %v431_v36 = vmul.f32 %v3922_v63, %v430_v25  ;;  %2099 = vmatpush.msrb.mxu1 %v2045_v5  ;;  %v465_v5 = vmul.f32 0.5, %v464_v7 }
 0x145   :  { %v3970_v26 = vpop.f32.mrf.mxu0  ;;  %v420_v48 = vmul.f32 %v419_v51, %v3882_v50  ;;  %v398_v14 = vsel %vm397_vm4, %v3869_v22, %v396_v59  ;;  %v442_v51 = vsub.f32 1.5, %v441_v16  ;;  %v410_v17 = vsel %vm409_vm3, %v3876_v30, %v408_v45 }
 0x146   :  { %5461 = vst [vmem:[#allocation73_spill] sm:$0xff] %v3970_v26  ;;  %v3972_v58 = vpop.permute.xlu2 %1490  ;;  %v432_v16 = vmul.f32 %v431_v36, %v3891_v35  ;;  %v476_v45 = vmul.f32 %v3976_v37, %v475_v38  ;;  %v454_v36 = vsub.f32 1.5, %v453_v54  ;;  %v436_v22 = vand.u32 2147483648, %v3891_v35 }
 0x147   :  { %5462 = vst [vmem:[#allocation74_spill] sm:$0xff] %v3972_v58  ;;  %v3978_v20 = vpop.f32.mrf.mxu1  ;;  %v4021_v58 = vld [vmem:[%s5324_s11] sm:$0xff]  ;;  %v422_v59 = vsel %vm421_vm6, %v3882_v50, %v420_v48  ;;  %v443_v48 = vmul.f32 %v3940_v31, %v442_v51  ;;  %vm481_vm3 = vcmp.eq.f32.partialorder %v3943_v0, inf  ;;  %vm483_vm4 = vcmp.eq.f32.partialorder %v3943_v0, 0.0 }
 0x148   :  { %1061 = vrot.lane.b32.xlu1 %v3945_v19, %s3084_s1  ;;  %2953 = vmatmul.msk.f32.vlgmr.msrb.gmra.mxu1 %vm2047_vm7, %v4021_v58 }
 0x149   :  { %1063 = vrot.lane.b32.xlu2 %v3970_v26, %s3084_s1  ;;  %v444_v54 = vmul.f32 %v443_v48, %v3907_v55  ;;  %v448_v48 = vand.u32 2147483648, %v3907_v55 }
 0x14b   :  { %v3996_v2 = vpop.f32.mrf.mxu2 }
 0x14c   :  { %5463 = vst [vmem:[#allocation75_spill] sm:$0xff] %v3996_v2  ;;  %v4005_v63 = vmul.f32 %v1451_v13, %v3996_v2  ;;  %v4007_v25 = vpop.permute.xlu1 %1462  ;;  %v424_v13 = vand.u32 2147483648, %v3882_v50  ;;  %v401_v2 = vsel %vm399_vm5, %v400_v9, %v398_v14  ;;  %v434_v14 = vsel %vm433_vm9, %v3891_v35, %v432_v16  ;;  %v1459_v35 = vpop.permute.xlu0 %1458 }
 0x14d   :  { %v4010_v43 = vpop.f32.mrf.mxu0  ;;  %v466_v9 = vsub.f32 1.5, %v465_v5  ;;  %v446_v5 = vsel %vm445_vm12, %v3907_v55, %v444_v54  ;;  %v531_v54 = vld [vmem:[%s5327_s2 + $0x98] sm:$0xff] }
 0x14e   :  { %5464 = vst [vmem:[#allocation76_spill] sm:$0xff] %v4005_v63  ;;  %v412_v63 = vand.u32 2147483648, %v3876_v30  ;;  %v425_v38 = vsel %vm423_vm8, %v424_v13, %v422_v59  ;;  %v551_v30 = vld [vmem:[%s5327_s2 + $0x138] sm:$0xff]  ;;  %v437_v13 = vsel %vm435_vm11, %v436_v22, %v434_v14  ;;  %v449_v14 = vsel %vm447_vm13, %v448_v48, %v446_v5 }
 0x14f   :  { %v4030_v19 = vpop.f32.mrf.mxu1  ;;  %v4032_v26 = vpop.permute.xlu2 %1534  ;;  %861 = vmatpush.msra.mxu0 %v551_v30 }
 0x150   :  { %5465 = vst [vmem:[#allocation77_spill] sm:$0xff] %v4030_v19  ;;  %1308 = vrot.lane.b32.xlu1 %v4030_v19, %s3084_s1  ;;  %v413_v7 = vsel %vm411_vm10, %v412_v63, %v410_v17  ;;  %v455_v63 = vmul.f32 %v3952_v61, %v454_v36  ;;  %v1250_v19 = vmul.f32 0.0, %v3665_v10 }
 0x151   :  { %5466 = vst [vmem:[#allocation78_spill] sm:$0xff] %v4032_v26  ;;  %v477_v26 = vmul.f32 0.5, %v476_v45  ;;  %v486_v29 = vadd.f32 %v413_v7, %v401_v2  ;;  %v546_v2 = vld [vmem:[%s5327_s2 + $0x110] sm:$0xff] }
 0x152   :  { %862 = vmatpush.msra.mxu0 %v546_v2  ;;  %v456_v45 = vmul.f32 %v455_v63, %v3917_v8  ;;  %v526_v63 = vld [vmem:[%s5327_s2 + $0x70] sm:$0xff]  ;;  %v472_v2 = vand.u32 2147483648, %v3930_v34 }
 0x153   :  { %v4047_v27 = vpop.f32.mrf.mxu2  ;;  %v487_v51 = vadd.f32 %v486_v29, %v425_v38  ;;  %v467_v29 = vmul.f32 %v3963_v11, %v466_v9  ;;  %v478_v61 = vsub.f32 1.5, %v477_v26  ;;  %v541_v26 = vld [vmem:[%s5327_s2 + $0xe8] sm:$0xff]  ;;  %v536_v38 = vld [vmem:[%s5327_s2 + $0xc0] sm:$0xff] }
 0x154   :  { %v4054_v31 = vmul.f32 %v3895_v23, %v4047_v27  ;;  %v4056_v50 = vpop.permute.xlu1 %1474  ;;  %v4070_v23 = vld [vmem:[%s5324_s11 + $0x8] sm:$0xff]  ;;  %863 = vmatpush.msra.mxu0 %v541_v26  ;;  %v458_v30 = vsel %vm457_vm14, %v3917_v8, %v456_v45 }
 0x155   :  { %v4063_v17 = vpop.f32.mrf.mxu0  ;;  %5468 = vst [vmem:[#allocation80_spill] sm:$0xff] %v4070_v23  ;;  %2954 = vmatmul.msk.f32.gmra.mxu1 %vm2047_vm7, %v4070_v23  ;;  %v488_v11 = vadd.f32 %v487_v51, %v437_v13  ;;  %v468_v36 = vmul.f32 %v467_v29, %v3930_v34  ;;  %v479_v7 = vmul.f32 %v3976_v37, %v478_v61  ;;  %v460_v51 = vand.u32 2147483648, %v3917_v8  ;;  %v4117_v13 = vld [vmem:[%s5324_s11 + $0x10] sm:$0xff]  ;;  %v4131_v45 = vld [vmem:[%s5324_s11 + $0x48] sm:$0xff]  ;;  %v4137_v8 = vld [vmem:[%s5324_s11 + $0x40] sm:$0xff] }
 0x156   :  { %5467 = vst [vmem:[#allocation79_spill] sm:$0xff] %v4063_v17  ;;  %864 = vmatpush.msra.mxu0 %v536_v38  ;;  %v521_v26 = vld [vmem:[%s5327_s2 + $0x48] sm:$0xff] }
 0x157   :  { %v4075_v59 = vpop.f32.mrf.mxu1  ;;  %v4077_v16 = vpop.permute.xlu2 %1546  ;;  %v489_v37 = vadd.f32 %v488_v11, %v449_v14  ;;  %v470_v29 = vsel %vm469_vm15, %v3930_v34, %v468_v36  ;;  %v480_v61 = vmul.f32 %v479_v7, %v3943_v0  ;;  %v461_v5 = vsel %vm459_vm0, %v460_v51, %v458_v30  ;;  %5471 = vst [vmem:[#allocation83_spill] sm:$0xff] %v4131_v45  ;;  %v516_v14 = vld [vmem:[%s5327_s2 + $0x20] sm:$0xff] }
 0x158   :  { %5469 = vst [vmem:[#allocation81_spill] sm:$0xff] %v4075_v59  ;;  %1310 = vrot.lane.b32.xlu2 %v4075_v59, %s3084_s1  ;;  %1067 = vrot.lane.b32.xlu1 %v4063_v17, %s3084_s1  ;;  %v473_v48 = vsel %vm471_vm2, %v472_v2, %v470_v29  ;;  %v484_v36 = vand.u32 2147483648, %v3943_v0  ;;  %v4146_v7 = vpop.permute.xlu0 %1470  ;;  %v4168_v2 = vld [vmem:[%s5324_s11 + $0x18] sm:$0xff]  ;;  %v5374_v59 = vmov 6  }
 0x159   :  { %865 = vmatpush.msra.mxu0 %v531_v54  ;;  %5472 = vst [vmem:[#allocation84_spill] sm:$0xff] %v4137_v8  ;;  %v490_v11 = vadd.f32 %v489_v37, %v461_v5  ;;  %v482_v38 = vsel %vm481_vm3, %v3943_v0, %v480_v61 }
 0x15a   :  { %v485_v0 = vsel %vm483_vm4, %v484_v36, %v482_v38  ;;  %v4198_v36 = vld [vmem:[%s5324_s11 + $0x20] sm:$0xff] }
 0x15b   :  { %v4096_v22 = vpop.f32.mrf.mxu2  ;;  %866 = vmatpush.msra.mxu0 %v526_v63  ;;  %v491_v63 = vadd.f32 %v490_v11, %v473_v48 }
 0x15c   :  { %v4101_v9 = vmul.f32 %v1459_v35, %v4096_v22  ;;  %v4103_v55 = vpop.permute.xlu1 %1486 }
 0x15d   :  { %5470 = vst [vmem:[#allocation82_spill] sm:$0xff] %v4103_v55  ;;  %2955 = vmatmul.msk.f32.gmra.mxu1 %vm2047_vm7, %v4117_v13  ;;  %867 = vmatpush.msra.mxu0 %v521_v26  ;;  %v4153_v30 = vpop.f32.mrf.mxu0 }
 0x15e   :  { %5473 = vst [vmem:[#allocation85_spill] sm:$0xff] %v4153_v30 }
 0x15f   :  { %v4125_v35 = vpop.f32.mrf.mxu1  ;;  %868 = vmatpush.msra.mxu0 %v516_v14 }
 0x160   :  { %1826 = vperm.xlu2 %3020, %v4131_v45   ;;  %1822 = vperm.xlu1 %3019, %v4137_v8   ;;  %v4140_v34 = vpop.permute.xlu2 %1794  ;;  %v4183_v5 = vpop.permute.xlu0 %1482 }
 0x161   :  { %2936 = vmatmul.msk.f32.vlgmr.msra.gmra.mxu0 %vm552_vm1, %v3469_v49  ;;  %5477 = vst [vmem:[#allocation89_spill] sm:$0xff] %v4183_v5 }
 0x163   :  { %v4155_v37 = vpop.f32.mrf.mxu2 }
 0x164   :  { %v4159_v54 = vmul.f32 %v4007_v25, %v4155_v37  ;;  %v4163_v51 = vpop.permute.xlu1 %1498  ;;  %v492_v25 = vadd.f32 %v491_v63, %v485_v0  ;;  %v4221_v0 = vld [vmem:[%s5324_s11 + $0x28] sm:$0xff] }
 0x165   :  { %5475 = vst [vmem:[#allocation87_spill] sm:$0xff] %v4163_v51  ;;  %2956 = vmatmul.msk.f32.gmra.mxu1 %vm2047_vm7, %v4168_v2  ;;  %v4191_v26 = vpop.f32.mrf.mxu0 }
 0x166   :  { %5474 = vst [vmem:[#allocation86_spill] sm:$0xff] %v4159_v54 }
 0x167   :  { %v4172_v29 = vpop.f32.mrf.mxu1 }
 0x168   :  { %5476 = vst [vmem:[#allocation88_spill] sm:$0xff] %v4172_v29  ;;  %1314 = vrot.lane.b32.xlu1 %v4172_v29, %s3084_s1  ;;  %1069 = vrot.lane.b32.xlu2 %v4153_v30, %s3084_s1  ;;  %v4178_v49 = vpop.permute.xlu2 %1802  ;;  %v4267_v30 = vld [vmem:[%s5324_s11 + $0x38] sm:$0xff] }
 0x169   :  { %3021 = vset.pattern.permute.xlu1 %v5440_v18  ;;  %2937 = vmatmul.msk.f32.gmra.mxu0 %vm552_vm1, %v3513_v3  ;;  %5485 = vst [vmem:[#allocation97_spill] sm:$0xff] %v4267_v30 }
 0x16a   :  { %493 = vadd.xlane.f32.xlu0 %v492_v25  ;;  %v4225_v25 = vpop.permute.xlu0 %1494 }
 0x16b   :  { %v4181_v61 = vpop.f32.mrf.mxu2  ;;  %5478 = vst [vmem:[#allocation90_spill] sm:$0xff] %v4225_v25  ;;  %v4246_v25 = vld [vmem:[%s5324_s11 + $0x30] sm:$0xff] }
 0x16c   :  { %v4187_v11 = vmul.f32 %v3919_v53, %v4181_v61  ;;  %v4207_v53 = vld [vmem:[%s5324_s11 + $0x50] sm:$0xff]  ;;  %5482 = vst [vmem:[#allocation94_spill] sm:$0xff] %v4246_v25 }
 0x16d   :  { %v4193_v48 = vpop.permute.xlu1 %1542  ;;  %2957 = vmatmul.msk.f32.gmra.mxu1 %vm2047_vm7, %v4198_v36  ;;  %v4227_v5 = vpop.f32.mrf.mxu0 }
 0x16e   :  { %5479 = vst [vmem:[#allocation91_spill] sm:$0xff] %v4227_v5 }
 0x16f   :  { %v4202_v38 = vpop.f32.mrf.mxu1 }
 0x170   :  { %1574 = vperm.xlu1 %3021, %v4207_v53   ;;  %v4210_v3 = vpop.permute.xlu2 %1806 }
 0x171   :  { %2938 = vmatmul.msk.f32.gmra.mxu0 %vm552_vm1, %v3548_v33 }
 0x173   :  { %v4212_v14 = vpop.f32.mrf.mxu2 }
 0x175   :  { %v4216_v63 = vpop.permute.xlu1 %1550  ;;  %2958 = vmatmul.msk.f32.gmra.mxu1 %vm2047_vm7, %v4221_v0 }
 0x177   :  { %v4229_v51 = vpop.f32.mrf.mxu1 }
 0x178   :  { %1073 = vrot.lane.b32.xlu1 %v4227_v5, %s3084_s1  ;;  %v4250_v5 = vpop.permute.xlu0 %1790 }
 0x179   :  { %v4233_v33 = vpop.permute.xlu2 %1562  ;;  %2939 = vmatmul.msk.f32.gmra.mxu0 %vm552_vm1, %v3570_v44 }
 0x17b   :  { %v4235_v55 = vpop.f32.mrf.mxu2 }
 0x17c   :  { %5480 = vst [vmem:[#allocation92_spill] sm:$0xff] %v4235_v55  ;;  %v4239_v29 = vmul.f32 %v4056_v50, %v4235_v55 }
 0x17d   :  { %2959 = vmatmul.msk.f32.gmra.mxu1 %vm2047_vm7, %v4246_v25 }
 0x17e   :  { %5481 = vst [vmem:[#allocation93_spill] sm:$0xff] %v4239_v29  ;;  %1306 = vrot.lane.b32.xlu0 %v3978_v20, %s3084_s1  ;;  %v4254_v17 = vpop.permute.xlu1 %1798 }
 0x17f   :  { %v4256_v50 = vpop.f32.mrf.mxu1 }
 0x180   :  { %5483 = vst [vmem:[#allocation95_spill] sm:$0xff] %v4256_v50  ;;  %1320 = vrot.lane.b32.xlu1 %v4256_v50, %s3084_s1  ;;  %v4275_v55 = vpop.permute.xlu0 %1810  ;;  %v1154_v50 = vmul.f32 0.0, %v3553_v41 }
 0x181   :  { %2940 = vmatmul.msk.f32.gmra.mxu0 %vm552_vm1, %v3592_v47  ;;  %v4280_v47 = vld [vmem:[%s5324_s11 + $0x58] sm:$0xff] }
 0x182   :  { %v4262_v44 = vpop.permute.xlu2 %1298 }
 0x183   :  { %5484 = vst [vmem:[#allocation96_spill] sm:$0xff] %v4262_v44  ;;  %v1010_v44 = vmul.f32 0.0, %v3354_v32 }
 0x185   :  { %2960 = vmatmul.msk.f32.gmra.mxu1 %vm2047_vm7, %v4267_v30  ;;  %v1170_v30 = vadd.f32 %v1154_v50, %v1010_v44  ;;  %v1502_v50 = vmul.f32 %v3938_v4, %v3936_v46 }
 0x186   :  { %1065 = vrot.lane.b32.xlu0 %v4010_v43, %s3084_s1 }
 0x187   :  { %v4273_v29 = vpop.permute.xlu1 %1554  ;;  %v1266_v41 = vadd.f32 %v1250_v19, %v1170_v30  ;;  %v4305_v44 = vpop.f32.mrf.mxu1 }
 0x188   :  { %1578 = vperm.xlu1 %3021, %v4280_v47   ;;  %v4296_v54 = vpop.permute.xlu0 %1814  ;;  %v4310_v19 = vpop.f32.mrf.mxu3 }
 0x189   :  { %2941 = vmatmul.msk.f32.gmra.mxu0 %vm552_vm1, %v3614_v24  ;;  %5486 = vst [vmem:[#allocation98_spill] sm:$0xff] %v4310_v19 }
 0x18b   :  { %v4292_v25 = vpop.permute.xlu2 %1057 }
 0x18d   :  { %2961 = vmatmul.msk.f32.gmra.mxu1 %vm2047_vm7, %v4137_v8 }
 0x18e   :  { %1312 = vrot.lane.b32.xlu0 %v4125_v35, %s3084_s1 }
 0x190   :  { %3022 = vset.pattern.permute.xlu1 %v5374_v59 }
 0x191   :  { %1694 = vperm.xlu1 %3022, %v4021_v58   ;;  %2942 = vmatmul.msk.f32.gmra.mxu0 %vm552_vm1, %v3638_v57 }
 0x192   :  { %v1297_v32 = vpop.permute.xlu1 %1296 }
 0x193   :  { %v1406_v24 = vmul.f32 %v3737_v15, %v1297_v32  ;;  %v4312_v30 = vpop.permute.xlu2 %1566  ;;  %v5376_v15 = vmov 8   ;;  %v1054_v32 = vpop.permute.xlu0 %1053 }
 0x195   :  { %v1422_v10 = vadd.f32 %v1406_v24, %v1266_v41  ;;  %2962 = vmatmul.msk.f32.gmra.mxu1 %vm2047_vm7, %v4131_v45  ;;  %v1156_v41 = vmul.f32 0.0, %v3575_v12  ;;  %v4322_v24 = vpop.f32.mrf.mxu0  ;;  %v1014_v12 = vmul.f32 %v3370_v40, %v3847_v21 }
 0x196   :  { %1570 = vperm.xlu0 %3018, %v4131_v45  }
 0x197   :  { %v4308_v59 = vadd.f32 %v1502_v50, %v1422_v10  ;;  %v4328_v50 = vpop.f32.mrf.mxu1  ;;  %v1252_v10 = vmul.f32 %v3619_v56, %v3852_v6  ;;  %v1254_v6 = vmul.f32 %v3642_v62, %v3897_v39  ;;  %v5492_v62 = vld [vmem:[#allocation76_spill] sm:$0xff] }
 0x199   :  { %3023 = vset.pattern.permute.xlu1 %v5376_v15  ;;  %2943 = vmatmul.msk.f32.gmra.mxu0 %vm552_vm1, %v3657_v60  ;;  %v4333_v15 = vpop.f32.mrf.mxu3 }
 0x19a   :  { %v1559_v4 = vpop.permute.xlu1 %1558  ;;  %1954 = vperm.xlu1 %3023, %v4070_v23   ;;  %5488 = vst [vmem:[#allocation100_spill] sm:$0xff] %v4333_v15  ;;  %v1157_v23 = vmul.f32 %v3474_v52, %v1054_v32 }
 0x19b   :  { %v4316_v57 = vmul.f32 %v1559_v4, %v4181_v61  ;;  %v1012_v61 = vmul.f32 0.0, %v3339_v28  ;;  %v1305_v8 = vpop.permute.xlu2 %1304 }
 0x19d   :  { %5487 = vst [vmem:[#allocation99_spill] sm:$0xff] %v4316_v57  ;;  %2963 = vmatmul.msk.f32.gmra.mxu1 %vm2047_vm7, %v4207_v53  ;;  %v1172_v4 = vadd.f32 %v1156_v41, %v1012_v61  ;;  %v5489_v41 = vld [vmem:[#allocation29_spill] sm:$0xff]  ;;  %v5490_v61 = vld [vmem:[#allocation2_spill] sm:$0xff] }
 0x19e   :  { %1071 = vrot.lane.b32.xlu0 %v4191_v26, %s3084_s1  ;;  %v1013_v40 = vmul.f32 0.0, %v5490_v61 }
 0x19f   :  { %v1268_v45 = vadd.f32 %v1252_v10, %v1172_v4 }
 0x1a1   :  { %2944 = vmatmul.msk.f32.gmra.mxu0 %vm552_vm1, %v5489_v41 }
 0x1a2   :  { %v1056_v60 = vpop.permute.xlu1 %1055  ;;  %v1301_v19 = vpop.permute.xlu0 %1300  ;;  %1950 = vperm.xlu1 %3023, %v4021_v58   ;;  %v5491_v58 = vld [vmem:[#allocation55_spill] sm:$0xff] }
 0x1a3   :  { %v1158_v57 = vmul.f32 %v3555_v42, %v1056_v60  ;;  %v1408_v28 = vmul.f32 %v3823_v1, %v1301_v19  ;;  %v654_v42 = vpop.f32.mrf.mxu0  ;;  %v1410_v52 = vmul.f32 %v5491_v58, %v1305_v8  ;;  %v724_v1 = vpop.f32.mrf.mxu1  ;;  %v1173_v19 = vadd.f32 %v1157_v23, %v1013_v40  ;;  %v5495_v60 = vld [vmem:[#allocation34_spill] sm:$0xff]  ;;  %v5496_v23 = vld [vmem:[#allocation72_spill] sm:$0xff] }
 0x1a4   :  { %v5497_v40 = vld [vmem:[#allocation42_spill] sm:$0xff]  ;;  %v5498_v42 = vld [vmem:[#allocation33_spill] sm:$0xff]  ;;  %v4388_v1 = vld [vmem:[%s5324_s11 + $0x68] sm:$0xff] }
 0x1a5   :  { %v1174_v56 = vadd.f32 %v1158_v57, %v1014_v12  ;;  %v1424_v21 = vadd.f32 %v1408_v28, %v1268_v45  ;;  %2964 = vmatmul.msk.f32.gmra.mxu1 %vm2047_vm7, %v4280_v47  ;;  %v5493_v57 = vld [vmem:[#allocation75_spill] sm:$0xff]  ;;  %v5494_v45 = vld [vmem:[#allocation61_spill] sm:$0xff] }
 0x1a6   :  { %1318 = vrot.lane.b32.xlu0 %v4229_v51, %s3084_s1  ;;  %v1599_v10 = vmul.f32 %v4193_v48, %v5493_v57  ;;  %v1253_v12 = vmul.f32 %v5495_v60, %v5494_v45  ;;  %v5499_v57 = vld [vmem:[#allocation37_spill] sm:$0xff]  ;;  %v5500_v45 = vmov 7   ;;  %v5501_v60 = vld [vmem:[#allocation67_spill] sm:$0xff] }
 0x1a7   :  { %v1270_v32 = vadd.f32 %v1254_v6, %v1174_v56  ;;  %v4352_v39 = vadd.f32 %v5492_v62, %v1424_v21  ;;  %v4362_v6 = vpop.f32.mrf.mxu3  ;;  %v4393_v62 = vpop.permute.xlu2 %1063 }
 0x1a8   :  { %v1269_v61 = vadd.f32 %v1253_v12, %v1173_v19  ;;  %v1854_v48 = vmul.f32 %v4140_v34, %v4362_v6  ;;  %v1853_v19 = vmul.f32 %v4250_v5, %v4333_v15  ;;  %v5502_v5 = vld [vmem:[#allocation4_spill] sm:$0xff] }
 0x1a9   :  { %v1426_v4 = vadd.f32 %v1410_v52, %v1270_v32  ;;  %2945 = vmatmul.msk.f32.gmra.mxu0 %vm552_vm1, %v5498_v42  ;;  %v1017_v12 = vmul.f32 %v5502_v5, %v5501_v60  ;;  %v5507_v42 = vld [vmem:[#allocation9_spill] sm:$0xff]  ;;  %v5509_v60 = vld [vmem:[#allocation58_spill] sm:$0xff]  ;;  %v5513_v15 = vld [vmem:[#allocation52_spill] sm:$0xff] }
 0x1aa   :  { %v1539_v28 = vpop.permute.xlu0 %1538  ;;  %v1303_v41 = vpop.permute.xlu1 %1302  ;;  %1633 = vrot.lane.b32.xlu1 %v1599_v10, %s3084_s1 }
 0x1ab   :  { %v4360_v8 = vadd.f32 %v4101_v9, %v1426_v4  ;;  %v1598_v56 = vmul.f32 %v1539_v28, %v5496_v23  ;;  %v1409_v21 = vmul.f32 %v5497_v40, %v1303_v41  ;;  %3025 = vset.pattern.permute.xlu1 %v5440_v18  ;;  %v4375_v9 = vld [vmem:[%s5324_s11 + $0x60] sm:$0xff]  ;;  %v656_v52 = vpop.f32.mrf.mxu0  ;;  %v5503_v28 = vld [vmem:[#allocation17_spill] sm:$0xff] }
 0x1ac   :  { %v5508_v52 = vld [vmem:[#allocation28_spill] sm:$0xff] }
 0x1ad   :  { %v1425_v58 = vadd.f32 %v1409_v21, %v1269_v61  ;;  %1631 = vrot.lane.b32.xlu2 %v1598_v56, %s3084_s1  ;;  %2965 = vmatmul.msk.f32.gmra.mxu1 %vm2047_vm7, %v4375_v9  ;;  %v5504_v56 = vld [vmem:[#allocation20_spill] sm:$0xff] }
 0x1ae   :  { %1887 = vrot.lane.b32.xlu0 %v1854_v48, %s3084_s1  ;;  %v5505_v21 = vld [vmem:[#allocation40_spill] sm:$0xff] }
 0x1af   :  { %v4381_v32 = vadd.f32 %v4054_v31, %v1425_v58  ;;  %v5506_v48 = vld [vmem:[#allocation64_spill] sm:$0xff] }
 0x1b0   :  { %v1016_v58 = vmul.f32 %v5507_v42, %v5506_v48  ;;  %v5512_v42 = vld [vmem:[#allocation78_spill] sm:$0xff] }
 0x1b1   :  { %2946 = vmatmul.msk.f32.gmra.mxu0 %vm552_vm1, %v5499_v57 }
 0x1b2   :  { %v4383_v34 = vpop.permute.xlu1 %1818  ;;  %1586 = vperm.xlu1 %3025, %v4388_v1   ;;  %v1060_v10 = vpop.permute.xlu0 %1059 }
 0x1b3   :  { %v658_v31 = vpop.f32.mrf.mxu0  ;;  %v1160_v41 = vmul.f32 %v5503_v28, %v1060_v10  ;;  %v1311_v40 = vpop.permute.xlu2 %1310  ;;  %v5511_v28 = vld [vmem:[#allocation38_spill] sm:$0xff] }
 0x1b4   :  { %v4419_v31 = vld [vmem:[%s5324_s11 + $0x70] sm:$0xff]  ;;  %v1413_v5 = vmul.f32 %v5509_v60, %v1311_v40 }
 0x1b5   :  { %1316 = vrot.lane.b32.xlu2 %v4202_v38, %s3084_s1  ;;  %2966 = vmatmul.msk.f32.gmra.mxu1 %vm2047_vm7, %v4388_v1 }
 0x1b6   :  { %1885 = vrot.lane.b32.xlu0 %v1853_v19, %s3084_s1  ;;  %v1257_v19 = vmul.f32 %v5508_v52, %v3978_v20  ;;  %v1597_v52 = vmul.f32 %v5512_v42, %v3936_v46  ;;  %v5521_v42 = vld [vmem:[#allocation51_spill] sm:$0xff] }
 0x1b9   :  { %2947 = vmatmul.msk.f32.gmra.mxu0 %vm552_vm1, %v5505_v21 }
 0x1ba   :  { %v1062_v4 = vpop.permute.xlu1 %1061  ;;  %3026 = vset.pattern.permute.xlu1 %v5500_v45 }
 0x1bb   :  { %v1161_v61 = vmul.f32 %v5504_v56, %v1062_v4  ;;  %1838 = vperm.xlu1 %3026, %v4375_v9   ;;  %v660_v10 = vpop.f32.mrf.mxu0  ;;  %v1176_v4 = vadd.f32 %v1160_v41, %v1016_v58  ;;  %v5514_v41 = vmov 8   ;;  %v5515_v58 = vld [vmem:[#allocation44_spill] sm:$0xff] }
 0x1bd   :  { %v1177_v57 = vadd.f32 %v1161_v61, %v1017_v12  ;;  %1075 = vrot.lane.b32.xlu2 %v4322_v24, %s3084_s1  ;;  %2967 = vmatmul.msk.f32.gmra.mxu1 %vm2047_vm7, %v4419_v31  ;;  %v5510_v12 = vld [vmem:[#allocation71_spill] sm:$0xff]  ;;  %v4428_v24 = vpop.f32.mrf.mxu3  ;;  %v1509_v61 = vmul.f32 %v4146_v7, %v4212_v14  ;;  %v4445_v7 = vld [vmem:[%s5324_s11 + $0x78] sm:$0xff] }
 0x1be   :  { %1324 = vrot.lane.b32.xlu0 %v4328_v50, %s3084_s1  ;;  %v1256_v56 = vmul.f32 %v5511_v28, %v5510_v12  ;;  %v5518_v28 = vld [vmem:[#allocation47_spill] sm:$0xff] }
 0x1bf   :  { %v1273_v20 = vadd.f32 %v1257_v19, %v1177_v57  ;;  %v5516_v57 = vld [vmem:[#allocation14_spill] sm:$0xff] }
 0x1c0   :  { %v1272_v10 = vadd.f32 %v1256_v56, %v1176_v4  ;;  %v1020_v4 = vmul.f32 %v5516_v57, %v4010_v43  ;;  %v5519_v56 = vld [vmem:[#allocation31_spill] sm:$0xff] }
 0x1c1   :  { %v1429_v21 = vadd.f32 %v1413_v5, %v1273_v20  ;;  %2948 = vmatmul.msk.f32.gmra.mxu0 %vm552_vm1, %v5515_v58  ;;  %v5517_v5 = vld [vmem:[#allocation23_spill] sm:$0xff]  ;;  %v5524_v58 = vld [vmem:[#allocation21_spill] sm:$0xff] }
 0x1c2   :  { %v1309_v48 = vpop.permute.xlu1 %1308 }
 0x1c3   :  { %v1412_v50 = vmul.f32 %v5513_v15, %v1309_v48  ;;  %3027 = vset.pattern.permute.xlu1 %v5514_v41  ;;  %v4436_v40 = vadd.f32 %v1509_v61, %v1429_v21  ;;  %v5520_v48 = vmov 6  }
 0x1c4   :  { %1958 = vperm.xlu1 %3027, %v4117_v13  }
 0x1c5   :  { %v1428_v19 = vadd.f32 %v1412_v50, %v1272_v10  ;;  %1629 = vrot.lane.b32.xlu2 %v1597_v52, %s3084_s1  ;;  %2968 = vmatmul.msk.f32.gmra.mxu1 %vm2047_vm7, %v4445_v7  ;;  %v4455_v60 = vpop.f32.mrf.mxu3  ;;  %v1602_v52 = vmul.f32 %v4273_v29, %v4155_v37  ;;  %v5522_v10 = vld [vmem:[#allocation54_spill] sm:$0xff] }
 0x1c6   :  { %1582 = vperm.xlu0 %3018, %v4375_v9   ;;  %v1856_v12 = vmul.f32 %v4178_v49, %v4455_v60  ;;  %v1601_v49 = vmul.f32 %v4216_v63, %v4096_v22 }
 0x1c7   :  { %v4451_v46 = vadd.f32 %v4187_v11, %v1428_v19  ;;  %v1260_v11 = vmul.f32 %v5519_v56, %v4125_v35  ;;  %v1159_v19 = vmul.f32 %v5524_v58, %v4292_v25 }
 0x1c9   :  { %2949 = vmatmul.msk.f32.gmra.mxu0 %vm552_vm1, %v5518_v28  ;;  %v5528_v28 = vld [vmem:[#allocation25_spill] sm:$0xff] }
 0x1ca   :  { %v1068_v15 = vpop.permute.xlu1 %1067 }
 0x1cb   :  { %v1164_v20 = vmul.f32 %v5517_v5, %v1068_v15 }
 0x1cc   :  { %1962 = vperm.xlu1 %3027, %v4168_v2  }
 0x1cd   :  { %v1180_v61 = vadd.f32 %v1164_v20, %v1020_v4  ;;  %1322 = vrot.lane.b32.xlu2 %v4305_v44, %s3084_s1  ;;  %v4481_v44 = vpop.f32.mrf.mxu3  ;;  %v5526_v4 = vld [vmem:[#allocation3_spill] sm:$0xff]  ;;  %v5527_v20 = vld [vmem:[#allocation16_spill] sm:$0xff] }
 0x1ce   :  { %1891 = vrot.lane.b32.xlu0 %v1856_v12, %s3084_s1  ;;  %v1857_v50 = vmul.f32 %v4210_v3, %v4481_v44  ;;  %v5525_v3 = vld [vmem:[#allocation59_spill] sm:$0xff]  ;;  %v1023_v12 = vmul.f32 %v5527_v20, %v4191_v26 }
 0x1cf   :  { %3035 = vset.pattern.permute.xlu0 %v5514_v41  ;;  %v4469_v43 = vadd.f32 %v1260_v11, %v1180_v61  ;;  %v1015_v5 = vmul.f32 %v5526_v4, %v5525_v3  ;;  %v4535_v3 = vpop.permute.xlu2 %1826  ;;  %v5533_v4 = vld [vmem:[#allocation86_spill] sm:$0xff] }
 0x1d1   :  { %2950 = vmatmul.msk.f32.gmra.mxu0 %vm552_vm1, %v5521_v42  ;;  %v1175_v25 = vadd.f32 %v1159_v19, %v1015_v5  ;;  %v5530_v42 = vld [vmem:[#allocation68_spill] sm:$0xff]  ;;  %v1604_v19 = vmul.f32 %v4233_v33, %v4212_v14  ;;  %v5535_v33 = vld [vmem:[#allocation73_spill] sm:$0xff] }
 0x1d2   :  { %v4471_v21 = vpop.permute.xlu1 %1822 }
 0x1d4   :  { %3031 = vset.pattern.permute.xlu1 %v5520_v48 }
 0x1d5   :  { %1830 = vperm.xlu2 %3020, %v4207_v53   ;;  %1710 = vperm.xlu1 %3031, %v4198_v36   ;;  %v4496_v37 = vpop.f32.mrf.mxu3 }
 0x1d6   :  { %1637 = vrot.lane.b32.xlu0 %v1601_v49, %s3084_s1  ;;  %5523 = vst [vmem:[#allocation29_spill] sm:$0xff] %v4496_v37  ;;  %v1858_v61 = vmul.f32 %v4275_v55, %v4496_v37  ;;  %v5532_v55 = vld [vmem:[#allocation46_spill] sm:$0xff] }
 0x1d9   :  { %2951 = vmatmul.msk.f32.gmra.mxu0 %vm552_vm1, %v5522_v10 }
 0x1da   :  { %v1315_v35 = vpop.permute.xlu1 %1314 }
 0x1dd   :  { %1834 = vperm.xlu2 %3020, %v4280_v47   ;;  %1714 = vperm.xlu1 %3031, %v4221_v0   ;;  %v4501_v29 = vpop.xlane.xlu0 %493 }
 0x1de   :  { %1639 = vrot.lane.b32.xlu0 %v1602_v52, %s3084_s1  ;;  %v870_v22 = vpop.f32.mrf.mxu0  ;;  %v5531_v52 = vld [vmem:[#allocation32_spill] sm:$0xff] }
 0x1df   :  { %v1255_v26 = vmul.f32 %v5531_v52, %v5530_v42  ;;  %v5541_v42 = vld [vmem:[#allocation81_spill] sm:$0xff] }
 0x1e0   :  { %v5542_v52 = vld [vmem:[#allocation41_spill] sm:$0xff] }
 0x1e1   :  { %v1271_v10 = vadd.f32 %v1255_v26, %v1175_v25  ;;  %v5540_v25 = vld [vmem:[#allocation11_spill] sm:$0xff]  ;;  %v1259_v26 = vmul.f32 %v5542_v52, %v5541_v42  ;;  %v5552_v42 = vld [vmem:[#allocation92_spill] sm:$0xff] }
 0x1e2   :  { %v4490_v63 = vpop.permute.xlu1 %1574  ;;  %v1605_v52 = vmul.f32 %v4312_v30, %v5552_v42  ;;  %v5562_v42 = vld [vmem:[#allocation13_spill] sm:$0xff] }
 0x1e5   :  { %3024 = vset.pattern.permute.xlu2 %v5520_v48  ;;  %3033 = vset.pattern.permute.xlu1 %v5514_v41 }
 0x1e6   :  { %1702 = vperm.xlu2 %3024, %v4117_v13   ;;  %1966 = vperm.xlu1 %3033, %v4198_v36   ;;  %v872_v15 = vpop.f32.mrf.mxu0  ;;  %v1600_v13 = vmul.f32 %v4077_v16, %v4047_v27  ;;  %v5529_v36 = vld [vmem:[#allocation35_spill] sm:$0xff]  ;;  %v4524_v16 = vpop.f32.mrf.mxu3 }
 0x1e7   :  { %1893 = vrot.lane.b32.xlu0 %v1857_v50, %s3084_s1  ;;  %v1263_v11 = vmul.f32 %v5529_v36, %v4229_v51  ;;  %v1855_v15 = vmul.f32 %v4254_v17, %v4428_v24 }
 0x1ea   :  { %v1074_v57 = vpop.permute.xlu1 %1073 }
 0x1eb   :  { %v1167_v56 = vmul.f32 %v5528_v28, %v1074_v57  ;;  %v1859_v57 = vmul.f32 %v4296_v54, %v4524_v16  ;;  %v5537_v28 = vld [vmem:[#allocation24_spill] sm:$0xff] }
 0x1ec   :  { %v1162_v54 = vmul.f32 %v5537_v28, %v4393_v62  ;;  %v5545_v62 = vld [vmem:[#allocation77_spill] sm:$0xff] }
 0x1ed   :  { %v1183_v49 = vadd.f32 %v1167_v56, %v1023_v12  ;;  %v5536_v12 = vld [vmem:[#allocation5_spill] sm:$0xff]  ;;  %v5538_v56 = vld [vmem:[#allocation18_spill] sm:$0xff] }
 0x1ee   :  { %1970 = vperm.xlu1 %3033, %v4221_v0   ;;  %1635 = vrot.lane.b32.xlu2 %v1600_v13, %s3084_s1  ;;  %v874_v50 = vpop.f32.mrf.mxu0  ;;  %v4543_v20 = vpop.f32.mrf.mxu3  ;;  %v1019_v17 = vmul.f32 %v5536_v12, %v5535_v33  ;;  %v5548_v12 = vld [vmem:[#allocation97_spill] sm:$0xff] }
 0x1ef   :  { %1895 = vrot.lane.b32.xlu0 %v1858_v61, %s3084_s1  ;;  %3028 = vset.pattern.permute.xlu2 %v5500_v45  ;;  %v4522_v27 = vadd.f32 %v1263_v11, %v1183_v49  ;;  %v5539_v61 = vld [vmem:[#allocation69_spill] sm:$0xff]  ;;  %v1070_v33 = vpop.permute.xlu2 %1069 }
 0x1f0   :  { %v1307_v51 = vpop.permute.xlu0 %1306  ;;  %v1018_v49 = vmul.f32 %v5540_v25, %v5539_v61 }
 0x1f1   :  { %v1411_v22 = vmul.f32 %v5532_v55, %v1307_v51 }
 0x1f2   :  { %v4527_v58 = vpop.permute.xlu1 %1320  ;;  %v1178_v55 = vadd.f32 %v1162_v54, %v1018_v49 }
 0x1f3   :  { %v1427_v0 = vadd.f32 %v1411_v22, %v1271_v10  ;;  %v773_v10 = vpop.f32.mrf.mxu2  ;;  %v5543_v22 = vld [vmem:[#allocation56_spill] sm:$0xff] }
 0x1f4   :  { %v1415_v50 = vmul.f32 %v5543_v22, %v1315_v35  ;;  %v5553_v22 = vld [vmem:[#allocation93_spill] sm:$0xff] }
 0x1f5   :  { %v4538_v5 = vadd.f32 %v5533_v4, %v1427_v0  ;;  %v5547_v4 = vld [vmem:[#allocation70_spill] sm:$0xff] }
 0x1f6   :  { %1889 = vrot.lane.b32.xlu2 %v1855_v15, %s3084_s1  ;;  %1643 = vrot.lane.b32.xlu1 %v1604_v19, %s3084_s1  ;;  %v876_v36 = vpop.f32.mrf.mxu0  ;;  %v5544_v19 = vld [vmem:[#allocation94_spill] sm:$0xff]  ;;  %v5546_v15 = vld [vmem:[#allocation36_spill] sm:$0xff]  ;;  %v4564_v61 = vpop.f32.mrf.mxu3 }
 0x1f7   :  { %5534 = vst [vmem:[#allocation2_spill] sm:$0xff] %v4538_v5  ;;  %1897 = vrot.lane.b32.xlu0 %v1859_v57, %s3084_s1  ;;  %v1258_v57 = vmul.f32 %v5546_v15, %v5545_v62 }
 0x1f8   :  { %v1066_v14 = vpop.permute.xlu0 %1065  ;;  %5551 = vst [vmem:[#allocation76_spill] sm:$0xff] %v4564_v61 }
 0x1f9   :  { %v1163_v13 = vmul.f32 %v5538_v56, %v1066_v14  ;;  %v1511_v14 = vmul.f32 %v5547_v4, %v773_v10 }
 0x1fa   :  { %v1579_v11 = vpop.permute.xlu1 %1578 }
 0x1fb   :  { %v1179_v51 = vadd.f32 %v1163_v13, %v1019_v17  ;;  %v1274_v17 = vadd.f32 %v1258_v57, %v1178_v55  ;;  %v5549_v13 = vld [vmem:[#allocation50_spill] sm:$0xff]  ;;  %v4579_v62 = vpop.f32.mrf.mxu2 }
 0x1fd   :  { %v1275_v0 = vadd.f32 %v1259_v26, %v1179_v51  ;;  %v1861_v26 = vmul.f32 %v4471_v21, %v4564_v61  ;;  %v495_v51 = vmul.f32 0.0009765625, %v4501_v29  ;;  %v5556_v29 = vld [vmem:[#allocation12_spill] sm:$0xff] }
 0x1fe   :  { %1842 = vperm.xlu2 %3028, %v4388_v1   ;;  %1974 = vperm.xlu1 %3033, %v5544_v19   ;;  %v878_v36 = vpop.f32.mrf.mxu0  ;;  %v1155_v4 = vmul.f32 0.0, %v5556_v29  ;;  %v5565_v29 = vld [vmem:[#allocation79_spill] sm:$0xff] }
 0x1ff   :  { %1978 = vperm.xlu0 %3035, %v5548_v12   ;;  %v1431_v28 = vadd.f32 %v1415_v50, %v1275_v0  ;;  %v5555_v50 = vmov 0   ;;  %v5560_v36 = vld [vmem:[#allocation63_spill] sm:$0xff] }
 0x200   :  { %v1313_v56 = vpop.permute.xlu0 %1312 }
 0x201   :  { %v1414_v54 = vmul.f32 %v5549_v13, %v1313_v56  ;;  %v4562_v35 = vadd.f32 %v1511_v14, %v1431_v28  ;;  %v5557_v14 = vld [vmem:[#allocation83_spill] sm:$0xff]  ;;  %v5558_v56 = vld [vmem:[#allocation6_spill] sm:$0xff] }
 0x202   :  { %v5559_v13 = vld [vmem:[#allocation30_spill] sm:$0xff] }
 0x203   :  { %5550 = vst [vmem:[#allocation55_spill] sm:$0xff] %v4562_v35  ;;  %v1430_v25 = vadd.f32 %v1414_v54, %v1274_v17  ;;  %v4566_v49 = vpop.permute.xlu1 %1694  ;;  %v1011_v17 = vmul.f32 0.0, %v5558_v56  ;;  %v1251_v54 = vmul.f32 0.0, %v5559_v13  ;;  %v5566_v56 = vld [vmem:[#allocation7_spill] sm:$0xff]  ;;  %v5568_v35 = vld [vmem:[#allocation96_spill] sm:$0xff] }
 0x204   :  { %v1021_v13 = vmul.f32 %v5566_v56, %v5565_v29 }
 0x205   :  { %v4574_v55 = vadd.f32 %v5553_v22, %v1430_v25  ;;  %v5561_v25 = vld [vmem:[#allocation85_spill] sm:$0xff]  ;;  %v5564_v22 = vld [vmem:[#allocation19_spill] sm:$0xff] }
 0x206   :  { %3029 = vset.pattern.permute.xlu2 %v5555_v50  ;;  %1645 = vrot.lane.b32.xlu1 %v1605_v52, %s3084_s1  ;;  %v1022_v52 = vmul.f32 %v5562_v42, %v5561_v25 }
 0x207   :  { %5554 = vst [vmem:[#allocation75_spill] sm:$0xff] %v4574_v55  ;;  %1901 = vrot.lane.b32.xlu0 %v1861_v26, %s3084_s1  ;;  %v1632_v0 = vpop.permute.xlu2 %1631  ;;  %2151 = vperm.xlu2 %3029, %v495_v51   ;;  %v5563_v26 = vld [vmem:[#allocation26_spill] sm:$0xff]  ;;  %v5569_v55 = vld [vmem:[#allocation48_spill] sm:$0xff] }
 0x208   :  { %v4582_v30 = vadd.f32 %v1632_v0, %v4308_v59  ;;  %v1571_v15 = vpop.permute.xlu0 %1570  ;;  %v1165_v51 = vmul.f32 %v5563_v26, %v1070_v33  ;;  %v1407_v61 = vmul.f32 %v5569_v55, %v5568_v35  ;;  %v5572_v26 = vld [vmem:[#allocation88_spill] sm:$0xff]  ;;  %v5575_v55 = vld [vmem:[#allocation91_spill] sm:$0xff] }
 0x209   :  { %v1606_v21 = vmul.f32 %v1571_v15, %v773_v10  ;;  %v1171_v15 = vadd.f32 %v1155_v4, %v1011_v17  ;;  %v5570_v4 = vld [vmem:[#allocation62_spill] sm:$0xff] }
 0x20a   :  { %v1181_v33 = vadd.f32 %v1165_v51, %v1021_v13  ;;  %v1418_v17 = vmul.f32 %v5570_v4, %v4527_v58  ;;  %v5577_v51 = vld [vmem:[#allocation27_spill] sm:$0xff]  ;;  %v5579_v13 = vld [vmem:[#allocation53_spill] sm:$0xff] }
 0x20b   :  { %v1267_v25 = vadd.f32 %v1251_v54, %v1171_v15  ;;  %v5576_v54 = vld [vmem:[#allocation8_spill] sm:$0xff] }
 0x20c   :  { %v4584_v57 = vpop.permute.xlu1 %1954 }
 0x20d   :  { %v1423_v56 = vadd.f32 %v1407_v61, %v1267_v25  ;;  %v5580_v61 = vld [vmem:[#allocation95_spill] sm:$0xff] }
 0x20e   :  { %1647 = vrot.lane.b32.xlu1 %v1606_v21, %s3084_s1  ;;  %v779_v21 = vpop.f32.mrf.mxu2 }
 0x20f   :  { %1986 = vperm.xlu0 %3035, %v5557_v14   ;;  %v1317_v28 = vpop.permute.xlu2 %1316  ;;  %3030 = vset.pattern.permute.xlu2 %v5440_v18 }
 0x210   :  { %v1416_v59 = vmul.f32 %v5560_v36, %v1317_v28  ;;  %1590 = vperm.xlu2 %3030, %v4419_v31   ;;  %v1072_v10 = vpop.permute.xlu0 %1071  ;;  %v5567_v28 = vld [vmem:[#allocation45_spill] sm:$0xff] }
 0x211   :  { %v1166_v0 = vmul.f32 %v5564_v22, %v1072_v10  ;;  %v1262_v36 = vmul.f32 %v5567_v28, %v4202_v38  ;;  %v1608_v10 = vmul.f32 %v1579_v11, %v779_v21  ;;  %v5573_v22 = vld [vmem:[#allocation39_spill] sm:$0xff] }
 0x212   :  { %v4599_v18 = vadd.f32 %v1416_v59, %v4469_v43  ;;  %v5571_v59 = vld [vmem:[#allocation84_spill] sm:$0xff]  ;;  %v1261_v29 = vmul.f32 %v5573_v22, %v5572_v26 }
 0x213   :  { %v1182_v37 = vadd.f32 %v1166_v0, %v1022_v52  ;;  %v1024_v52 = vmul.f32 %v5576_v54, %v5575_v55 }
 0x214   :  { %v4607_v42 = vpop.permute.xlu1 %1950  ;;  %v1277_v15 = vadd.f32 %v1261_v29, %v1181_v33 }
 0x215   :  { %v1278_v43 = vadd.f32 %v1262_v36, %v1182_v37  ;;  %v5578_v37 = vld [vmem:[#allocation60_spill] sm:$0xff]  ;;  %v5581_v36 = vld [vmem:[#allocation43_spill] sm:$0xff] }
 0x216   :  { %1982 = vperm.xlu1 %3033, %v5571_v59   ;;  %v1503_v11 = vmul.f32 %v5578_v37, %v5496_v23  ;;  %v1264_v25 = vmul.f32 %v5581_v36, %v5580_v61  ;;  %v4627_v22 = vpop.f32.mrf.mxu2  ;;  %v5586_v37 = vld [vmem:[#allocation80_spill] sm:$0xff]  ;;  %v4663_v61 = vpop.f32.mrf.mxu0 }
 0x217   :  { %1651 = vrot.lane.b32.xlu0 %v1608_v10, %s3084_s1  ;;  %v1076_v38 = vpop.permute.xlu2 %1075  ;;  %v4615_v35 = vadd.f32 %v1418_v17, %v1278_v43  ;;  %v5582_v17 = vld [vmem:[#allocation82_spill] sm:$0xff]  ;;  %5583 = vst [vmem:[#allocation34_spill] sm:$0xff] %v4627_v22 }
 0x218   :  { %v1168_v0 = vmul.f32 %v5577_v51, %v1076_v38  ;;  %1594 = vperm.xlu2 %3030, %v4445_v7   ;;  %v1319_v58 = vpop.permute.xlu0 %1318  ;;  %v1513_v10 = vmul.f32 %v5582_v17, %v779_v21  ;;  %v1519_v26 = vadd.f32 %v1503_v11, %v1423_v56  ;;  %v1607_v38 = vmul.f32 %v4490_v63, %v4579_v62  ;;  %v4642_v63 = vpop.f32.mrf.mxu3 }
 0x219   :  { %5574 = vst [vmem:[#allocation61_spill] sm:$0xff] %v4615_v35  ;;  %v1417_v28 = vmul.f32 %v5579_v13, %v1319_v58  ;;  %v4670_v17 = vpop.f32.mrf.mxu1 }
 0x21a   :  { %v1184_v4 = vadd.f32 %v1168_v0, %v1024_v52  ;;  %v5585_v0 = vld [vmem:[#allocation65_spill] sm:$0xff] }
 0x21b   :  { %v1433_v43 = vadd.f32 %v1417_v28, %v1277_v15  ;;  %v2301_v15 = vld [vmem:[%s5331_s5 + $0x78] sm:$0xff] }
 0x21c   :  { %v1634_v55 = vpop.permute.xlu1 %1633  ;;  %v1280_v54 = vadd.f32 %v1264_v25, %v1184_v4  ;;  %2313 = vmatpush.msra.mxu2 %v2301_v15 }
 0x21d   :  { %v1679_v51 = vadd.f32 %v1634_v55, %v1519_v26  ;;  %v4631_v23 = vadd.f32 %v1513_v10, %v1433_v43  ;;  %v5589_v43 = vld [vmem:[#allocation99_spill] sm:$0xff] }
 0x21e   :  { %1649 = vrot.lane.b32.xlu1 %v1607_v38, %s3084_s1  ;;  %v4646_v56 = vpop.f32.mrf.mxu2  ;;  %v5590_v26 = vld [vmem:[#allocation87_spill] sm:$0xff] }
 0x21f   :  { %5584 = vst [vmem:[#allocation72_spill] sm:$0xff] %v4631_v23  ;;  %1990 = vperm.xlu0 %3035, %v4207_v53   ;;  %v4635_v33 = vpop.permute.xlu2 %1629  ;;  %3036 = vset.pattern.permute.xlu1 %v5520_v48 }
 0x220   :  { %3032 = vset.pattern.permute.xlu2 %v5500_v45  ;;  %v4639_v21 = vpop.permute.xlu0 %1887  ;;  %v4661_v13 = vpop.f32.mrf.mxu3 }
 0x221   :  { %1846 = vperm.xlu2 %3032, %v4419_v31  }
 0x224   :  { %v4644_v29 = vpop.permute.xlu1 %1586 }
 0x226   :  { %1738 = vperm.xlu1 %3036, %v4280_v47   ;;  %v4667_v25 = vpop.f32.mrf.mxu2 }
 0x227   :  { %3037 = vset.pattern.permute.xlu0 %v5520_v48  ;;  %v1323_v52 = vpop.permute.xlu2 %1322  ;;  %v1516_v38 = vmul.f32 %v5590_v26, %v4667_v25  ;;  %v1860_v26 = vmul.f32 %v4383_v34, %v4543_v20  ;;  %v2291_v34 = vld [vmem:[%s5331_s5 + $0x28] sm:$0xff] }
 0x228   :  { %v1419_v58 = vmul.f32 %v5585_v0, %v1323_v52  ;;  %1698 = vperm.xlu0 %3037, %v5586_v37   ;;  %v4652_v45 = vpop.permute.xlu0 %1885  ;;  %v2293_v52 = vld [vmem:[%s5331_s5 + $0x38] sm:$0xff]  ;;  %v4685_v37 = vpop.f32.mrf.mxu0 }
 0x229   :  { %1850 = vperm.xlu2 %3032, %v4445_v7   ;;  %2336 = vmatpush.msrb.mxu3 %v2293_v52  ;;  %v2292_v52 = vld [vmem:[%s5331_s5 + $0x30] sm:$0xff] }
 0x22a   :  { %v4656_v11 = vadd.f32 %v1419_v58, %v4522_v27  ;;  %v5588_v27 = vld [vmem:[#allocation57_spill] sm:$0xff] }
 0x22b   :  { %2337 = vmatpush.msrb.mxu3 %v2292_v52  ;;  %v5594_v52 = vld [vmem:[#allocation10_spill] sm:$0xff] }
 0x22c   :  { %5587 = vst [vmem:[#allocation42_spill] sm:$0xff] %v4656_v11 }
 0x22d   :  { %v1839_v28 = vpop.permute.xlu1 %1838  ;;  %2338 = vmatpush.msrb.mxu3 %v2291_v34  ;;  %v1009_v34 = vmul.f32 0.0, %v5594_v52  ;;  %v5598_v52 = vld [vmem:[#allocation49_spill] sm:$0xff] }
 0x22e   :  { %v1405_v35 = vmul.f32 0.0, %v5598_v52 }
 0x22f   :  { %v4665_v36 = vpop.permute.xlu2 %1830 }
 0x230   :  { %1706 = vperm.xlu0 %3037, %v4168_v2   ;;  %v1325_v4 = vpop.permute.xlu0 %1324  ;;  %v4681_v2 = vpop.f32.mrf.mxu3 }
 0x231   :  { %v1420_v10 = vmul.f32 %v5588_v27, %v1325_v4  ;;  %1641 = vrot.lane.b32.xlu2 %v5589_v43, %s3084_s1  ;;  %5591 = vst [vmem:[#allocation33_spill] sm:$0xff] %v4681_v2  ;;  %v2300_v27 = vld [vmem:[%s5331_s5 + $0x70] sm:$0xff] }
 0x232   :  { %3034 = vset.pattern.permute.xlu2 %v5520_v48  ;;  %2314 = vmatpush.msra.mxu2 %v2300_v27  ;;  %v2289_v27 = vld [vmem:[%s5331_s5 + $0x18] sm:$0xff] }
 0x233   :  { %v1436_v55 = vadd.f32 %v1420_v10, %v1280_v54  ;;  %v4691_v54 = vpop.f32.mrf.mxu1 }
 0x235   :  { %v4683_v0 = vadd.f32 %v1516_v38, %v1436_v55 }
 0x236   :  { %v1959_v58 = vpop.permute.xlu1 %1958 }
 0x237   :  { %5592 = vst [vmem:[#allocation37_spill] sm:$0xff] %v4683_v0  ;;  %v1835_v15 = vpop.permute.xlu2 %1834  ;;  %v5595_v0 = vld [vmem:[#allocation15_spill] sm:$0xff] }
 0x238   :  { %v1864_v4 = vmul.f32 %v1835_v15, %v4681_v2  ;;  %1718 = vperm.xlu0 %3037, %v5544_v19   ;;  %v1583_v48 = vpop.permute.xlu0 %1582  ;;  %v886_v19 = vpop.f32.mrf.mxu0 }
 0x239   :  { %1722 = vperm.xlu2 %3034, %v5548_v12   ;;  %v1609_v10 = vmul.f32 %v1583_v48, %v4627_v22 }
 0x23a   :  { %1907 = vrot.lane.b32.xlu1 %v1864_v4, %s3084_s1  ;;  %v2290_v4 = vld [vmem:[%s5331_s5 + $0x20] sm:$0xff] }
 0x23b   :  { %v4716_v48 = vpop.f32.mrf.mxu1  ;;  %2339 = vmatpush.msrb.mxu3 %v2290_v4  ;;  %v1153_v4 = vmul.f32 0.0, %v5595_v0  ;;  %v5596_v0 = vld [vmem:[#allocation22_spill] sm:$0xff] }
 0x23d   :  { %2340 = vmatpush.msrb.mxu3 %v2289_v27  ;;  %v1169_v27 = vadd.f32 %v1153_v4, %v1009_v34 }
 0x23e   :  { %v4697_v43 = vpop.permute.xlu1 %1962 }
 0x240   :  { %1653 = vrot.lane.b32.xlu0 %v1609_v10, %s3084_s1  ;;  %v1703_v12 = vpop.permute.xlu2 %1702  ;;  %v4702_v38 = vpop.permute.xlu0 %1891 }
 0x241   :  { %5593 = vst [vmem:[#allocation67_spill] sm:$0xff] %v4702_v38  ;;  %v1759_v55 = vmul.f32 %v1703_v12, %v4362_v6  ;;  %1899 = vrot.lane.b32.xlu2 %v1860_v26, %s3084_s1  ;;  %v1865_v6 = vmul.f32 0.0, %v1839_v28  ;;  %v2288_v28 = vld [vmem:[%s5331_s5 + $0x10] sm:$0xff]  ;;  %v4733_v11 = vpop.f32.mrf.mxu0 }
 0x242   :  { %1742 = vperm.xlu1 %3036, %v4375_v9   ;;  %2341 = vmatpush.msrb.mxu3 %v2288_v28 }
 0x243   :  { %v1775_v15 = vadd.f32 %v1759_v55, %v1679_v51 }
 0x247   :  { %v1711_v10 = vpop.permute.xlu1 %1710 }
 0x248   :  { %1746 = vperm.xlu0 %3037, %v4388_v1   ;;  %v1636_v51 = vpop.permute.xlu2 %1635  ;;  %v1638_v26 = vpop.permute.xlu0 %1637  ;;  %v1761_v4 = vmul.f32 %v1711_v10, %v4455_v60 }
 0x249   :  { %v4723_v12 = vadd.f32 %v1636_v51, %v4352_v39  ;;  %v1681_v55 = vadd.f32 %v1638_v26, %v4381_v32  ;;  %1726 = vperm.xlu2 %3034, %v5571_v59   ;;  %v2287_v39 = vld [vmem:[%s5331_s5 + $0x8] sm:$0xff]  ;;  %v2286_v32 = vld [vmem:[%s5331_s5] sm:$0xff]  ;;  %v1249_v51 = vmul.f32 0.0, %v5596_v0  ;;  %v2015_v26 = vmul.f32 %v1959_v58, %v886_v19 }
 0x24a   :  { %1909 = vrot.lane.b32.xlu1 %v1865_v6, %s3084_s1  ;;  %2342 = vmatpush.msrb.mxu3 %v2287_v39  ;;  %v2299_v59 = vld [vmem:[%s5331_s5 + $0x68] sm:$0xff]  ;;  %v4745_v6 = vpop.f32.mrf.mxu1  ;;  %v5599_v0 = vld [vmem:[#allocation66_spill] sm:$0xff]  ;;  %v1862_v58 = vmul.f32 %v4535_v3, %v4642_v63  ;;  %v2013_v3 = vmul.f32 %v4607_v42, %v4663_v61 }
 0x24b   :  { %2315 = vmatpush.msra.mxu2 %v2299_v59  ;;  %5597 = vst [vmem:[#allocation4_spill] sm:$0xff] %v4745_v6  ;;  %v1265_v5 = vadd.f32 %v1249_v51, %v1169_v27  ;;  %v892_v59 = vpop.f32.mrf.mxu0 }
 0x24c   :  { %2343 = vmatpush.msrb.mxu3 %v2286_v32 }
 0x24d   :  { %v1421_v34 = vadd.f32 %v1405_v35, %v1265_v5 }
 0x24f   :  { %v1715_v28 = vpop.permute.xlu1 %1714  ;;  %v1517_v6 = vadd.f32 %v5599_v0, %v1421_v34 }
 0x250   :  { %v1890_v39 = vpop.permute.xlu2 %1889  ;;  %v1640_v23 = vpop.permute.xlu0 %1639 }
 0x251   :  { %v1935_v22 = vadd.f32 %v1890_v39, %v1775_v15  ;;  %v1682_v2 = vadd.f32 %v1640_v23, %v4360_v8  ;;  %1730 = vperm.xlu2 %3034, %v5557_v14   ;;  %v1677_v19 = vadd.f32 %v4635_v33, %v1517_v6  ;;  %v1777_v15 = vadd.f32 %v1761_v4, %v1681_v55  ;;  %v5600_v14 = vld [vmem:[#allocation98_spill] sm:$0xff] }
 0x252   :  { %v1757_v5 = vmul.f32 %v4566_v49, %v5600_v14  ;;  %v2113_v35 = vpop.f32.mrf.mxu1  ;;  %v1762_v23 = vmul.f32 %v1715_v28, %v4481_v44  ;;  %v2298_v55 = vld [vmem:[%s5331_s5 + $0x60] sm:$0xff] }
 0x253   :  { %v2031_v38 = vadd.f32 %v2015_v26, %v1935_v22  ;;  %v895_v10 = vpop.f32.mrf.mxu0  ;;  %2316 = vmatpush.msra.mxu2 %v2298_v55 }
 0x254   :  { %v1773_v22 = vadd.f32 %v1757_v5, %v1677_v19  ;;  %v1778_v51 = vadd.f32 %v1762_v23, %v1682_v2  ;;  %v4775_v2 = vld [vmem:[%s5330_s4] ss:$0 sm:$0xff] }
 0x256   :  { %v1933_v33 = vadd.f32 %v4652_v45, %v1773_v22 }
 0x258   :  { %v1967_v32 = vpop.permute.xlu1 %1966  ;;  %v1843_v52 = vpop.permute.xlu2 %1842  ;;  %v2029_v44 = vadd.f32 %v2013_v3, %v1933_v33  ;;  %v2386_v3 = vld [vmem:[%s5331_s5 + $0xf0] sm:$0xff] }
 0x259   :  { %v1866_v39 = vmul.f32 0.0, %v1843_v52  ;;  %v1894_v8 = vpop.permute.xlu0 %1893  ;;  %1903 = vrot.lane.b32.xlu2 %v1862_v58, %s3084_s1  ;;  %v2017_v27 = vmul.f32 %v1967_v32, %v892_v59  ;;  %v1863_v52 = vmul.f32 %v4665_v36, %v4661_v13  ;;  %v2297_v36 = vld [vmem:[%s5331_s5 + $0x58] sm:$0xff] }
 0x25a   :  { %v1937_v60 = vadd.f32 %v1894_v8, %v1777_v15  ;;  %v2116_v61 = vpop.f32.mrf.mxu1  ;;  %2317 = vmatpush.msra.mxu2 %v2297_v36  ;;  %v2448_v36 = vld [vmem:[%s5331_s5 + $0x160] sm:$0xff] }
 0x25b   :  { %1911 = vrot.lane.b32.xlu1 %v1866_v39, %s3084_s1 }
 0x25c   :  { %v2033_v45 = vadd.f32 %v2017_v27, %v1937_v60 }
 0x260   :  { %v1971_v49 = vpop.permute.xlu1 %1970 }
 0x261   :  { %v2018_v6 = vmul.f32 %v1971_v49, %v895_v10  ;;  %v1896_v26 = vpop.permute.xlu0 %1895  ;;  %1734 = vperm.xlu2 %3034, %v4207_v53   ;;  %v4767_v34 = vpop.permute.xlu2 %2151  ;;  %v2295_v10 = vld [vmem:[%s5331_s5 + $0x48] sm:$0xff]  ;;  %v2294_v49 = vld [vmem:[%s5331_s5 + $0x40] sm:$0xff] }
 0x262   :  { %v1938_v28 = vadd.f32 %v1896_v26, %v1778_v51  ;;  %v2154_v42 = vmul.f32 %v4767_v34, %v4670_v17  ;;  %v2156_v53 = vmul.f32 %v4767_v34, %v4716_v48  ;;  %v2158_v0 = vmul.f32 %v4767_v34, %v2113_v35  ;;  %v2384_v51 = vld [vmem:[%s5331_s5 + $0xe0] sm:$0xff]  ;;  %v2383_v26 = vld [vmem:[%s5331_s5 + $0xd8] sm:$0xff] }
 0x263   :  { %1750 = vperm.xlu1 %3036, %v4419_v31   ;;  %v2159_v58 = vmul.f32 %v4767_v34, %v2116_v61  ;;  %v2381_v61 = vld [vmem:[%s5331_s5 + $0xc8] sm:$0xff] }
 0x264   :  { %v2034_v4 = vadd.f32 %v2018_v6, %v1938_v28  ;;  %v2170_v59 = vadd.f32 %v2154_v42, %v2029_v44  ;;  %v4781_v17 = vadd.f32 %v2156_v53, %v2031_v38  ;;  %v4783_v32 = vadd.f32 %v2158_v0, %v2033_v45  ;;  %v2355_v6 = vld [vmem:[%s5331_s5 + $0xb8] sm:$0xff]  ;;  %v2354_v44 = vld [vmem:[%s5331_s5 + $0xb0] sm:$0xff]  ;;  %v2353_v42 = vld [vmem:[%s5331_s5 + $0xa8] sm:$0xff] }
 0x265   :  { %v5601_v53 = vld [vmem:[#allocation89_spill] sm:$0xff] }
 0x266   :  { %v2186_v19 = vmul.f32 0.04134491, %v2170_v59  ;;  %v4787_v15 = vadd.f32 %v2159_v58, %v2034_v4  ;;  %v2380_v59 = vld [vmem:[%s5331_s5 + $0xc0] sm:$0xff]  ;;  %v1512_v0 = vmul.f32 %v5601_v53, %v4579_v62  ;;  %v2351_v58 = vld [vmem:[%s5331_s5 + $0x98] sm:$0xff]  ;;  %v2450_v62 = vld [vmem:[%s5331_s5 + $0x170] sm:$0xff] }
 0x268   :  { %v2206_v39 = vadd.f32 %v4775_v2, %v2186_v19  ;;  %v4827_v27 = vpop.permute.xlu1 %1643  ;;  %v2451_v19 = vld [vmem:[%s5331_s5 + $0x178] sm:$0xff] }
 0x269   :  { %v4790_v8 = vpop.permute.xlu0 %1897  ;;  %1905 = vrot.lane.b32.xlu2 %v1863_v52, %s3084_s1 }
 0x26a   :  { %v1591_v48 = vpop.permute.xlu2 %1590  ;;  %vm2222_vm5 = vcmp.ge.f32.partialorder %v2206_v39, 0.0  ;;  %v2238_v14 = vmul.f32 0.2, %v2206_v39  ;;  %3038 = vset.pattern.permute.xlu2 %v5514_v41 }
 0x26b   :  { %v1611_v38 = vmul.f32 %v1591_v48, %v4667_v25  ;;  %3039 = vset.pattern.permute.xlu1 %v5514_v41  ;;  %v2387_v41 = vld [vmem:[%s5331_s5 + $0xf8] sm:$0xff]  ;;  %v1610_v25 = vmul.f32 %v4644_v29, %v4646_v56  ;;  %v2385_v29 = vld [vmem:[%s5331_s5 + $0xe8] sm:$0xff] }
 0x26c   :  { %v2254_v5 = vsel %vm2222_vm5, %v2206_v39, %v2238_v14  ;;  %2399 = vmatpush.msra.mxu3 %v2387_v41  ;;  %v1528_v39 = vadd.f32 %v1512_v0, %v4599_v18  ;;  %v2349_v18 = vld [vmem:[%s5331_s5 + $0x88] sm:$0xff] }
 0x26d   :  { %1657 = vrot.lane.b32.xlu0 %v1611_v38, %s3084_s1  ;;  %v2270_v35 = vmul.f32 1.4142135, %v2254_v5  ;;  %v2449_v38 = vld [vmem:[%s5331_s5 + $0x168] sm:$0xff] }
 0x26e   :  { %2400 = vmatpush.msra.mxu3 %v2386_v3 }
 0x26f   :  { %2970 = vmatmul.msk.f32.vlgmr.msrb.gmra.mxu3 %vm552_vm1, %v2270_v35  ;;  %v4900_v35 = vpop.f32.mrf.mxu0 }
 0x270   :  { %2401 = vmatpush.msra.mxu3 %v2385_v29  ;;  %v4874_v52 = vpop.permute.xlu1 %1974 }
 0x271   :  { %v4801_v60 = vpop.permute.xlu0 %1978  ;;  %1994 = vperm.xlu2 %3038, %v4280_v47   ;;  %v2296_v47 = vld [vmem:[%s5331_s5 + $0x50] sm:$0xff] }
 0x272   :  { %v4804_v22 = vpop.permute.xlu2 %1594  ;;  %2318 = vmatpush.msra.mxu2 %v2296_v47  ;;  %2402 = vmatpush.msra.mxu3 %v2384_v51  ;;  %v1684_v51 = vadd.f32 %v4827_v27, %v4451_v46  ;;  %v2014_v46 = vmul.f32 %v4584_v57, %v4685_v37 }
 0x273   :  { %v1612_v41 = vmul.f32 0.0, %v4804_v22  ;;  %v2445_v22 = vld [vmem:[%s5331_s5 + $0x148] sm:$0xff] }
 0x274   :  { %2319 = vmatpush.msra.mxu2 %v2295_v10  ;;  %2403 = vmatpush.msra.mxu3 %v2383_v26  ;;  %v4912_v10 = vpop.f32.mrf.mxu1 }
 0x275   :  { %1754 = vperm.xlu0 %3037, %v4445_v7  }
 0x276   :  { %2320 = vmatpush.msra.mxu2 %v2294_v49 }
 0x278   :  { %2367 = vmatpush.msrb.mxu2 %v2355_v6  ;;  %v1646_v47 = vpop.permute.xlu1 %1645  ;;  %v901_v6 = vpop.f32.mrf.mxu0 }
 0x279   :  { %v4812_v23 = vpop.permute.xlu0 %1901  ;;  %1655 = vrot.lane.b32.xlu2 %v1610_v25, %s3084_s1  ;;  %v2447_v25 = vld [vmem:[%s5331_s5 + $0x158] sm:$0xff] }
 0x27a   :  { %2368 = vmatpush.msrb.mxu2 %v2354_v44 }
 0x27b   :  { %v1847_v33 = vpop.permute.xlu2 %1846 }
 0x27c   :  { %v1867_v55 = vmul.f32 0.0, %v1847_v33  ;;  %2369 = vmatpush.msrb.mxu2 %v2353_v42  ;;  %v2446_v33 = vld [vmem:[%s5331_s5 + $0x150] sm:$0xff] }
 0x27d   :  { %3040 = vset.pattern.permute.xlu0 %v5555_v50  ;;  %v2382_v50 = vld [vmem:[%s5331_s5 + $0xd0] sm:$0xff] }
 0x27e   :  { %1913 = vrot.lane.b32.xlu1 %v1867_v55, %s3084_s1  ;;  %2404 = vmatpush.msra.mxu3 %v2382_v50  ;;  %v2444_v55 = vld [vmem:[%s5331_s5 + $0x140] sm:$0xff]  ;;  %v5602_v42 = vld [vmem:[#allocation100_spill] sm:$0xff] }
 0x280   :  { %2405 = vmatpush.msra.mxu3 %v2381_v61  ;;  %v1648_v50 = vpop.permute.xlu1 %1647 }
 0x281   :  { %v4846_v28 = vpop.permute.xlu0 %1986  ;;  %1998 = vperm.xlu2 %3038, %v4375_v9   ;;  %v2352_v9 = vld [vmem:[%s5331_s5 + $0xa0] sm:$0xff] }
 0x282   :  { %2370 = vmatpush.msrb.mxu2 %v2352_v9  ;;  %2406 = vmatpush.msra.mxu3 %v2380_v59  ;;  %v2122_v59 = vpop.f32.mrf.mxu1 }
 0x283   :  { %v1851_v45 = vpop.permute.xlu2 %1850 }
 0x284   :  { %v1868_v4 = vmul.f32 0.0, %v1851_v45  ;;  %2463 = vmatpush.msrb.mxu3 %v2451_v19  ;;  %2371 = vmatpush.msrb.mxu2 %v2351_v58  ;;  %v2155_v58 = vmul.f32 %v4767_v34, %v4691_v54  ;;  %v2016_v54 = vmul.f32 %v4697_v43, %v4733_v11 }
 0x286   :  { %2010 = vperm.xlu1 %3039, %v4445_v7   ;;  %1915 = vrot.lane.b32.xlu0 %v1868_v4, %s3084_s1  ;;  %v2350_v7 = vld [vmem:[%s5331_s5 + $0x90] sm:$0xff]  ;;  %v2020_v4 = vmul.f32 %v4801_v60, %v901_v6 }
 0x287   :  { %2464 = vmatpush.msrb.mxu3 %v2450_v62  ;;  %2372 = vmatpush.msrb.mxu2 %v2350_v7 }
 0x289   :  { %v1652_v48 = vpop.permute.xlu0 %1651  ;;  %2002 = vperm.xlu2 %3038, %v4388_v1   ;;  %2465 = vmatpush.msrb.mxu3 %v2449_v38  ;;  %v2348_v1 = vld [vmem:[%s5331_s5 + $0x80] sm:$0xff] }
 0x28a   :  { %v4884_v14 = vadd.f32 %v1652_v48, %v1528_v39  ;;  %2373 = vmatpush.msrb.mxu2 %v2349_v18  ;;  %v1983_v18 = vpop.permute.xlu1 %1982 }
 0x28b   :  { %v4892_v5 = vpop.permute.xlu2 %1641  ;;  %2466 = vmatpush.msrb.mxu3 %v2448_v36 }
 0x28c   :  { %2374 = vmatpush.msrb.mxu2 %v2348_v1  ;;  %v904_v1 = vpop.f32.mrf.mxu0 }
 0x28d   :  { %2467 = vmatpush.msrb.mxu3 %v2447_v25  ;;  %v2021_v25 = vmul.f32 %v1983_v18, %v904_v1  ;;  %v2416_v18 = vld [vmem:[%s5331_s5 + $0x120] sm:$0xff] }
 0x28f   :  { %2468 = vmatpush.msrb.mxu3 %v2446_v33  ;;  %v5604_v33 = vld [vmem:[#allocation4_spill] sm:$0xff] }
 0x291   :  { %v4906_v3 = vpop.permute.xlu0 %1990  ;;  %1659 = vrot.lane.b32.xlu2 %v1612_v41, %s3084_s1  ;;  %2469 = vmatpush.msrb.mxu3 %v2445_v22  ;;  %v5603_v41 = vld [vmem:[#allocation67_spill] sm:$0xff] }
 0x293   :  { %v1723_v29 = vpop.permute.xlu2 %1722  ;;  %2470 = vmatpush.msrb.mxu3 %v2444_v55  ;;  %v2190_v55 = vmul.f32 0.04134491, %v4783_v32 }
 0x294   :  { %v1764_v49 = vmul.f32 %v1723_v29, %v4524_v16  ;;  %v2161_v16 = vmul.f32 %v4767_v34, %v2122_v59 }
 0x296   :  { %v1780_v44 = vadd.f32 %v1764_v49, %v1684_v51  ;;  %v5605_v49 = vld [vmem:[#allocation2_spill] sm:$0xff] }
 0x297   :  { %v1683_v51 = vadd.f32 %v4892_v5, %v5605_v49  ;;  %v2418_v5 = vld [vmem:[%s5331_s5 + $0x130] sm:$0xff]  ;;  %v2512_v49 = vld [vmem:[%s5331_s5 + $0x1e0] sm:$0xff] }
 0x299   :  { %2006 = vperm.xlu2 %3038, %v4419_v31  }
 0x29a   :  { %v1699_v26 = vpop.permute.xlu0 %1698 }
 0x29b   :  { %v1758_v45 = vmul.f32 %v1699_v26, %v5602_v42  ;;  %v1900_v61 = vpop.permute.xlu2 %1899  ;;  %v5606_v26 = vld [vmem:[#allocation29_spill] sm:$0xff] }
 0x29c   :  { %v1940_v9 = vadd.f32 %v1900_v61, %v1780_v44 }
 0x29d   :  { %v1774_v53 = vadd.f32 %v1758_v45, %v4582_v30  ;;  %v1685_v30 = vadd.f32 %v1646_v47, %v4436_v40  ;;  %v2157_v40 = vmul.f32 %v4767_v34, %v5604_v33  ;;  %v2125_v47 = vpop.f32.mrf.mxu1 }
 0x29e   :  { %v2036_v0 = vadd.f32 %v2020_v4, %v1940_v9  ;;  %v2162_v22 = vmul.f32 %v4767_v34, %v2125_v47  ;;  %v2419_v4 = vld [vmem:[%s5331_s5 + $0x138] sm:$0xff]  ;;  %v2191_v9 = vmul.f32 0.04134491, %v4787_v15  ;;  %v5608_v15 = vld [vmem:[#allocation75_spill] sm:$0xff]  ;;  %v2414_v47 = vld [vmem:[%s5331_s5 + $0x110] sm:$0xff] }
 0x29f   :  { %v1934_v31 = vadd.f32 %v4639_v21, %v1774_v53  ;;  %v2188_v21 = vmul.f32 0.04134491, %v4781_v17 }
 0x2a0   :  { %v4931_v27 = vadd.f32 %v2161_v16, %v2036_v0  ;;  %v5607_v16 = vld [vmem:[#allocation76_spill] sm:$0xff] }
 0x2a1   :  { %v2030_v19 = vadd.f32 %v2014_v46, %v1934_v31  ;;  %v2208_v17 = vadd.f32 %v4775_v2, %v2188_v21  ;;  %v2019_v46 = vmul.f32 %v4874_v52, %v4900_v35  ;;  %v2211_v52 = vadd.f32 %v4775_v2, %v2191_v9  ;;  %v907_v35 = vpop.f32.mrf.mxu0 }
 0x2a2   :  { %v1707_v39 = vpop.permute.xlu0 %1706  ;;  %v2022_v21 = vmul.f32 %v4846_v28, %v907_v35 }
 0x2a3   :  { %v2171_v60 = vadd.f32 %v2155_v58, %v2030_v19  ;;  %v1760_v7 = vmul.f32 %v1707_v39, %v4428_v24  ;;  %v1727_v62 = vpop.permute.xlu2 %1726  ;;  %v2240_v32 = vmul.f32 0.2, %v2208_v17  ;;  %vm2224_vm7 = vcmp.ge.f32.partialorder %v2208_v17, 0.0  ;;  %v4969_v39 = vpop.permute.xlu1 %1649 }
 0x2a4   :  { %v1765_v48 = vmul.f32 %v1727_v62, %v4543_v20  ;;  %v1686_v19 = vadd.f32 %v1648_v50, %v5608_v15  ;;  %v2210_v62 = vadd.f32 %v4775_v2, %v2190_v55  ;;  %v2243_v33 = vmul.f32 0.2, %v2211_v52  ;;  %v2412_v55 = vld [vmem:[%s5331_s5 + $0x100] sm:$0xff] }
 0x2a5   :  { %v2187_v38 = vmul.f32 0.04134491, %v2171_v60  ;;  %v1776_v57 = vadd.f32 %v1760_v7, %v4723_v12  ;;  %v2160_v60 = vmul.f32 %v4767_v34, %v4912_v10  ;;  %v2417_v7 = vld [vmem:[%s5331_s5 + $0x128] sm:$0xff]  ;;  %vm2227_vm9 = vcmp.ge.f32.partialorder %v2211_v52, 0.0 }
 0x2a6   :  { %v1781_v37 = vadd.f32 %v1765_v48, %v1685_v30  ;;  %vm2226_vm10 = vcmp.ge.f32.partialorder %v2210_v62, 0.0 }
 0x2a7   :  { %v2207_v36 = vadd.f32 %v4775_v2, %v2187_v38  ;;  %v1936_v24 = vadd.f32 %v5603_v41, %v1776_v57  ;;  %v2515_v41 = vld [vmem:[%s5331_s5 + $0x1f8] sm:$0xff] }
 0x2a8   :  { %v1941_v20 = vadd.f32 %v4812_v23, %v1781_v37 }
 0x2a9   :  { %v2239_v29 = vmul.f32 0.2, %v2207_v36  ;;  %v2032_v12 = vadd.f32 %v2016_v54, %v1936_v24  ;;  %vm2223_vm6 = vcmp.ge.f32.partialorder %v2207_v36, 0.0  ;;  %v2128_v24 = vpop.f32.mrf.mxu1 }
 0x2aa   :  { %v2037_v11 = vadd.f32 %v2021_v25, %v1941_v20  ;;  %v1719_v43 = vpop.permute.xlu0 %1718  ;;  %v2242_v25 = vmul.f32 0.2, %v2210_v62  ;;  %v2163_v20 = vmul.f32 %v4767_v34, %v2128_v24 }
 0x2ab   :  { %v2173_v6 = vadd.f32 %v2157_v40, %v2032_v12  ;;  %v1763_v44 = vmul.f32 %v1719_v43, %v5606_v26  ;;  %v1731_v42 = vpop.permute.xlu2 %1730  ;;  %v2255_v23 = vsel %vm2223_vm6, %v2207_v36, %v2239_v29  ;;  %v2415_v36 = vld [vmem:[%s5331_s5 + $0x118] sm:$0xff]  ;;  %v2193_v40 = vmul.f32 0.04134491, %v4931_v27  ;;  %v2514_v29 = vld [vmem:[%s5331_s5 + $0x1f0] sm:$0xff]  ;;  %v2413_v12 = vld [vmem:[%s5331_s5 + $0x108] sm:$0xff] }
 0x2ac   :  { %v4953_v45 = vadd.f32 %v2162_v22, %v2037_v11  ;;  %v2271_v61 = vmul.f32 1.4142135, %v2255_v23  ;;  %v1766_v0 = vmul.f32 %v1731_v42, %v5607_v16  ;;  %v2259_v22 = vsel %vm2227_vm9, %v2211_v52, %v2243_v33  ;;  %v1739_v11 = vpop.permute.xlu1 %1738  ;;  %v2483_v26 = vld [vmem:[%s5331_s5 + $0x1b8] sm:$0xff]  ;;  %v5609_v16 = vld [vmem:[#allocation55_spill] sm:$0xff] }
 0x2ad   :  { %v2189_v59 = vmul.f32 0.04134491, %v2173_v6  ;;  %v1779_v53 = vadd.f32 %v1763_v44, %v1683_v51  ;;  %v2213_v43 = vadd.f32 %v4775_v2, %v2193_v40  ;;  %v2258_v51 = vsel %vm2226_vm10, %v2210_v62, %v2242_v25  ;;  %v2511_v23 = vld [vmem:[%s5331_s5 + $0x1d8] sm:$0xff] }
 0x2ae   :  { %2969 = vmatmul.msk.f32.vlgmr.msra.gmra.mxu2 %vm552_vm1, %v2271_v61  ;;  %v1782_v50 = vadd.f32 %v1766_v0, %v1686_v19  ;;  %v2275_v42 = vmul.f32 1.4142135, %v2259_v22  ;;  %v2274_v61 = vmul.f32 1.4142135, %v2258_v51  ;;  %v1687_v0 = vadd.f32 %v4969_v39, %v5609_v16  ;;  %v2508_v39 = vld [vmem:[%s5331_s5 + $0x1c0] sm:$0xff]  ;;  %v2479_v62 = vld [vmem:[%s5331_s5 + $0x198] sm:$0xff] }
 0x2af   :  { %v2209_v31 = vadd.f32 %v4775_v2, %v2189_v59  ;;  %v1939_v58 = vadd.f32 %v4790_v8, %v1779_v53  ;;  %2431 = vmatpush.msra.mxu2 %v2419_v4  ;;  %v2256_v8 = vsel %vm2224_vm7, %v2208_v17, %v2240_v32  ;;  %v2513_v17 = vld [vmem:[%s5331_s5 + $0x1e8] sm:$0xff]  ;;  %v2482_v4 = vld [vmem:[%s5331_s5 + $0x1b0] sm:$0xff]  ;;  %v2245_v9 = vmul.f32 0.2, %v2213_v43  ;;  %v2579_v52 = vld [vmem:[%s5331_s5 + $0x278] sm:$0xff] }
 0x2b0   :  { %v2272_v54 = vmul.f32 1.4142135, %v2256_v8  ;;  %v2510_v53 = vld [vmem:[%s5331_s5 + $0x1d0] sm:$0xff]  ;;  %vm2229_vm11 = vcmp.ge.f32.partialorder %v2213_v43, 0.0  ;;  %v2481_v32 = vld [vmem:[%s5331_s5 + $0x1a8] sm:$0xff]  ;;  %v2547_v40 = vld [vmem:[%s5331_s5 + $0x238] sm:$0xff] }
 0x2b1   :  { %v2241_v30 = vmul.f32 0.2, %v2209_v31  ;;  %v2035_v48 = vadd.f32 %v2019_v46, %v1939_v58  ;;  %2432 = vmatpush.msra.mxu2 %v2418_v5  ;;  %vm2225_vm8 = vcmp.ge.f32.partialorder %v2209_v31, 0.0  ;;  %v2509_v5 = vld [vmem:[%s5331_s5 + $0x1c8] sm:$0xff]  ;;  %v910_v46 = vpop.f32.mrf.mxu0  ;;  %v2261_v58 = vsel %vm2229_vm11, %v2213_v43, %v2245_v9  ;;  %v2574_v22 = vld [vmem:[%s5331_s5 + $0x250] sm:$0xff]  ;;  %v2643_v9 = vld [vmem:[%s5331_s5 + $0x2f8] sm:$0xff] }
 0x2b2   :  { %v2023_v35 = vmul.f32 %v4906_v3, %v910_v46  ;;  %v2545_v43 = vld [vmem:[%s5331_s5 + $0x228] sm:$0xff]  ;;  %v2642_v16 = vld [vmem:[%s5331_s5 + $0x2f0] sm:$0xff]  ;;  %v5611_v46 = vld [vmem:[#allocation34_spill] sm:$0xff]  ;;  %vm2845_vm7 = vcmask 261120  }
 0x2b3   :  { %v2176_v10 = vadd.f32 %v2160_v60, %v2035_v48  ;;  %2433 = vmatpush.msra.mxu2 %v2417_v7  ;;  %v1904_v38 = vpop.permute.xlu2 %1903  ;;  %v2257_v57 = vsel %vm2225_vm8, %v2209_v31, %v2241_v30  ;;  %v2480_v31 = vld [vmem:[%s5331_s5 + $0x1a0] sm:$0xff]  ;;  %v2131_v60 = vpop.f32.mrf.mxu1  ;;  %vm2850_vm8 = vcmask 7168  }
 0x2b4   :  { %v1942_v37 = vadd.f32 %v1904_v38, %v1782_v50  ;;  %v2273_v1 = vmul.f32 1.4142135, %v2257_v57  ;;  %v1908_v15 = vpop.permute.xlu1 %1907  ;;  %v2277_v50 = vmul.f32 1.4142135, %v2261_v58  ;;  %v1768_v38 = vmul.f32 %v1739_v11, %v4661_v13  ;;  %v2476_v13 = vld [vmem:[%s5331_s5 + $0x180] sm:$0xff] }
 0x2b5   :  { %2434 = vmatpush.msra.mxu2 %v2416_v18  ;;  %v2192_v44 = vmul.f32 0.04134491, %v2176_v10  ;;  %v2478_v18 = vld [vmem:[%s5331_s5 + $0x190] sm:$0xff]  ;;  %v2164_v57 = vmul.f32 %v4767_v34, %v2131_v60 }
 0x2b6   :  { %v2038_v28 = vadd.f32 %v2022_v21, %v1942_v37  ;;  %2971 = vmatmul.msk.f32.vlgmr.msrb.gmra.mxu2 %vm552_vm1, %v2272_v54  ;;  %2972 = vmatmul.msk.f32.vlgmr.msra.gmra.mxu3 %vm552_vm1, %v2273_v1  ;;  %v2578_v10 = vld [vmem:[%s5331_s5 + $0x270] sm:$0xff]  ;;  %v2477_v21 = vld [vmem:[%s5331_s5 + $0x188] sm:$0xff]  ;;  %v1784_v24 = vadd.f32 %v1768_v38, %v4884_v14 }
 0x2b7   :  { %2435 = vmatpush.msra.mxu2 %v2415_v36  ;;  %2527 = vmatpush.msra.mxu3 %v2515_v41  ;;  %v2577_v37 = vld [vmem:[%s5331_s5 + $0x268] sm:$0xff]  ;;  %v2576_v41 = vld [vmem:[%s5331_s5 + $0x260] sm:$0xff]  ;;  %v5613_v60 = vld [vmem:[#allocation72_spill] sm:$0xff] }
 0x2b8   :  { %v2179_v27 = vadd.f32 %v2163_v20, %v2038_v28  ;;  %v2575_v20 = vld [vmem:[%s5331_s5 + $0x258] sm:$0xff]  ;;  %v2194_v28 = vmul.f32 0.04134491, %v4953_v45 }
 0x2b9   :  { %2436 = vmatpush.msra.mxu2 %v2414_v47  ;;  %2528 = vmatpush.msra.mxu3 %v2514_v29  ;;  %v1944_v47 = vadd.f32 %v1908_v15, %v1784_v24  ;;  %v2541_v15 = vld [vmem:[%s5331_s5 + $0x208] sm:$0xff] }
 0x2ba   :  { %v2195_v48 = vmul.f32 0.04134491, %v2179_v27 }
 0x2bb   :  { %2437 = vmatpush.msra.mxu2 %v2413_v12  ;;  %2529 = vmatpush.msra.mxu3 %v2513_v17  ;;  %v1735_v6 = vpop.permute.xlu2 %1734  ;;  %v2134_v12 = vpop.f32.mrf.mxu1  ;;  %v2546_v17 = vld [vmem:[%s5331_s5 + $0x230] sm:$0xff] }
 0x2bc   :  { %v1767_v59 = vmul.f32 %v1735_v6, %v4642_v63  ;;  %v2212_v63 = vadd.f32 %v4775_v2, %v2192_v44  ;;  %v2215_v1 = vadd.f32 %v4775_v2, %v2195_v48  ;;  %v1743_v27 = vpop.permute.xlu1 %1742  ;;  %v2165_v45 = vmul.f32 %v4767_v34, %v2134_v12  ;;  %v2544_v44 = vld [vmem:[%s5331_s5 + $0x220] sm:$0xff] }
 0x2bd   :  { %2438 = vmatpush.msra.mxu2 %v2412_v55  ;;  %2530 = vmatpush.msra.mxu3 %v2512_v49  ;;  %v2573_v55 = vld [vmem:[%s5331_s5 + $0x248] sm:$0xff]  ;;  %v2214_v49 = vadd.f32 %v4775_v2, %v2194_v28  ;;  %v2608_v12 = vld [vmem:[%s5331_s5 + $0x2a0] sm:$0xff] }
 0x2be   :  { %2974 = vmatmul.msk.f32.vlgmr.msrb.gmra.mxu3 %vm552_vm1, %v2275_v42  ;;  %2973 = vmatmul.msk.f32.vlgmr.msra.gmra.mxu2 %vm552_vm1, %v2274_v61  ;;  %v1783_v19 = vadd.f32 %v1767_v59, %v1687_v0  ;;  %v2244_v30 = vmul.f32 0.2, %v2212_v63  ;;  %vm2228_vm12 = vcmp.ge.f32.partialorder %v2212_v63, 0.0  ;;  %v2247_v29 = vmul.f32 0.2, %v2215_v1  ;;  %v2572_v42 = vld [vmem:[%s5331_s5 + $0x240] sm:$0xff] }
 0x2bf   :  { %2495 = vmatpush.msrb.mxu2 %v2483_v26  ;;  %2531 = vmatpush.msra.mxu3 %v2511_v23  ;;  %vm2231_vm13 = vcmp.ge.f32.partialorder %v2215_v1, 0.0  ;;  %v1654_v26 = vpop.permute.xlu0 %1653  ;;  %v2246_v59 = vmul.f32 0.2, %v2214_v49  ;;  %vm2230_vm14 = vcmp.ge.f32.partialorder %v2214_v49, 0.0  ;;  %v5610_v0 = vld [vmem:[#allocation33_spill] sm:$0xff]  ;;  %v2609_v28 = vld [vmem:[%s5331_s5 + $0x2a8] sm:$0xff] }
 0x2c0   :  { %v2260_v54 = vsel %vm2228_vm12, %v2212_v63, %v2244_v30  ;;  %v2263_v51 = vsel %vm2231_vm13, %v2215_v1, %v2247_v29  ;;  %v1769_v63 = vmul.f32 %v1743_v27, %v5610_v0  ;;  %v2640_v30 = vld [vmem:[%s5331_s5 + $0x2e0] sm:$0xff] }
 0x2c1   :  { %2496 = vmatpush.msrb.mxu2 %v2482_v4  ;;  %2532 = vmatpush.msra.mxu3 %v2510_v53  ;;  %v2276_v25 = vmul.f32 1.4142135, %v2260_v54  ;;  %v2279_v23 = vmul.f32 1.4142135, %v2263_v51  ;;  %v2543_v4 = vld [vmem:[%s5331_s5 + $0x218] sm:$0xff]  ;;  %v2704_v0 = vld [vmem:[%s5331_s5 + $0x360] sm:$0xff] }
 0x2c3   :  { %2497 = vmatpush.msrb.mxu2 %v2481_v32  ;;  %2533 = vmatpush.msra.mxu3 %v2509_v5  ;;  %v1906_v7 = vpop.permute.xlu2 %1905  ;;  %v2542_v32 = vld [vmem:[%s5331_s5 + $0x210] sm:$0xff] }
 0x2c4   :  { %v1943_v8 = vadd.f32 %v1906_v7, %v1783_v19  ;;  %v1910_v5 = vpop.permute.xlu1 %1909  ;;  %v2641_v19 = vld [vmem:[%s5331_s5 + $0x2e8] sm:$0xff]  ;;  %v1689_v7 = vadd.f32 %v1654_v26, %v5613_v60  ;;  %v2606_v26 = vld [vmem:[%s5331_s5 + $0x290] sm:$0xff]  ;;  %v5616_v60 = vld [vmem:[#allocation42_spill] sm:$0xff] }
 0x2c5   :  { %2498 = vmatpush.msrb.mxu2 %v2480_v31  ;;  %2534 = vmatpush.msra.mxu3 %v2508_v39  ;;  %v5612_v31 = vld [vmem:[#allocation74_spill] sm:$0xff]  ;;  %v2262_v39 = vsel %vm2230_vm14, %v2214_v49, %v2246_v59 }
 0x2c6   :  { %v2039_v3 = vadd.f32 %v2023_v35, %v1943_v8  ;;  %2976 = vmatmul.msk.f32.vlgmr.msra.gmra.mxu3 %vm552_vm1, %v2277_v50  ;;  %v1514_v58 = vmul.f32 %v5612_v31, %v5611_v46  ;;  %v2540_v35 = vld [vmem:[%s5331_s5 + $0x200] sm:$0xff]  ;;  %v1785_v48 = vadd.f32 %v1769_v63, %v1689_v7  ;;  %v5614_v8 = vld [vmem:[#allocation61_spill] sm:$0xff] }
 0x2c7   :  { %2499 = vmatpush.msrb.mxu2 %v2479_v62  ;;  %2591 = vmatpush.msrb.mxu3 %v2579_v52  ;;  %v2137_v52 = vpop.f32.mrf.mxu1  ;;  %v5615_v63 = vld [vmem:[#allocation90_spill] sm:$0xff] }
 0x2c8   :  { %v5064_v36 = vadd.f32 %v2164_v57, %v2039_v3  ;;  %v1530_v50 = vadd.f32 %v1514_v58, %v5614_v8  ;;  %v2611_v57 = vld [vmem:[%s5331_s5 + $0x2b8] sm:$0xff] }
 0x2c9   :  { %2500 = vmatpush.msrb.mxu2 %v2478_v18  ;;  %2592 = vmatpush.msrb.mxu3 %v2578_v10  ;;  %v2278_v18 = vmul.f32 1.4142135, %v2262_v39  ;;  %v1747_v10 = vpop.permute.xlu0 %1746  ;;  %v2675_v58 = vld [vmem:[%s5331_s5 + $0x338] sm:$0xff] }
 0x2ca   :  { %v2196_v38 = vmul.f32 0.04134491, %v5064_v36  ;;  %v2610_v36 = vld [vmem:[%s5331_s5 + $0x2b0] sm:$0xff]  ;;  %v1770_v24 = vmul.f32 0.0, %v1747_v10  ;;  %v2701_v10 = vld [vmem:[%s5331_s5 + $0x348] sm:$0xff] }
 0x2cb   :  { %2501 = vmatpush.msrb.mxu2 %v2477_v21  ;;  %2593 = vmatpush.msrb.mxu3 %v2577_v37  ;;  %v1995_v33 = vpop.permute.xlu2 %1994  ;;  %v2639_v21 = vld [vmem:[%s5331_s5 + $0x2d8] sm:$0xff]  ;;  %v1945_v37 = vadd.f32 %v1910_v5, %v1785_v48  ;;  %v1515_v5 = vmul.f32 %v5615_v63, %v4646_v56  ;;  %v2766_v63 = vld [vmem:[%s5331_s5 + $0x3d0] sm:$0xff] }
 0x2cc   :  { %v2024_v14 = vmul.f32 0.0, %v1995_v33  ;;  %v2166_v33 = vmul.f32 %v4767_v34, %v2137_v52  ;;  %v2674_v52 = vld [vmem:[%s5331_s5 + $0x330] sm:$0xff] }
 0x2cd   :  { %2502 = vmatpush.msrb.mxu2 %v2476_v13  ;;  %2594 = vmatpush.msrb.mxu3 %v2576_v41  ;;  %v2638_v41 = vld [vmem:[%s5331_s5 + $0x2d0] sm:$0xff]  ;;  %v1531_v7 = vadd.f32 %v1515_v5, %v5616_v60  ;;  %v2737_v5 = vld [vmem:[%s5331_s5 + $0x3a8] sm:$0xff] }
 0x2ce   :  { %2975 = vmatmul.msk.f32.vlgmr.msrb.gmra.mxu2 %vm552_vm1, %v2276_v25  ;;  %v2040_v11 = vadd.f32 %v2024_v14, %v1944_v47  ;;  %v1912_v25 = vpop.permute.xlu1 %1911  ;;  %v2637_v47 = vld [vmem:[%s5331_s5 + $0x2c8] sm:$0xff] }
 0x2cf   :  { %2559 = vmatpush.msra.mxu2 %v2547_v40  ;;  %2595 = vmatpush.msrb.mxu3 %v2575_v20  ;;  %v2216_v20 = vadd.f32 %v4775_v2, %v2196_v38 }
 0x2d0   :  { %v2181_v6 = vadd.f32 %v2165_v45, %v2040_v11  ;;  %v2607_v11 = vld [vmem:[%s5331_s5 + $0x298] sm:$0xff] }
 0x2d1   :  { %2560 = vmatpush.msra.mxu2 %v2546_v17  ;;  %2596 = vmatpush.msrb.mxu3 %v2574_v22  ;;  %v2636_v17 = vld [vmem:[%s5331_s5 + $0x2c0] sm:$0xff]  ;;  %v2140_v22 = vpop.f32.mrf.mxu1  ;;  %v2248_v49 = vmul.f32 0.2, %v2216_v20  ;;  %vm2232_vm0 = vcmp.ge.f32.partialorder %v2216_v20, 0.0 }
 0x2d2   :  { %v2197_v53 = vmul.f32 0.04134491, %v2181_v6 }
 0x2d3   :  { %2561 = vmatpush.msra.mxu2 %v2545_v43  ;;  %2597 = vmatpush.msrb.mxu3 %v2573_v55  ;;  %v1656_v61 = vpop.permute.xlu2 %1655  ;;  %v2707_v55 = vld [vmem:[%s5331_s5 + $0x378] sm:$0xff]  ;;  %v2264_v59 = vsel %vm2232_vm0, %v2216_v20, %v2248_v49 }
 0x2d4   :  { %v2217_v62 = vadd.f32 %v4775_v2, %v2197_v53  ;;  %v1690_v1 = vadd.f32 %v1656_v61, %v1530_v50  ;;  %v2280_v31 = vmul.f32 1.4142135, %v2264_v59  ;;  %v2812_v50 = vld [vmem:[%s5332_s7 + $0x30] sm:$0xff] }
 0x2d5   :  { %2562 = vmatpush.msra.mxu2 %v2544_v44  ;;  %2598 = vmatpush.msrb.mxu3 %v2572_v42  ;;  %v2706_v44 = vld [vmem:[%s5331_s5 + $0x370] sm:$0xff] }
 0x2d6   :  { %2978 = vmatmul.msk.f32.vlgmr.msrb.gmra.mxu3 %vm552_vm1, %v2279_v23  ;;  %v2249_v54 = vmul.f32 0.2, %v2217_v62  ;;  %vm2233_vm15 = vcmp.ge.f32.partialorder %v2217_v62, 0.0  ;;  %v1786_v27 = vadd.f32 %v1770_v24, %v1690_v1  ;;  %v2167_v23 = vmul.f32 %v4767_v34, %v2140_v22  ;;  %v1751_v53 = vpop.permute.xlu1 %1750  ;;  %v2672_v1 = vld [vmem:[%s5331_s5 + $0x320] sm:$0xff] }
 0x2d7   :  { %2563 = vmatpush.msra.mxu2 %v2543_v4  ;;  %2655 = vmatpush.msra.mxu3 %v2643_v9  ;;  %v2605_v4 = vld [vmem:[%s5331_s5 + $0x288] sm:$0xff]  ;;  %v1771_v38 = vmul.f32 0.0, %v1751_v53  ;;  %v2767_v53 = vld [vmem:[%s5331_s5 + $0x3d8] sm:$0xff] }
 0x2d8   :  { %v2265_v29 = vsel %vm2233_vm15, %v2217_v62, %v2249_v54  ;;  %v1946_v51 = vadd.f32 %v1912_v25, %v1786_v27  ;;  %v2705_v9 = vld [vmem:[%s5331_s5 + $0x368] sm:$0xff]  ;;  %v2671_v25 = vld [vmem:[%s5331_s5 + $0x318] sm:$0xff]  ;;  %v2670_v27 = vld [vmem:[%s5331_s5 + $0x310] sm:$0xff] }
 0x2d9   :  { %2564 = vmatpush.msra.mxu2 %v2542_v32  ;;  %2656 = vmatpush.msra.mxu3 %v2642_v16  ;;  %v2281_v45 = vmul.f32 1.4142135, %v2265_v29  ;;  %v2604_v16 = vld [vmem:[%s5331_s5 + $0x280] sm:$0xff]  ;;  %v2143_v56 = vpop.f32.mrf.mxu1 }
 0x2db   :  { %2565 = vmatpush.msra.mxu2 %v2541_v15  ;;  %2657 = vmatpush.msra.mxu3 %v2641_v19  ;;  %v1999_v3 = vpop.permute.xlu2 %1998  ;;  %v2703_v19 = vld [vmem:[%s5331_s5 + $0x358] sm:$0xff] }
 0x2dc   :  { %v2025_v13 = vmul.f32 0.0, %v1999_v3 }
 0x2dd   :  { %2566 = vmatpush.msra.mxu2 %v2540_v35  ;;  %2658 = vmatpush.msra.mxu3 %v2640_v30  ;;  %v2702_v35 = vld [vmem:[%s5331_s5 + $0x350] sm:$0xff]  ;;  %v2813_v30 = vld [vmem:[%s5332_s7 + $0x38] sm:$0xff] }
 0x2de   :  { %2977 = vmatmul.msk.f32.vlgmr.msra.gmra.mxu2 %vm552_vm1, %v2278_v18  ;;  %v2041_v40 = vadd.f32 %v2025_v13, %v1945_v37  ;;  %v2673_v18 = vld [vmem:[%s5331_s5 + $0x328] sm:$0xff]  ;;  %2825 = vmatpush.msrb.mxu0 %v2813_v30  ;;  %v2700_v13 = vld [vmem:[%s5331_s5 + $0x340] sm:$0xff] }
 0x2df   :  { %2623 = vmatpush.msrb.mxu2 %v2611_v57  ;;  %2659 = vmatpush.msra.mxu3 %v2639_v21  ;;  %v1658_v42 = vpop.permute.xlu0 %1657 }
 0x2e0   :  { %v2182_v14 = vadd.f32 %v2166_v33, %v2041_v40  ;;  %v1691_v48 = vadd.f32 %v1658_v42, %v1531_v7  ;;  %2826 = vmatpush.msrb.mxu0 %v2812_v50  ;;  %v2771_v40 = vld [vmem:[%s5331_s5 + $0x3f8] sm:$0xff]  ;;  %v2811_v50 = vld [vmem:[%s5332_s7 + $0x28] sm:$0xff] }
 0x2e1   :  { %2624 = vmatpush.msrb.mxu2 %v2610_v36  ;;  %2660 = vmatpush.msra.mxu3 %v2638_v41  ;;  %v5617_v41 = vld [vmem:[#allocation37_spill] sm:$0xff]  ;;  %v2146_v22 = vpop.f32.mrf.mxu1 }
 0x2e2   :  { %v2198_v39 = vmul.f32 0.04134491, %v2182_v14  ;;  %v1787_v36 = vadd.f32 %v1771_v38, %v1691_v48  ;;  %v2770_v14 = vld [vmem:[%s5331_s5 + $0x3f0] sm:$0xff]  ;;  %v2732_v48 = vld [vmem:[%s5331_s5 + $0x380] sm:$0xff]  ;;  %2827 = vmatpush.msrb.mxu0 %v2811_v50 }
 0x2e3   :  { %2625 = vmatpush.msrb.mxu2 %v2609_v28  ;;  %2661 = vmatpush.msra.mxu3 %v2637_v47  ;;  %v2003_v43 = vpop.permute.xlu2 %2002  ;;  %v2808_v38 = vld [vmem:[%s5332_s7 + $0x10] sm:$0xff] }
 0x2e4   :  { %v2026_v6 = vmul.f32 0.0, %v2003_v43  ;;  %v2218_v57 = vadd.f32 %v4775_v2, %v2198_v39  ;;  %v2769_v43 = vld [vmem:[%s5331_s5 + $0x3e8] sm:$0xff]  ;;  %v2764_v39 = vld [vmem:[%s5331_s5 + $0x3c0] sm:$0xff] }
 0x2e5   :  { %2626 = vmatpush.msrb.mxu2 %v2608_v12  ;;  %2662 = vmatpush.msra.mxu3 %v2636_v17  ;;  %v2168_v12 = vmul.f32 %v4767_v34, %v2143_v56  ;;  %v2734_v56 = vld [vmem:[%s5331_s5 + $0x390] sm:$0xff] }
 0x2e6   :  { %2980 = vmatmul.msk.f32.vlgmr.msra.gmra.mxu3 %vm552_vm1, %v2281_v45  ;;  %v2042_v61 = vadd.f32 %v2026_v6, %v1946_v51  ;;  %v2250_v20 = vmul.f32 0.2, %v2218_v57  ;;  %vm2234_vm3 = vcmp.ge.f32.partialorder %v2218_v57, 0.0  ;;  %v2669_v45 = vld [vmem:[%s5331_s5 + $0x308] sm:$0xff] }
 0x2e7   :  { %2627 = vmatpush.msrb.mxu2 %v2607_v11  ;;  %2719 = vmatpush.msrb.mxu3 %v2707_v55  ;;  %v1755_v21 = vpop.permute.xlu0 %1754 }
 0x2e8   :  { %v2183_v32 = vadd.f32 %v2167_v23, %v2042_v61  ;;  %v1772_v29 = vmul.f32 0.0, %v1755_v21  ;;  %v2266_v55 = vsel %vm2234_vm3, %v2218_v57, %v2250_v20  ;;  %v2768_v23 = vld [vmem:[%s5331_s5 + $0x3e0] sm:$0xff]  ;;  %v2807_v21 = vld [vmem:[%s5332_s7 + $0x8] sm:$0xff] }
 0x2e9   :  { %2628 = vmatpush.msrb.mxu2 %v2606_v26  ;;  %2720 = vmatpush.msrb.mxu3 %v2706_v44  ;;  %v2668_v26 = vld [vmem:[%s5331_s5 + $0x300] sm:$0xff]  ;;  %v2282_v61 = vmul.f32 1.4142135, %v2266_v55 }
 0x2ea   :  { %v2199_v46 = vmul.f32 0.04134491, %v2183_v32 }
 0x2eb   :  { %2629 = vmatpush.msrb.mxu2 %v2605_v4  ;;  %2721 = vmatpush.msrb.mxu3 %v2705_v9  ;;  %v1660_v15 = vpop.permute.xlu2 %1659  ;;  %v2739_v4 = vld [vmem:[%s5331_s5 + $0x3b8] sm:$0xff]  ;;  %v2169_v9 = vmul.f32 %v4767_v34, %v2146_v22 }
 0x2ec   :  { %v2219_v62 = vadd.f32 %v4775_v2, %v2199_v46  ;;  %v1692_v24 = vadd.f32 %v1660_v15, %v5617_v41  ;;  %v2765_v46 = vld [vmem:[%s5331_s5 + $0x3c8] sm:$0xff] }
 0x2ed   :  { %2630 = vmatpush.msrb.mxu2 %v2604_v16  ;;  %2722 = vmatpush.msrb.mxu3 %v2704_v0  ;;  %v2738_v0 = vld [vmem:[%s5331_s5 + $0x3b0] sm:$0xff] }
 0x2ee   :  { %2979 = vmatmul.msk.f32.vlgmr.msrb.gmra.mxu2 %vm552_vm1, %v2280_v31  ;;  %vm2235_vm2 = vcmp.ge.f32.partialorder %v2219_v62, 0.0  ;;  %v2251_v8 = vmul.f32 0.2, %v2219_v62  ;;  %v1788_v11 = vadd.f32 %v1772_v29, %v1692_v24 }
 0x2ef   :  { %2687 = vmatpush.msra.mxu2 %v2675_v58  ;;  %2723 = vmatpush.msrb.mxu3 %v2703_v19  ;;  %v3076_v58 = vld [vmem:[%s5330_s4] ss:$0 sm:$0xff] }
 0x2f0   :  { %v2267_v3 = vsel %vm2235_vm2, %v2219_v62, %v2251_v8  ;;  %v1914_v37 = vpop.permute.xlu1 %1913  ;;  %v2736_v19 = vld [vmem:[%s5331_s5 + $0x3a0] sm:$0xff] }
 0x2f1   :  { %2688 = vmatpush.msra.mxu2 %v2674_v52  ;;  %2724 = vmatpush.msrb.mxu3 %v2702_v35  ;;  %v2283_v54 = vmul.f32 1.4142135, %v2267_v3  ;;  %v1947_v28 = vadd.f32 %v1914_v37, %v1787_v36  ;;  %v2733_v35 = vld [vmem:[%s5331_s5 + $0x388] sm:$0xff] }
 0x2f2   :  { %v2345_v57 = vpop.f32.mrf.mxu3 }
 0x2f3   :  { %2689 = vmatpush.msra.mxu2 %v2673_v18  ;;  %2725 = vmatpush.msrb.mxu3 %v2701_v10  ;;  %v2007_v33 = vpop.permute.xlu2 %2006  ;;  %v2810_v18 = vld [vmem:[%s5332_s7 + $0x20] sm:$0xff]  ;;  %v2809_v10 = vld [vmem:[%s5332_s7 + $0x18] sm:$0xff] }
 0x2f4   :  { %v2027_v47 = vmul.f32 0.0, %v2007_v33  ;;  %2828 = vmatpush.msrb.mxu0 %v2810_v18 }
 0x2f5   :  { %2690 = vmatpush.msra.mxu2 %v2672_v1  ;;  %2726 = vmatpush.msrb.mxu3 %v2700_v13  ;;  %v2806_v1 = vld [vmem:[%s5332_s7] sm:$0xff] }
 0x2f6   :  { %2982 = vmatmul.msk.f32.vlgmr.msrb.gmra.mxu3 %vm552_vm1, %v2283_v54  ;;  %v2043_v17 = vadd.f32 %v2027_v47, %v1947_v28  ;;  %2829 = vmatpush.msrb.mxu0 %v2809_v10 }
 0x2f7   :  { %2691 = vmatpush.msra.mxu2 %v2671_v25  ;;  %2783 = vmatpush.msra.mxu3 %v2771_v40 }
 0x2f8   :  { %v2184_v49 = vadd.f32 %v2168_v12, %v2043_v17  ;;  %v2011_v51 = vpop.permute.xlu1 %2010  ;;  %v1916_v6 = vpop.permute.xlu0 %1915  ;;  %2830 = vmatpush.msrb.mxu0 %v2808_v38 }
 0x2f9   :  { %2692 = vmatpush.msra.mxu2 %v2670_v27  ;;  %2784 = vmatpush.msra.mxu3 %v2770_v14  ;;  %v2028_v44 = vmul.f32 0.0, %v2011_v51  ;;  %v1948_v42 = vadd.f32 %v1916_v6, %v1788_v11 }
 0x2fa   :  { %v2200_v32 = vmul.f32 0.04134491, %v2184_v49  ;;  %2831 = vmatpush.msrb.mxu0 %v2807_v21 }
 0x2fb   :  { %2693 = vmatpush.msra.mxu2 %v2669_v45  ;;  %2785 = vmatpush.msra.mxu3 %v2769_v43  ;;  %v2044_v59 = vadd.f32 %v2028_v44, %v1948_v42 }
 0x2fc   :  { %v2220_v31 = vadd.f32 %v4775_v2, %v2200_v32  ;;  %v2735_v2 = vld [vmem:[%s5331_s5 + $0x398] sm:$0xff]  ;;  %2832 = vmatpush.msrb.mxu0 %v2806_v1 }
 0x2fd   :  { %2694 = vmatpush.msra.mxu2 %v2668_v26  ;;  %2786 = vmatpush.msra.mxu3 %v2768_v23  ;;  %v2185_v16 = vadd.f32 %v2169_v9, %v2044_v59 }
 0x2fe   :  { %2981 = vmatmul.msk.f32.vlgmr.msra.gmra.mxu2 %vm552_vm1, %v2282_v61  ;;  %v2252_v7 = vmul.f32 0.2, %v2220_v31  ;;  %vm2236_vm5 = vcmp.ge.f32.partialorder %v2220_v31, 0.0  ;;  %v3042_v61 = vld [vmem:[%s5333_s6] ss:$0 sm:$0xff] }
 0x2ff   :  { %2751 = vmatpush.msrb.mxu2 %v2739_v4  ;;  %2787 = vmatpush.msra.mxu3 %v2767_v53  ;;  %v2201_v34 = vmul.f32 0.04134491, %v2185_v16  ;;  %v3043_v16 = vld [vmem:[%s5334_s8] ss:$0 sm:$0xff] }
 0x300   :  { %v2268_v30 = vsel %vm2236_vm5, %v2220_v31, %v2252_v7 }
 0x301   :  { %2752 = vmatpush.msrb.mxu2 %v2738_v0  ;;  %2788 = vmatpush.msra.mxu3 %v2766_v63  ;;  %v2221_v15 = vadd.f32 %v3076_v58, %v2201_v34  ;;  %v2284_v8 = vmul.f32 1.4142135, %v2268_v30  ;;  %v2843_v34 = vld [vmem:[%s5335_s9] sm:$0xff] }
 0x303   :  { %2753 = vmatpush.msrb.mxu2 %v2737_v5  ;;  %2789 = vmatpush.msra.mxu3 %v2765_v46  ;;  %vm2237_vm4 = vcmp.ge.f32.partialorder %v2221_v15, 0.0  ;;  %v2253_v60 = vmul.f32 0.2, %v2221_v15 }
 0x305   :  { %2754 = vmatpush.msrb.mxu2 %v2736_v19  ;;  %2790 = vmatpush.msra.mxu3 %v2764_v39  ;;  %v2269_v62 = vsel %vm2237_vm4, %v2221_v15, %v2253_v60 }
 0x306   :  { %v2285_v52 = vmul.f32 1.4142135, %v2269_v62 }
 0x307   :  { %2755 = vmatpush.msrb.mxu2 %v2735_v2 }
 0x308   :  { %2984 = vmatmul.msk.f32.vlgmr.msra.gmra.mxu3 %vm552_vm1, %v2285_v52 }
 0x309   :  { %2756 = vmatpush.msrb.mxu2 %v2734_v56 }
 0x30b   :  { %2757 = vmatpush.msrb.mxu2 %v2733_v35 }
 0x30d   :  { %2758 = vmatpush.msrb.mxu2 %v2732_v48 }
 0x30e   :  { %2983 = vmatmul.msk.f32.vlgmr.msrb.gmra.mxu2 %vm552_vm1, %v2284_v8 }
 0x331   :  { %v2322_v3 = vpop.f32.mrf.mxu2 }
 0x332   :  { %v2346_v41 = vadd.f32 %v2345_v57, %v2322_v3 }
 0x339   :  { %v2408_v37 = vpop.f32.mrf.mxu3  ;;  %v2376_v54 = vpop.f32.mrf.mxu2 }
 0x33a   :  { %v2379_v24 = vadd.f32 %v2376_v54, %v2346_v41 }
 0x33c   :  { %v2411_v40 = vadd.f32 %v2408_v37, %v2379_v24 }
 0x341   :  { %v2472_v13 = vpop.f32.mrf.mxu3  ;;  %v2440_v36 = vpop.f32.mrf.mxu2 }
 0x342   :  { %v2443_v20 = vadd.f32 %v2440_v36, %v2411_v40 }
 0x344   :  { %v2475_v28 = vadd.f32 %v2472_v13, %v2443_v20 }
 0x349   :  { %v2536_v25 = vpop.f32.mrf.mxu3 }
 0x351   :  { %v2504_v33 = vpop.f32.mrf.mxu2 }
 0x352   :  { %v2507_v27 = vadd.f32 %v2504_v33, %v2475_v28 }
 0x354   :  { %v2539_v14 = vadd.f32 %v2536_v25, %v2507_v27 }
 0x359   :  { %v2600_v47 = vpop.f32.mrf.mxu3 }
 0x361   :  { %v2568_v29 = vpop.f32.mrf.mxu2 }
 0x362   :  { %v2571_v12 = vadd.f32 %v2568_v29, %v2539_v14 }
 0x364   :  { %v2603_v45 = vadd.f32 %v2600_v47, %v2571_v12 }
 0x369   :  { %v2664_v17 = vpop.f32.mrf.mxu3 }
 0x371   :  { %v2632_v22 = vpop.f32.mrf.mxu2 }
 0x372   :  { %v2635_v11 = vadd.f32 %v2632_v22, %v2603_v45 }
 0x374   :  { %v2667_v49 = vadd.f32 %v2664_v17, %v2635_v11 }
 0x379   :  { %v2728_v43 = vpop.f32.mrf.mxu3 }
 0x381   :  { %v2696_v55 = vpop.f32.mrf.mxu2 }
 0x382   :  { %v2699_v51 = vadd.f32 %v2696_v55, %v2667_v49 }
 0x384   :  { %v2731_v6 = vadd.f32 %v2728_v43, %v2699_v51 }
 0x38b   :  { %v2792_v44 = vpop.f32.mrf.mxu3 }
 0x391   :  { %v2760_v26 = vpop.f32.mrf.mxu2 }
 0x392   :  { %v2763_v42 = vadd.f32 %v2760_v26, %v2731_v6 }
 0x394   :  { %v2795_v23 = vadd.f32 %v2792_v44, %v2763_v42 }
 0x396   :  { %v2796_v4 = vmul.f32 0.03125, %v2795_v23 }
 0x398   :  { %v2801_v9 = vadd.f32 %v3042_v61, %v2796_v4 }
 0x39a   :  { %vm2802_vm6 = vcmp.ge.f32.partialorder %v2801_v9, 0.0  ;;  %v2803_v59 = vmul.f32 0.2, %v2801_v9 }
 0x39c   :  { %v2804_v53 = vsel %vm2802_vm6, %v2801_v9, %v2803_v59 }
 0x39d   :  { %v2805_v32 = vmul.f32 1.4142135, %v2804_v53 }
 0x39f   :  { %2985 = vmatmul.msk.f32.vlgmr.msrb.gmra.mxu0 %vm552_vm1, %v2805_v32 }
 0x41c   :  { %v2834_v0 = vpop.f32.mrf.mxu0 }
 0x41d   :  { %v2837_v63 = vmul.f32 0.125, %v2834_v0 }
 0x41f   :  { %v2842_v5 = vadd.f32 %v3043_v16, %v2837_v63 }
 0x421   :  { %v2844_v46 = vmul.f32 %v2843_v34, %v2842_v5 }
 0x423   :  { %v2846_v31 = vsel %vm2845_vm7, %v2844_v46, 0.0 }
 0x424   :  { %2847 = vadd.xlane.f32.xlu2 %v2846_v31 }
 0x497   :  { %v2848_v58 = vpop.xlane.xlu2 %2847 }
 0x498   :  { %v2849_v15 = vmul.f32 0.17677669, %v2848_v58 }
 0x49a   :  { %2851 = vst.msk [vmem:[%s5336_s12] sm:$0xff] %vm2850_vm8, %v2849_v15 }

</bundles_post_ra>
